<compile_context>
chip_gen: v6e
topology: v6e:2x2x1
jax: 0.10.0
libtpu: 0.0.40
codegen_flags: <defaults>
</compile_context>

<pallas_src>
import numpy as np

import jax
import jax.numpy as jnp
from jax.experimental import pallas as pl
from jax.experimental.pallas import tpu as pltpu


def _gaussian_1d(window_size: int, sigma: float = 1.5) -> np.ndarray:
    """1D Gaussian identical to SSIM._create_window's _gaussian (normalized)."""
    coords = np.arange(window_size, dtype=np.float32)
    center = window_size // 2
    g = np.exp(-((coords - center) ** 2) / (2.0 * sigma ** 2)).astype(np.float32)
    return (g / g.sum()).astype(np.float32)


def _vmem_limit_and_megacore():
    """Per-generation VMEM limit (bytes) and whether to keep an even, >=2-step
    grid so v7x's two TensorCores both get work.  Unknown chips fall back to
    conservative settings that are safe everywhere."""
    cap_bytes = None
    try:
        cap_bytes = int(getattr(pltpu.get_tpu_info(), "vmem_capacity_bytes", 0)) or None
    except Exception:
        cap_bytes = None
    kind = ""
    try:
        kind = jax.devices()[0].device_kind.lower()
    except Exception:
        pass
    is_v7x = "7" in kind
    if (cap_bytes is not None) and (cap_bytes >= (128 << 20)) and not is_v7x:
        # v5e / v6e: 128 MiB physical VMEM, single TensorCore -> big blocks.
        return 96 << 20, False
    # v7x (64 MiB / TC, 2 TCs) or unknown chip: stay conservative, feed both cores.
    return 40 << 20, True


def _choose_planes_per_block(n_planes: int, per_plane_bytes: int,
                             budget_bytes: int, prefer_multi_step: bool) -> int:
    """Largest plane-block size fitting the VMEM budget.  Planes are padded up
    to a multiple of P by the caller, so P need not divide n_planes."""
    cap = max(1, int(budget_bytes) // max(int(per_plane_bytes), 1))
    cap = min(cap, n_planes)
    if prefer_multi_step and n_planes >= 2:
        # At least 2 grid steps, and an even number of blocks when possible,
        # so the 'parallel' axis load-balances across v7x's 2 TensorCores.
        cap = max(1, min(cap, n_planes // 2))
        p = cap
        while p > 1 and (-(-n_planes // p)) % 2 != 0:   # cdiv(n_planes, p) odd
            p -= 1
        return max(p, 1)
    return max(cap, 1)


def _make_ssim_kernel(g1d: np.ndarray, ws: int, P: int, H: int, W: int, pad: int):
    """Per-grid-step kernel over P planes. 1D window taps baked as immediates."""
    C1 = 0.01 ** 2
    C2 = 0.03 ** 2
    wv = [float(v) for v in g1d]          # separable taps (python floats)
    half = ws // 2                        # Gaussian is symmetric: wv[j]==wv[ws-1-j]
    Hp, Wp = H + 2 * pad, W + 2 * pad

    def kernel(x1_ref, x2_ref, out_ref, pad_ref):
        # x1_ref/x2_ref: (P, H, W)   out_ref: (1, 1, P)   pad_ref: (5P, Hp, Wp)
        x1 = x1_ref[...]
        x2 = x2_ref[...]

        # Zero only the pad border strips: the interior is fully overwritten
        # below, and the full-scratch zero would double vst traffic.  (Zeroing
        # once at program_id==0 would be wrong on v7x megacore.)
        if pad > 0:
            zrows = jnp.zeros((5 * P, pad, Wp), jnp.float32)
            zcols = jnp.zeros((5 * P, Hp, pad), jnp.float32)
            pad_ref[:, 0:pad, :] = zrows
            pad_ref[:, pad + H:Hp, :] = zrows
            pad_ref[:, :, 0:pad] = zcols
            pad_ref[:, :, pad + W:Wp] = zcols

        # Zero-padded stack of the five conv inputs (padding stays in VMEM).
        pad_ref[0 * P:1 * P, pad:pad + H, pad:pad + W] = x1
        pad_ref[1 * P:2 * P, pad:pad + H, pad:pad + W] = x2
        pad_ref[2 * P:3 * P, pad:pad + H, pad:pad + W] = x1 * x1
        pad_ref[3 * P:4 * P, pad:pad + H, pad:pad + W] = x2 * x2
        pad_ref[4 * P:5 * P, pad:pad + H, pad:pad + W] = x1 * x2
        z = pad_ref[...]

        # Separable Gaussian (outer(g, g) == 2D window) with tap symmetry:
        # (half + 1) multiplies per pass instead of ws, shared by all 5P maps.
        acc_h = wv[half] * z[:, :, half:half + W]
        for j in range(half):
            acc_h = acc_h + wv[j] * (z[:, :, j:j + W]
                                     + z[:, :, ws - 1 - j:ws - 1 - j + W])
        acc = wv[half] * acc_h[:, half:half + H, :]
        for i in range(half):
            acc = acc + wv[i] * (acc_h[:, i:i + H, :]
                                 + acc_h[:, ws - 1 - i:ws - 1 - i + H, :])

        mu1 = acc[0 * P:1 * P]
        mu2 = acc[1 * P:2 * P]
        e11 = acc[2 * P:3 * P]
        e22 = acc[3 * P:4 * P]
        e12 = acc[4 * P:5 * P]

        mu1_sq = mu1 * mu1
        mu2_sq = mu2 * mu2
        mu1_mu2 = mu1 * mu2
        sigma1_sq = e11 - mu1_sq
        sigma2_sq = e22 - mu2_sq
        sigma12 = e12 - mu1_mu2

        num = (2.0 * mu1_mu2 + C1) * (2.0 * sigma12 + C2)
        den = (mu1_sq + mu2_sq + C1) * (sigma1_sq + sigma2_sq + C2)
        # den >= C1*C2 > 0.  EUP approx reciprocal seed (free slot) + one
        # Newton step restores ~f32 accuracy well inside the 1e-4 tolerance.
        inv0 = pl.reciprocal(den, approx=True)
        inv = inv0 * (2.0 - den * inv0)
        ssim = num * inv

        # Fused reduction: only a lane-dense row of per-plane sums leaves VMEM.
        sums = jnp.sum(jnp.sum(ssim, axis=2), axis=1)        # (P,)
        out_ref[...] = jnp.reshape(sums, (1, 1, P))

    return kernel


def ssim_loss(img1: jax.Array, img2: jax.Array,
              window_size: int = 5, size_average: bool = True) -> jax.Array:
    """1 - SSIM(img1, img2), matching the PyTorch SSIM.forward semantics."""
    assert img1.shape == img2.shape and img1.ndim == 4
    assert window_size % 2 == 1, "window_size must be odd (same-size conv output)"
    B, C, H, W = img1.shape
    pad = window_size // 2
    Hp, Wp = H + 2 * pad, W + 2 * pad
    nP = B * C

    x1 = img1.astype(jnp.float32).reshape(nP, H, W)
    x2 = img2.astype(jnp.float32).reshape(nP, H, W)

    vmem_limit, prefer_multi_step = _vmem_limit_and_megacore()

    # Rough per-plane VMEM footprint: double-buffered inputs, padded 5-stack,
    # horizontal-pass temp, and ~12 live (H, W) f32 temporaries.
    per_plane_bytes = 4 * (2 * 2 * H * W + 5 * Hp * Wp + 5 * Hp * W + 12 * H * W)
    budget_bytes = max(vmem_limit - (2 << 20), 1 << 20)
    P = _choose_planes_per_block(nP, per_plane_bytes, budget_bytes, prefer_multi_step)
    n_blocks = -(-nP // P)                    # cdiv
    nP_pad = n_blocks * P
    if nP_pad != nP:
        # Pad with zero planes so P need not divide B*C; their sums are dropped.
        x1 = jnp.pad(x1, ((0, nP_pad - nP), (0, 0), (0, 0)))
        x2 = jnp.pad(x2, ((0, nP_pad - nP), (0, 0), (0, 0)))

    g1d = _gaussian_1d(window_size, 1.5)
    kernel = _make_ssim_kernel(g1d, window_size, P, H, W, pad)

    in_spec = pl.BlockSpec((P, H, W), lambda p: (p, 0, 0))
    out_spec = pl.BlockSpec((1, 1, P), lambda p: (p, 0, 0))   # lane-dense output

    plane_sums = pl.pallas_call(
        kernel,
        out_shape=jax.ShapeDtypeStruct((n_blocks, 1, P), jnp.float32),
        grid_spec=pltpu.PrefetchScalarGridSpec(
            num_scalar_prefetch=0,
            grid=(n_blocks,),
            in_specs=[in_spec, in_spec],
            out_specs=out_spec,
            scratch_shapes=[pltpu.VMEM((5 * P, Hp, Wp), jnp.float32)],
        ),
        compiler_params=pltpu.CompilerParams(
            dimension_semantics=("parallel",),
            vmem_limit_bytes=int(vmem_limit)),
    )(x1, x2)

    plane_sums = plane_sums.reshape(nP_pad)[:nP]
    if size_average:
        ssim_value = jnp.sum(plane_sums) / (nP * H * W)
    else:
        # matches ssim_map.mean(1).mean(1).mean(1) -> per-batch scalar
        ssim_value = plane_sums.reshape(B, C).sum(axis=1) / (C * H * W)
    return 1.0 - ssim_value


def _ssim_reference(img1, img2, window_size=5):
    """Pure-JAX reference (grouped depthwise conv, same math as the module)."""
    B, C, H, W = img1.shape
    pad = window_size // 2
    g = _gaussian_1d(window_size, 1.5)
    w2d = np.outer(g, g).astype(np.float32)
    w = jnp.asarray(np.broadcast_to(w2d, (C, 1, window_size, window_size)).copy())

    def conv(x):
        return jax.lax.conv_general_dilated(
            x, w, window_strides=(1, 1), padding=((pad, pad), (pad, pad)),
            dimension_numbers=("NCHW", "OIHW", "NCHW"), feature_group_count=C)

    mu1, mu2 = conv(img1), conv(img2)
    mu1_sq, mu2_sq, mu1_mu2 = mu1 * mu1, mu2 * mu2, mu1 * mu2
    s1 = conv(img1 * img1) - mu1_sq
    s2 = conv(img2 * img2) - mu2_sq
    s12 = conv(img1 * img2) - mu1_mu2
    C1, C2 = 0.01 ** 2, 0.03 ** 2
    ssim_map = ((2 * mu1_mu2 + C1) * (2 * s12 + C2)
                / ((mu1_sq + mu2_sq + C1) * (s1 + s2 + C2)))
    return 1.0 - jnp.mean(ssim_map)


if __name__ == "__main__":
    key = jax.random.PRNGKey(0)
    k1, k2 = jax.random.split(key)
    B, C, H, W = 2, 4, 16, 16
    img1 = jax.random.uniform(k1, (B, C, H, W), dtype=jnp.float32)
    img2 = jax.random.uniform(k2, (B, C, H, W), dtype=jnp.float32)

    loss = ssim_loss(img1, img2, window_size=5, size_average=True)
    loss = jax.block_until_ready(loss)

    ref = jax.block_until_ready(_ssim_reference(img1, img2, window_size=5))
    assert abs(float(loss) - float(ref)) < 1e-4, (float(loss), float(ref))

    # also exercise the size_average=False path once
    per_batch = jax.block_until_ready(
        ssim_loss(img1, img2, window_size=5, size_average=False))
    assert per_batch.shape == (B,)

    print("KERNEL_OK")
</pallas_src>

<mosaic_0001>
module attributes {stable_mosaic.version = 11 : i64} {
  func.func @kernel(%arg0: i32, %arg1: memref<4x16x16xf32, #tpu.memory_space<vmem>>, %arg2: memref<4x16x16xf32, #tpu.memory_space<vmem>>, %arg3: memref<1x1x4xf32, #tpu.memory_space<vmem>>, %arg4: memref<20x20x20xf32, #tpu.memory_space<vmem>>) attributes {dimension_semantics = [#tpu.dimension_semantics<parallel>], iteration_bounds = array<i64: 2>, scalar_prefetch = 0 : i64, scratch_operands = 1 : i64, tpu.core_type = #tpu.core_type<tc>, window_params = [{transform_indices = @transform_0, window_bounds = array<i64: 4, 16, 16>}, {transform_indices = @transform_1, window_bounds = array<i64: 4, 16, 16>}, {transform_indices = @transform_2, window_bounds = array<i64: 1, 1, 4>}]} {
    %c0 = arith.constant 0 : index
    %c0_0 = arith.constant 0 : index
    %c0_1 = arith.constant 0 : index
    %0 = vector.load %arg1[%c0, %c0_0, %c0_1] : memref<4x16x16xf32, #tpu.memory_space<vmem>>, vector<4x16x16xf32>
    %c0_2 = arith.constant 0 : index
    %c0_3 = arith.constant 0 : index
    %c0_4 = arith.constant 0 : index
    %1 = vector.load %arg2[%c0_2, %c0_3, %c0_4] : memref<4x16x16xf32, #tpu.memory_space<vmem>>, vector<4x16x16xf32>
    %cst = arith.constant 0.000000e+00 : f32
    %2 = vector.broadcast %cst : f32 to vector<20x2x20xf32>
    %cst_5 = arith.constant 0.000000e+00 : f32
    %3 = vector.broadcast %cst_5 : f32 to vector<20x20x2xf32>
    %c0_6 = arith.constant 0 : index
    %c0_7 = arith.constant 0 : index
    %c0_8 = arith.constant 0 : index
    %4 = vector.load %arg4[%c0_6, %c0_7, %c0_8] : memref<20x20x20xf32, #tpu.memory_space<vmem>>, vector<20x2x20xf32>
    tpu.vector_store %arg4[%c0_6, %c0_7, %c0_8], %2 {strides = array<i32>} : memref<20x20x20xf32, #tpu.memory_space<vmem>>, vector<20x2x20xf32>,
    %c0_9 = arith.constant 0 : index
    %c18 = arith.constant 18 : index
    %c0_10 = arith.constant 0 : index
    %5 = vector.load %arg4[%c0_9, %c18, %c0_10] : memref<20x20x20xf32, #tpu.memory_space<vmem>>, vector<20x2x20xf32>
    tpu.vector_store %arg4[%c0_9, %c18, %c0_10], %2 {strides = array<i32>} : memref<20x20x20xf32, #tpu.memory_space<vmem>>, vector<20x2x20xf32>,
    %c0_11 = arith.constant 0 : index
    %c0_12 = arith.constant 0 : index
    %c0_13 = arith.constant 0 : index
    %6 = vector.load %arg4[%c0_11, %c0_12, %c0_13] : memref<20x20x20xf32, #tpu.memory_space<vmem>>, vector<20x20x2xf32>
    tpu.vector_store %arg4[%c0_11, %c0_12, %c0_13], %3 {strides = array<i32>} : memref<20x20x20xf32, #tpu.memory_space<vmem>>, vector<20x20x2xf32>,
    %c0_14 = arith.constant 0 : index
    %c0_15 = arith.constant 0 : index
    %c18_16 = arith.constant 18 : index
    %7 = vector.load %arg4[%c0_14, %c0_15, %c18_16] : memref<20x20x20xf32, #tpu.memory_space<vmem>>, vector<20x20x2xf32>
    tpu.vector_store %arg4[%c0_14, %c0_15, %c18_16], %3 {strides = array<i32>} : memref<20x20x20xf32, #tpu.memory_space<vmem>>, vector<20x20x2xf32>,
    %c0_17 = arith.constant 0 : index
    %c2 = arith.constant 2 : index
    %c2_18 = arith.constant 2 : index
    %8 = vector.load %arg4[%c0_17, %c2, %c2_18] : memref<20x20x20xf32, #tpu.memory_space<vmem>>, vector<4x16x16xf32>
    tpu.vector_store %arg4[%c0_17, %c2, %c2_18], %0 {strides = array<i32>} : memref<20x20x20xf32, #tpu.memory_space<vmem>>, vector<4x16x16xf32>,
    %c4 = arith.constant 4 : index
    %c2_19 = arith.constant 2 : index
    %c2_20 = arith.constant 2 : index
    %9 = vector.load %arg4[%c4, %c2_19, %c2_20] : memref<20x20x20xf32, #tpu.memory_space<vmem>>, vector<4x16x16xf32>
    tpu.vector_store %arg4[%c4, %c2_19, %c2_20], %1 {strides = array<i32>} : memref<20x20x20xf32, #tpu.memory_space<vmem>>, vector<4x16x16xf32>,
    %10 = arith.mulf %0, %0 : vector<4x16x16xf32>
    %c8 = arith.constant 8 : index
    %c2_21 = arith.constant 2 : index
    %c2_22 = arith.constant 2 : index
    %11 = vector.load %arg4[%c8, %c2_21, %c2_22] : memref<20x20x20xf32, #tpu.memory_space<vmem>>, vector<4x16x16xf32>
    tpu.vector_store %arg4[%c8, %c2_21, %c2_22], %10 {strides = array<i32>} : memref<20x20x20xf32, #tpu.memory_space<vmem>>, vector<4x16x16xf32>,
    %12 = arith.mulf %1, %1 : vector<4x16x16xf32>
    %c12 = arith.constant 12 : index
    %c2_23 = arith.constant 2 : index
    %c2_24 = arith.constant 2 : index
    %13 = vector.load %arg4[%c12, %c2_23, %c2_24] : memref<20x20x20xf32, #tpu.memory_space<vmem>>, vector<4x16x16xf32>
    tpu.vector_store %arg4[%c12, %c2_23, %c2_24], %12 {strides = array<i32>} : memref<20x20x20xf32, #tpu.memory_space<vmem>>, vector<4x16x16xf32>,
    %14 = arith.mulf %0, %1 : vector<4x16x16xf32>
    %c16 = arith.constant 16 : index
    %c2_25 = arith.constant 2 : index
    %c2_26 = arith.constant 2 : index
    %15 = vector.load %arg4[%c16, %c2_25, %c2_26] : memref<20x20x20xf32, #tpu.memory_space<vmem>>, vector<4x16x16xf32>
    tpu.vector_store %arg4[%c16, %c2_25, %c2_26], %14 {strides = array<i32>} : memref<20x20x20xf32, #tpu.memory_space<vmem>>, vector<4x16x16xf32>,
    %c0_27 = arith.constant 0 : index
    %c0_28 = arith.constant 0 : index
    %c0_29 = arith.constant 0 : index
    %16 = vector.load %arg4[%c0_27, %c0_28, %c0_29] : memref<20x20x20xf32, #tpu.memory_space<vmem>>, vector<20x20x20xf32>
    %17 = vector.extract_strided_slice %16 {offsets = [0, 0, 2], sizes = [20, 20, 16], strides = [1, 1, 1]} : vector<20x20x20xf32> to vector<20x20x16xf32>
    %cst_30 = arith.constant 0.292081714 : f32
    %18 = vector.broadcast %cst_30 : f32 to vector<20x20x16xf32>
    %19 = arith.mulf %18, %17 : vector<20x20x16xf32>
    %20 = vector.extract_strided_slice %16 {offsets = [0, 0, 0], sizes = [20, 20, 16], strides = [1, 1, 1]} : vector<20x20x20xf32> to vector<20x20x16xf32>
    %21 = vector.extract_strided_slice %16 {offsets = [0, 0, 4], sizes = [20, 20, 16], strides = [1, 1, 1]} : vector<20x20x20xf32> to vector<20x20x16xf32>
    %22 = arith.addf %20, %21 : vector<20x20x16xf32>
    %cst_31 = arith.constant 0.120078392 : f32
    %23 = vector.broadcast %cst_31 : f32 to vector<20x20x16xf32>
    %24 = arith.mulf %23, %22 : vector<20x20x16xf32>
    %25 = arith.addf %19, %24 : vector<20x20x16xf32>
    %26 = vector.extract_strided_slice %16 {offsets = [0, 0, 1], sizes = [20, 20, 16], strides = [1, 1, 1]} : vector<20x20x20xf32> to vector<20x20x16xf32>
    %27 = vector.extract_strided_slice %16 {offsets = [0, 0, 3], sizes = [20, 20, 16], strides = [1, 1, 1]} : vector<20x20x20xf32> to vector<20x20x16xf32>
    %28 = arith.addf %26, %27 : vector<20x20x16xf32>
    %cst_32 = arith.constant 0.233880743 : f32
    %29 = vector.broadcast %cst_32 : f32 to vector<20x20x16xf32>
    %30 = arith.mulf %29, %28 : vector<20x20x16xf32>
    %31 = arith.addf %25, %30 : vector<20x20x16xf32>
    %32 = vector.extract_strided_slice %31 {offsets = [0, 2, 0], sizes = [20, 16, 16], strides = [1, 1, 1]} : vector<20x20x16xf32> to vector<20x16x16xf32>
    %cst_33 = arith.constant 0.292081714 : f32
    %33 = vector.broadcast %cst_33 : f32 to vector<20x16x16xf32>
    %34 = arith.mulf %33, %32 : vector<20x16x16xf32>
    %35 = vector.extract_strided_slice %31 {offsets = [0, 0, 0], sizes = [20, 16, 16], strides = [1, 1, 1]} : vector<20x20x16xf32> to vector<20x16x16xf32>
    %36 = vector.extract_strided_slice %31 {offsets = [0, 4, 0], sizes = [20, 16, 16], strides = [1, 1, 1]} : vector<20x20x16xf32> to vector<20x16x16xf32>
    %37 = arith.addf %35, %36 : vector<20x16x16xf32>
    %cst_34 = arith.constant 0.120078392 : f32
    %38 = vector.broadcast %cst_34 : f32 to vector<20x16x16xf32>
    %39 = arith.mulf %38, %37 : vector<20x16x16xf32>
    %40 = arith.addf %34, %39 : vector<20x16x16xf32>
    %41 = vector.extract_strided_slice %31 {offsets = [0, 1, 0], sizes = [20, 16, 16], strides = [1, 1, 1]} : vector<20x20x16xf32> to vector<20x16x16xf32>
    %42 = vector.extract_strided_slice %31 {offsets = [0, 3, 0], sizes = [20, 16, 16], strides = [1, 1, 1]} : vector<20x20x16xf32> to vector<20x16x16xf32>
    %43 = arith.addf %41, %42 : vector<20x16x16xf32>
    %cst_35 = arith.constant 0.233880743 : f32
    %44 = vector.broadcast %cst_35 : f32 to vector<20x16x16xf32>
    %45 = arith.mulf %44, %43 : vector<20x16x16xf32>
    %46 = arith.addf %40, %45 : vector<20x16x16xf32>
    %47 = vector.extract_strided_slice %46 {offsets = [0, 0, 0], sizes = [4, 16, 16], strides = [1, 1, 1]} : vector<20x16x16xf32> to vector<4x16x16xf32>
    %48 = vector.extract_strided_slice %46 {offsets = [4, 0, 0], sizes = [4, 16, 16], strides = [1, 1, 1]} : vector<20x16x16xf32> to vector<4x16x16xf32>
    %49 = vector.extract_strided_slice %46 {offsets = [8, 0, 0], sizes = [4, 16, 16], strides = [1, 1, 1]} : vector<20x16x16xf32> to vector<4x16x16xf32>
    %50 = vector.extract_strided_slice %46 {offsets = [12, 0, 0], sizes = [4, 16, 16], strides = [1, 1, 1]} : vector<20x16x16xf32> to vector<4x16x16xf32>
    %51 = vector.extract_strided_slice %46 {offsets = [16, 0, 0], sizes = [4, 16, 16], strides = [1, 1, 1]} : vector<20x16x16xf32> to vector<4x16x16xf32>
    %52 = arith.mulf %47, %47 : vector<4x16x16xf32>
    %53 = arith.mulf %48, %48 : vector<4x16x16xf32>
    %54 = arith.mulf %47, %48 : vector<4x16x16xf32>
    %55 = arith.subf %49, %52 : vector<4x16x16xf32>
    %56 = arith.subf %50, %53 : vector<4x16x16xf32>
    %57 = arith.subf %51, %54 : vector<4x16x16xf32>
    %cst_36 = arith.constant 2.000000e+00 : f32
    %58 = vector.broadcast %cst_36 : f32 to vector<4x16x16xf32>
    %59 = arith.mulf %58, %54 : vector<4x16x16xf32>
    %cst_37 = arith.constant 9.99999974E-5 : f32
    %60 = vector.broadcast %cst_37 : f32 to vector<4x16x16xf32>
    %61 = arith.addf %59, %60 : vector<4x16x16xf32>
    %cst_38 = arith.constant 2.000000e+00 : f32
    %62 = vector.broadcast %cst_38 : f32 to vector<4x16x16xf32>
    %63 = arith.mulf %62, %57 : vector<4x16x16xf32>
    %cst_39 = arith.constant 8.99999984E-4 : f32
    %64 = vector.broadcast %cst_39 : f32 to vector<4x16x16xf32>
    %65 = arith.addf %63, %64 : vector<4x16x16xf32>
    %66 = arith.mulf %61, %65 : vector<4x16x16xf32>
    %67 = arith.addf %52, %53 : vector<4x16x16xf32>
    %cst_40 = arith.constant 9.99999974E-5 : f32
    %68 = vector.broadcast %cst_40 : f32 to vector<4x16x16xf32>
    %69 = arith.addf %67, %68 : vector<4x16x16xf32>
    %70 = arith.addf %55, %56 : vector<4x16x16xf32>
    %cst_41 = arith.constant 8.99999984E-4 : f32
    %71 = vector.broadcast %cst_41 : f32 to vector<4x16x16xf32>
    %72 = arith.addf %70, %71 : vector<4x16x16xf32>
    %73 = arith.mulf %69, %72 : vector<4x16x16xf32>
    %74 = tpu.reciprocal %73 {approx = true} : vector<4x16x16xf32> -> vector<4x16x16xf32>
    %75 = arith.mulf %73, %74 : vector<4x16x16xf32>
    %cst_42 = arith.constant 2.000000e+00 : f32
    %76 = vector.broadcast %cst_42 : f32 to vector<4x16x16xf32>
    %77 = arith.subf %76, %75 : vector<4x16x16xf32>
    %78 = arith.mulf %74, %77 : vector<4x16x16xf32>
    %79 = arith.mulf %66, %78 : vector<4x16x16xf32>
    %cst_43 = arith.constant dense<0.000000e+00> : vector<4x16xf32>
    %80 = vector.multi_reduction <add>, %79, %cst_43 [2] : vector<4x16x16xf32> to vector<4x16xf32>
    %cst_44 = arith.constant dense<0.000000e+00> : vector<4xf32>
    %81 = vector.multi_reduction <add>, %80, %cst_44 [1] : vector<4x16xf32> to vector<4xf32>
    %82 = vector.shape_cast %81 : vector<4xf32> to vector<1x1x4xf32>
    %c0_45 = arith.constant 0 : index
    %c0_46 = arith.constant 0 : index
    %c0_47 = arith.constant 0 : index
    %83 = vector.load %arg3[%c0_45, %c0_46, %c0_47] : memref<1x1x4xf32, #tpu.memory_space<vmem>>, vector<1x1x4xf32>
    tpu.vector_store %arg3[%c0_45, %c0_46, %c0_47], %82 {strides = array<i32>} : memref<1x1x4xf32, #tpu.memory_space<vmem>>, vector<1x1x4xf32>,
    return
  }
  func.func @transform_0(%arg0: i32) -> (i32, i32, i32) {
    %c0_i32 = arith.constant 0 : i32
    %c0_i32_0 = arith.constant 0 : i32
    %c0_i32_1 = arith.constant 0 : i32
    return %arg0, %c0_i32, %c0_i32_0 : i32, i32, i32
  }
  func.func @transform_1(%arg0: i32) -> (i32, i32, i32) {
    %c0_i32 = arith.constant 0 : i32
    %c0_i32_0 = arith.constant 0 : i32
    %c0_i32_1 = arith.constant 0 : i32
    return %arg0, %c0_i32, %c0_i32_0 : i32, i32, i32
  }
  func.func @transform_2(%arg0: i32) -> (i32, i32, i32) {
    %c0_i32 = arith.constant 0 : i32
    %c0_i32_0 = arith.constant 0 : i32
    %c0_i32_1 = arith.constant 0 : i32
    return %arg0, %c0_i32, %c0_i32_0 : i32, i32, i32
  }
}

</mosaic_0001>

<bundles_post_ra>
// kernel: tpu_custom_call.1
= control target key start
LH: loop header
LB: loop body
LE: loop exit
PB: predicated region body
PF: predicated region fallthrough
CT: control target
= control target key end

     0   :  { %7 = vsyncpa [#allocation4], 0  ;;  %s7081_s0 = inlined_call_operand.hbm [shape: f32[8,16,16], index: 0, kind: input, shape index: {}]   ;;  %s7082_s1 = inlined_call_operand.hbm [shape: f32[8,16,16], index: 1, kind: input, shape index: {}]   ;;  %s7083_s2 = inlined_call_operand.hbm [shape: f32[2,1,4], index: 2, kind: output, shape index: {}]  }
   0x1   :  { %9 = vsyncpa [#allocation4 + $0x1], 0 }
   0x2   :  { %10 = vsyncpa [#allocation7], 0 }
   0x3   :  { %12 = vsyncpa [#allocation7 + $0x1], 0 }
   0x4   :  { %13 = vsyncpa [#allocation5], 0 }
   0x5   :  { %15 = vsyncpa [#allocation5 + $0x1], 0  ;;  %s3968_s9 = smov 0   ;;  %s3970_s10 = smov 0  }
   0x6   :  { %s3972_s11 = smov 0   ;;  %s3974_s12 = smov 0  }
   0x7 LB: > { %s3989_s13 = sadd.s32 4294967295, %s3941_s12   ;;  %s3654_s14 = sadd.s32 4294967294, %s3941_s12   ;;  %s3941_s12 = sphi %s3974_s12, %s7689_s12   ;;  %s3937_s11 = sphi %s3972_s11, %s7688_s11   ;;  %s3933_s10 = sphi %s3970_s10, %s7687_s10   ;;  %s3929_s9 = sphi %s3968_s9, %s7686_s9  }
   0x8   : > { %s3993_s15 = sadd.s32 1, %s3941_s12   ;;  %s28_s16 = sadd.s32 1, %s3937_s11 }
   0x9   : > { %s25_s17 = ssub.s32 %s3941_s12, %s3993_s15  ;;  %p35_p0 = scmp.ne.s32.totalorder %s3937_s11, %s3933_s10 }
   0xa   : > { %p26_p1 = scmp.eq.s32.totalorder %s25_s17, 0  ;;  %p36_p2 = scmp.eq.s32.totalorder %s3941_s12, 0 }
   0xb   : > { %p41_p3 = scmp.ne.s32.totalorder %s3933_s10, %s3929_s9  ;;  %p42_p4 = scmp.eq.s32.totalorder %s3989_s13, 0 }
   0xc   : > { %s4005_s18 = scalar_select %p26_p1, %s3937_s11, %s28_s16  }
   0xd   : > { %p4007_p5 = por %p36_p2, %p35_p0  ;;  %p4011_p6 = por %p42_p4, %p41_p3 }
   0xe   : > { %p91_p7 = scmp.eq.s32.totalorder %s3989_s13, 1  ;;  %p97_p8 = scmp.eq.s32.totalorder %s3654_s14, 1 }
   0xf   : > { %s7180_s20 = scalar_select %p4011_p6, 1, 0 }
  0x10   : > { %p3692_p10 = scmp.lt.s32.totalorder %s3941_s12, 2  ;;  %p4018_p11 = por %p91_p7, %p35_p0 }
  0x11   : > { %p4022_p12 = por %p97_p8, %p41_p3  ;;  %s4027_s23 = sand.u32 1, %s3937_s11  }
  0x12   : > { %s7181_s21 = scalar_select %p4018_p11, 1, 0 }
  0x13   : > { %s7182_s22 = scalar_select %p4022_p12, 1, 0 }
  0x14   : > { %s3672_s24 = sshll.u32 %s3941_s12, 10  ;;  %s3657_s25 = sshll.u32 %s4027_s23, 6 }
  0x15   : > { %s4036_s28 = scalar_lea.hbm %s7081_s0, %s3672_s24  ;;  %s121_s29 = scalar_lea.vmem [#allocation3], %s3657_s25 }
  0x16   : > { %s129_s30 = sshll.u32 %s121_s29, 4  ;;  %p4042_p13 = pnand %p3692_p10, %p4007_p5  ;;  %s4046_s30 = int_to_ptr.vmem [resolvable:$true] %s129_s30 }
  0x17   : > { %s118_s4 = scalar_lea.sflag [#allocation4], %s4027_s23  ;;  %s3817_s5 = scalar_lea.hbm %s4036_s28, 1024 }
  0x18   : > { %p3818_p0 = scmp.ne.s32.totalorder %s4036_s28, %s3817_s5  ;;  %p3819_p1 = pneg %p4042_p13 }
  0x19   : > { %s3822_s8 = scalar_lea.hbm %s7081_s0, 2048  ;;  %p3823_p4 = scmp.lt.s32.totalorder %s4036_s28, %s7081_s0 }
  0x1a   : > { %p3820_p2 = pnand %p3819_p1, %p3818_p0  ;;  %p3824_p5 = scmp.lt.s32.totalorder %s3822_s8, %s3817_s5 }
  0x1c   : > { %p3821_p3 = pneg %p3820_p2  ;;  %p3825_p7 = por %p3824_p5, %p3823_p4 }
  0x1e   : > { %p3826_p8 = pnand %p3825_p7, %p3821_p3 }
  0x20   : > { %3829 = shalt.err (!%p3826_p8)
}
  0x21   : > { %s3830_s17 = scalar_lea.vmem %s4046_s30, 1024  ;;  %s3943_s19 = smov [#allocation3]  }
  0x22   : > { %p3831_p10 = scmp.ne.s32.totalorder %s4046_s30, %s3830_s17  ;;  %s3835_s26 = sshll.u32 %s3943_s19, 4  ;;  %s3836_s26 = int_to_ptr.vmem [resolvable:$false] %s3835_s26 }
  0x23   : > { %s3837_s27 = scalar_lea.vmem %s3836_s26, 2048  ;;  %p3838_p9 = scmp.lt.s32.totalorder %s4046_s30, %s3836_s26 }
  0x24   : > { %p3833_p0 = pnand %p3831_p10, %p3819_p1  ;;  %p3839_p12 = scmp.lt.s32.totalorder %s3837_s27, %s3830_s17 }
  0x26   : > { %p3834_p2 = pneg %p3833_p0  ;;  %p3840_p11 = por %p3839_p12, %p3838_p9 }
  0x28   : > { %p3841_p4 = pnand %p3840_p11, %p3834_p2 }
  0x2a   : > { %3844 = shalt.err (!%p3841_p4)
}
  0x2b   : > { %s3944_s29 = smov 128   ;;  %s3945_s5 = smov 8  }
  0x2c   : > { %3684 = dma.hbm_to_vmem [thread:$0]  (!%p4042_p13), %s4036_s28, 1024, %s4046_s30, %s118_s4, %s3944_s29, %s3944_s29, %s3945_s5  }
  0x2d   : > { %p3665_p9 = scmp.ge.s32.totalorder %s3941_s12, 1  ;;  %p159_p11 = scmp.lt.s32.totalorder %s3941_s12, 3 }
  0x2e   : > { %s4089_s14 = scalar_lea.hbm %s7082_s1, %s3672_s24  ;;  %s143_s16 = scalar_lea.vmem [#allocation6], %s3657_s25 }
  0x2f   : > { %p4080_p12 = pnand %p3665_p9, %p159_p11  ;;  %s151_s17 = sshll.u32 %s143_s16, 4  ;;  %s4093_s17 = int_to_ptr.vmem [resolvable:$true] %s151_s17 }
  0x30   : > { %s140_s28 = scalar_lea.sflag [#allocation7], %s4027_s23  ;;  %s3845_s30 = scalar_lea.hbm %s4089_s14, 1024 }
  0x31   : > { %p3846_p3 = scmp.ne.s32.totalorder %s4089_s14, %s3845_s30  ;;  %s3850_s24 = scalar_lea.hbm %s7082_s1, 2048 }
  0x32   : > { %p3851_p8 = scmp.lt.s32.totalorder %s4089_s14, %s7082_s1  ;;  %p3852_p10 = scmp.lt.s32.totalorder %s3850_s24, %s3845_s30 }
  0x33   : > { %p3848_p5 = pnand %p3846_p3, %p3819_p1 }
  0x34   : > { %p3853_p0 = por %p3852_p10, %p3851_p8 }
  0x35   : > { %p3849_p7 = pneg %p3848_p5 }
  0x37   : > { %p3854_p2 = pnand %p3853_p0, %p3849_p7 }
  0x39   : > { %3857 = shalt.err (!%p3854_p2)
}
  0x3a   : > { %s3858_s23 = scalar_lea.vmem %s4093_s17, 1024  ;;  %s3946_s25 = smov [#allocation6]  }
  0x3b   : > { %p3859_p4 = scmp.ne.s32.totalorder %s4093_s17, %s3858_s23  ;;  %s3863_s7 = sshll.u32 %s3946_s25, 4  ;;  %s3864_s7 = int_to_ptr.vmem [resolvable:$false] %s3863_s7 }
  0x3c   : > { %s3865_s8 = scalar_lea.vmem %s3864_s7, 2048  ;;  %p3866_p3 = scmp.lt.s32.totalorder %s4093_s17, %s3864_s7 }
  0x3d   : > { %p3861_p9 = pnand %p3859_p4, %p3819_p1  ;;  %p3867_p5 = scmp.lt.s32.totalorder %s3865_s8, %s3858_s23 }
  0x3f   : > { %p3862_p11 = pneg %p3861_p9  ;;  %p3868_p6 = por %p3867_p5, %p3866_p3 }
  0x41   : > { %p3869_p8 = pnand %p3868_p6, %p3862_p11 }
  0x43   : > { %3872 = shalt.err (!%p3869_p8)
}
  0x44   : > { %3687 = dma.hbm_to_vmem [thread:$0]  (!%p4042_p13), %s4089_s14, 1024, %s4093_s17, %s140_s28, %s3944_s29, %s3944_s29, %s3945_s5  }
  0x45   : > { %163 = sbr.rel (%p4080_p12) target bundleno = 1360 (0x550), region = 28 }
  0x4a   : > { %s4124_s16 = sand.u32 1, %s3933_s10   ;;  %p7185_p6 = scmp.ne.s32.totalorder %s7180_s20, 0 }
  0x4b   : > { %s3666_s30 = sshll.u32 %s4124_s16, 6  ;;  %s166_s4 = scalar_lea.sflag [#allocation4], %s4124_s16 }
  0x4c   : > { %s4128_s19 = scalar_lea.vmem [#allocation3], %s3666_s30 }
  0x4d   : > { %3916 = dma.done.wait (%p7185_p6), %s166_s4, 1024  }
  0x4e   : > { %3918 = vsyncadd (%p7185_p6), %s166_s4, 4294966272  ;;  %s175_s3 = scalar_lea.sflag [#allocation7], %s4124_s16  ;;  %s4135_s29 = scalar_lea.vmem [#allocation6], %s3666_s30 }
  0x4f   : > { %3920 = dma.done.wait (%p7185_p6), %s175_s3, 1024  }
  0x50   : > { %3922 = vsyncadd (%p7185_p6), %s175_s3, 4294966272  ;;  %vm221_vm0 = vcmask 156672   ;;  %vm262_vm1 = vcmask 15360   ;;  %vm324_vm2 = vcmask 162960   ;;  %v3947_v0 = vmov 0.0   ;;  %v4462_v1 = vld [vmem:[%s4128_s19] sm:$0xff] }
  0x51   : > { %222 = vst.msk [vmem:[#allocation2] sm:$0x3] %vm221_vm0, %v3947_v0  ;;  %223 = vst.msk [vmem:[#allocation2 + $0x18] sm:$0x3] %vm221_vm0, %v3947_v0  ;;  %vm265_vm3 = vcmask 11264   ;;  %vm327_vm4 = vcmask 158864   ;;  %v468_v17 = vmul.f32 %v4462_v1, %v4462_v1 }
  0x52   : > { %264 = vst.msk [vmem:[#allocation2 + $0x8] sm:$0xff] %vm262_vm1, %v3947_v0  ;;  %268 = vst.msk [vmem:[#allocation2 + $0x20] sm:$0xff] %vm262_vm1, %v3947_v0  ;;  %v4465_v2 = vld [vmem:[%s4128_s19 + $0x10] sm:$0xff]  ;;  %s3948_s20 = smov 2   ;;  %v206_v3 = vld [vmem:[%s4128_s19 + $0x8] sm:$0xff]  ;;  %vm418_vm5 = vcmask 146448  }
  0x53   : > { %224 = vst.msk [vmem:[#allocation2 + $0x30] sm:$0x3] %vm221_vm0, %v3947_v0  ;;  %225 = vst.msk [vmem:[#allocation2 + $0x48] sm:$0x3] %vm221_vm0, %v3947_v0  ;;  %394 = vrot.lane.b32.xlu0 %v4462_v1, %s3948_s20  ;;  %398 = vrot.lane.b32.xlu1 %v4465_v2, %s3948_s20  ;;  %v4473_v4 = vld [vmem:[%s4128_s19 + $0x18] sm:$0xff]  ;;  %v4479_v5 = vld [vmem:[%s4128_s19 + $0x20] sm:$0xff]  ;;  %v469_v18 = vmul.f32 %v206_v3, %v206_v3  ;;  %v470_v20 = vmul.f32 %v4465_v2, %v4465_v2 }
  0x54   : > { %226 = vst.msk [vmem:[#allocation2 + $0x60] sm:$0x3] %vm221_vm0, %v3947_v0  ;;  %227 = vst.msk [vmem:[#allocation2 + $0x78] sm:$0x3] %vm221_vm0, %v3947_v0  ;;  %v4482_v6 = vld [vmem:[%s4128_s19 + $0x28] sm:$0xff]  ;;  %v4489_v7 = vld [vmem:[%s4128_s19 + $0x38] sm:$0xff]  ;;  %v471_v19 = vmul.f32 %v4473_v4, %v4473_v4  ;;  %v472_v21 = vmul.f32 %v4479_v5, %v4479_v5 }
  0x55   : > { %228 = vst.msk [vmem:[#allocation2 + $0x90] sm:$0x3] %vm221_vm0, %v3947_v0  ;;  %229 = vst.msk [vmem:[#allocation2 + $0xa8] sm:$0x3] %vm221_vm0, %v3947_v0  ;;  %v4492_v8 = vld [vmem:[%s4128_s19 + $0x30] sm:$0xff]  ;;  %v213_v9 = vld [vmem:[%s4135_s29] sm:$0xff]  ;;  %v473_v22 = vmul.f32 %v4482_v6, %v4482_v6  ;;  %v475_v23 = vmul.f32 %v4489_v7, %v4489_v7 }
  0x56   : > { %230 = vst.msk [vmem:[#allocation2 + $0xc0] sm:$0x3] %vm221_vm0, %v3947_v0  ;;  %231 = vst.msk [vmem:[#allocation2 + $0xd8] sm:$0x3] %vm221_vm0, %v3947_v0  ;;  %v214_v10 = vld [vmem:[%s4135_s29 + $0x8] sm:$0xff]  ;;  %v216_v11 = vld [vmem:[%s4135_s29 + $0x18] sm:$0xff]  ;;  %v474_v24 = vmul.f32 %v4492_v8, %v4492_v8  ;;  %v517_v25 = vmul.f32 %v213_v9, %v213_v9  ;;  %v566_v33 = vmul.f32 %v213_v9, %v4462_v1 }
  0x57   : > { %232 = vst.msk [vmem:[#allocation2 + $0xf0] sm:$0x3] %vm221_vm0, %v3947_v0  ;;  %233 = vst.msk [vmem:[#allocation2 + $0x108] sm:$0x3] %vm221_vm0, %v3947_v0  ;;  %396 = vrot.lane.b32.xlu0 %v206_v3, %s3948_s20  ;;  %400 = vrot.lane.b32.xlu1 %v4473_v4, %s3948_s20  ;;  %v215_v12 = vld [vmem:[%s4135_s29 + $0x10] sm:$0xff]  ;;  %v217_v13 = vld [vmem:[%s4135_s29 + $0x20] sm:$0xff]  ;;  %v518_v26 = vmul.f32 %v214_v10, %v214_v10  ;;  %v520_v27 = vmul.f32 %v216_v11, %v216_v11 }
  0x58   : > { %234 = vst.msk [vmem:[#allocation2 + $0x120] sm:$0x3] %vm221_vm0, %v3947_v0  ;;  %235 = vst.msk [vmem:[#allocation2 + $0x138] sm:$0x3] %vm221_vm0, %v3947_v0  ;;  %v218_v14 = vld [vmem:[%s4135_s29 + $0x28] sm:$0xff]  ;;  %v220_v15 = vld [vmem:[%s4135_s29 + $0x38] sm:$0xff]  ;;  %v519_v28 = vmul.f32 %v215_v12, %v215_v12  ;;  %v521_v29 = vmul.f32 %v217_v13, %v217_v13  ;;  %v567_v34 = vmul.f32 %v214_v10, %v206_v3 }
  0x59   : > { %236 = vst.msk [vmem:[#allocation2 + $0x150] sm:$0x3] %vm221_vm0, %v3947_v0  ;;  %237 = vst.msk [vmem:[#allocation2 + $0x168] sm:$0x3] %vm221_vm0, %v3947_v0  ;;  %v219_v16 = vld [vmem:[%s4135_s29 + $0x30] sm:$0xff]  ;;  %v522_v30 = vmul.f32 %v218_v14, %v218_v14  ;;  %v524_v31 = vmul.f32 %v220_v15, %v220_v15  ;;  %v569_v35 = vmul.f32 %v216_v11, %v4473_v4  ;;  %s3949_s5 = smov 124  }
  0x5a   : > { %238 = vst.msk [vmem:[#allocation2 + $0x180] sm:$0x3] %vm221_vm0, %v3947_v0  ;;  %239 = vst.msk [vmem:[#allocation2 + $0x198] sm:$0x3] %vm221_vm0, %v3947_v0  ;;  %v523_v32 = vmul.f32 %v219_v16, %v219_v16  ;;  %v568_v36 = vmul.f32 %v215_v12, %v4465_v2  ;;  %v570_v37 = vmul.f32 %v217_v13, %v4479_v5  ;;  %s3950_s6 = smov 126   ;;  %s3951_s14 = smov 1  }
  0x5b   : > { %240 = vst.msk [vmem:[#allocation2 + $0x1b0] sm:$0x3] %vm221_vm0, %v3947_v0  ;;  %241 = vst.msk [vmem:[#allocation2 + $0x1c8] sm:$0x3] %vm221_vm0, %v3947_v0  ;;  %402 = vrot.lane.b32.xlu0 %v4479_v5, %s3948_s20  ;;  %404 = vrot.lane.b32.xlu1 %v4482_v6, %s3948_s20  ;;  %v571_v38 = vmul.f32 %v218_v14, %v4482_v6  ;;  %v573_v39 = vmul.f32 %v220_v15, %v4489_v7  ;;  %vm2115_vm6 = vcmask 1043456   ;;  %vm2557_vm7 = vcmask 1045504  }
  0x5c   : > { %242 = vst.msk [vmem:[#allocation2 + $0x12] sm:$0x3] %vm221_vm0, %v3947_v0  ;;  %243 = vst.msk [vmem:[#allocation2 + $0x2a] sm:$0x3] %vm221_vm0, %v3947_v0  ;;  %v572_v40 = vmul.f32 %v219_v16, %v4492_v8  ;;  %vm2898_vm8 = vcmask 1040384   ;;  %vm2376_vm9 = vcmask 1041408  }
  0x5d   : > { %244 = vst.msk [vmem:[#allocation2 + $0x42] sm:$0x3] %vm221_vm0, %v3947_v0  ;;  %245 = vst.msk [vmem:[#allocation2 + $0x5a] sm:$0x3] %vm221_vm0, %v3947_v0  ;;  %vm3419_vm10 = vcmask 130050   ;;  %vm3423_vm11 = vcmask 130048  }
  0x5e   : > { %246 = vst.msk [vmem:[#allocation2 + $0x72] sm:$0x3] %vm221_vm0, %v3947_v0  ;;  %247 = vst.msk [vmem:[#allocation2 + $0x8a] sm:$0x3] %vm221_vm0, %v3947_v0  ;;  %vm3427_vm12 = vcmask 123904   ;;  %vm3482_vm13 = vcmask 113712  }
  0x5f   : > { %248 = vst.msk [vmem:[#allocation2 + $0xa2] sm:$0x3] %vm221_vm0, %v3947_v0  ;;  %249 = vst.msk [vmem:[#allocation2 + $0xba] sm:$0x3] %vm221_vm0, %v3947_v0  ;;  %408 = vrot.lane.b32.xlu1 %v4489_v7, %s3948_s20  ;;  %406 = vrot.lane.b32.xlu0 %v4492_v8, %s3948_s20  ;;  %vm3489_vm14 = vcmask 179312   ;;  %vm3533_vm15 = vcmask 1041409  }
  0x60   : > { %250 = vst.msk [vmem:[#allocation2 + $0xd2] sm:$0x3] %vm221_vm0, %v3947_v0  ;;  %251 = vst.msk [vmem:[#allocation2 + $0xea] sm:$0x3] %vm221_vm0, %v3947_v0  ;;  %s3668_s17 = sshll.u32 %s3989_s13, 4  ;;  %s202_s28 = scalar_lea.vmem [#allocation8], %s4124_s16 }
  0x61   : > { %252 = vst.msk [vmem:[#allocation2 + $0x102] sm:$0x3] %vm221_vm0, %v3947_v0  ;;  %253 = vst.msk [vmem:[#allocation2 + $0x11a] sm:$0x3] %vm221_vm0, %v3947_v0  ;;  %s3565_s24 = sshll.u32 %s202_s28, 4  ;;  %s3563_s23 = scalar_lea.hbm %s7083_s2, %s3668_s17  ;;  %s3566_s24 = int_to_ptr.vmem [resolvable:$true] %s3565_s24 }
  0x62   : > { %254 = vst.msk [vmem:[#allocation2 + $0x132] sm:$0x3] %vm221_vm0, %v3947_v0  ;;  %255 = vst.msk [vmem:[#allocation2 + $0x14a] sm:$0x3] %vm221_vm0, %v3947_v0  ;;  %s3553_s25 = scalar_lea.sflag [#allocation5], %s4124_s16  ;;  %s3873_s7 = scalar_lea.vmem %s3566_s24, 16 }
  0x63   : > { %256 = vst.msk [vmem:[#allocation2 + $0x162] sm:$0x3] %vm221_vm0, %v3947_v0  ;;  %257 = vst.msk [vmem:[#allocation2 + $0x17a] sm:$0x3] %vm221_vm0, %v3947_v0  ;;  %435 = vrot.lane.b32.xlu0 %v213_v9, %s3948_s20  ;;  %437 = vrot.lane.b32.xlu1 %v214_v10, %s3948_s20  ;;  %p3874_p13 = scmp.ne.s32.totalorder %s3566_s24, %s3873_s7  ;;  %p7683_p1 = scmp.ne.s32.totalorder %s7181_s21, 0 }
  0x64   : > { %258 = vst.msk [vmem:[#allocation2 + $0x192] sm:$0x3] %vm221_vm0, %v3947_v0  ;;  %259 = vst.msk [vmem:[#allocation2 + $0x1aa] sm:$0x3] %vm221_vm0, %v3947_v0  ;;  %s3952_s8 = smov [#allocation8]  }
  0x65   : > { %260 = vst.msk [vmem:[#allocation2 + $0x1c2] sm:$0x3] %vm221_vm0, %v3947_v0  ;;  %261 = vst.msk [vmem:[#allocation2 + $0x1da] sm:$0x3] %vm221_vm0, %v3947_v0  ;;  %vm3535_vm0 = vcmask 1042434   ;;  %p3875_p12 = pnand %p3874_p13, %p7683_p1  ;;  %s3877_s30 = sshll.u32 %s3952_s8, 4  ;;  %s3878_s30 = int_to_ptr.vmem [resolvable:$false] %s3877_s30 }
  0x66   : > { %271 = vst.msk [vmem:[#allocation2 + $0x38] sm:$0xff] %vm262_vm1, %v3947_v0  ;;  %274 = vst.msk [vmem:[#allocation2 + $0x50] sm:$0xff] %vm262_vm1, %v3947_v0  ;;  %s3879_s13 = scalar_lea.vmem %s3878_s30, 32  ;;  %p3880_p10 = scmp.lt.s32.totalorder %s3566_s24, %s3878_s30 }
  0x67   : > { %277 = vst.msk [vmem:[#allocation2 + $0x68] sm:$0xff] %vm262_vm1, %v3947_v0  ;;  %280 = vst.msk [vmem:[#allocation2 + $0x80] sm:$0xff] %vm262_vm1, %v3947_v0  ;;  %441 = vrot.lane.b32.xlu1 %v216_v11, %s3948_s20  ;;  %439 = vrot.lane.b32.xlu0 %v215_v12, %s3948_s20  ;;  %p3876_p7 = pneg %p3875_p12  ;;  %p3881_p0 = scmp.lt.s32.totalorder %s3879_s13, %s3873_s7 }
  0x68   : > { %283 = vst.msk [vmem:[#allocation2 + $0x98] sm:$0xff] %vm262_vm1, %v3947_v0  ;;  %286 = vst.msk [vmem:[#allocation2 + $0xb0] sm:$0xff] %vm262_vm1, %v3947_v0 }
  0x69   : > { %289 = vst.msk [vmem:[#allocation2 + $0xc8] sm:$0xff] %vm262_vm1, %v3947_v0  ;;  %292 = vst.msk [vmem:[#allocation2 + $0xe0] sm:$0xff] %vm262_vm1, %v3947_v0  ;;  %p3882_p2 = por %p3881_p0, %p3880_p10 }
  0x6a   : > { %295 = vst.msk [vmem:[#allocation2 + $0xf8] sm:$0xff] %vm262_vm1, %v3947_v0  ;;  %298 = vst.msk [vmem:[#allocation2 + $0x110] sm:$0xff] %vm262_vm1, %v3947_v0 }
  0x6b   : > { %301 = vst.msk [vmem:[#allocation2 + $0x128] sm:$0xff] %vm262_vm1, %v3947_v0  ;;  %304 = vst.msk [vmem:[#allocation2 + $0x140] sm:$0xff] %vm262_vm1, %v3947_v0  ;;  %443 = vrot.lane.b32.xlu0 %v217_v13, %s3948_s20  ;;  %445 = vrot.lane.b32.xlu1 %v218_v14, %s3948_s20  ;;  %p3883_p4 = pnand %p3882_p2, %p3876_p7 }
  0x6c   : > { %307 = vst.msk [vmem:[#allocation2 + $0x158] sm:$0xff] %vm262_vm1, %v3947_v0  ;;  %310 = vst.msk [vmem:[#allocation2 + $0x170] sm:$0xff] %vm262_vm1, %v3947_v0 }
  0x6d   : > { %313 = vst.msk [vmem:[#allocation2 + $0x188] sm:$0xff] %vm262_vm1, %v3947_v0  ;;  %316 = vst.msk [vmem:[#allocation2 + $0x1a0] sm:$0xff] %vm262_vm1, %v3947_v0 }
  0x6e   : > { %319 = vst.msk [vmem:[#allocation2 + $0x1b8] sm:$0xff] %vm262_vm1, %v3947_v0  ;;  %322 = vst.msk [vmem:[#allocation2 + $0x1d0] sm:$0xff] %vm262_vm1, %v3947_v0 }
  0x6f   : > { %263 = vst.msk [vmem:[#allocation2] sm:$0xff] %vm262_vm1, %v3947_v0  ;;  %267 = vst.msk [vmem:[#allocation2 + $0x18] sm:$0xff] %vm262_vm1, %v3947_v0  ;;  %449 = vrot.lane.b32.xlu1 %v220_v15, %s3948_s20  ;;  %447 = vrot.lane.b32.xlu0 %v219_v16, %s3948_s20 }
  0x70   : > { %326 = vst.msk [vmem:[#allocation2 + $0x8] sm:$0xff] %vm324_vm2, %v3947_v0  ;;  %330 = vst.msk [vmem:[#allocation2 + $0x20] sm:$0xff] %vm324_vm2, %v3947_v0 }
  0x71   : > { %270 = vst.msk [vmem:[#allocation2 + $0x30] sm:$0xff] %vm262_vm1, %v3947_v0  ;;  %273 = vst.msk [vmem:[#allocation2 + $0x48] sm:$0xff] %vm262_vm1, %v3947_v0 }
  0x72   : > { %276 = vst.msk [vmem:[#allocation2 + $0x60] sm:$0xff] %vm262_vm1, %v3947_v0  ;;  %279 = vst.msk [vmem:[#allocation2 + $0x78] sm:$0xff] %vm262_vm1, %v3947_v0 }
  0x73   : > { %282 = vst.msk [vmem:[#allocation2 + $0x90] sm:$0xff] %vm262_vm1, %v3947_v0  ;;  %285 = vst.msk [vmem:[#allocation2 + $0xa8] sm:$0xff] %vm262_vm1, %v3947_v0  ;;  %484 = vrot.lane.b32.xlu0 %v468_v17, %s3948_s20  ;;  %486 = vrot.lane.b32.xlu1 %v469_v18, %s3948_s20 }
  0x74   : > { %288 = vst.msk [vmem:[#allocation2 + $0xc0] sm:$0xff] %vm262_vm1, %v3947_v0  ;;  %291 = vst.msk [vmem:[#allocation2 + $0xd8] sm:$0xff] %vm262_vm1, %v3947_v0 }
  0x75   : > { %294 = vst.msk [vmem:[#allocation2 + $0xf0] sm:$0xff] %vm262_vm1, %v3947_v0  ;;  %297 = vst.msk [vmem:[#allocation2 + $0x108] sm:$0xff] %vm262_vm1, %v3947_v0 }
  0x76   : > { %300 = vst.msk [vmem:[#allocation2 + $0x120] sm:$0xff] %vm262_vm1, %v3947_v0  ;;  %303 = vst.msk [vmem:[#allocation2 + $0x138] sm:$0xff] %vm262_vm1, %v3947_v0 }
  0x77   : > { %306 = vst.msk [vmem:[#allocation2 + $0x150] sm:$0xff] %vm262_vm1, %v3947_v0  ;;  %309 = vst.msk [vmem:[#allocation2 + $0x168] sm:$0xff] %vm262_vm1, %v3947_v0  ;;  %490 = vrot.lane.b32.xlu1 %v471_v19, %s3948_s20  ;;  %488 = vrot.lane.b32.xlu0 %v470_v20, %s3948_s20 }
  0x78   : > { %312 = vst.msk [vmem:[#allocation2 + $0x180] sm:$0xff] %vm262_vm1, %v3947_v0  ;;  %315 = vst.msk [vmem:[#allocation2 + $0x198] sm:$0xff] %vm262_vm1, %v3947_v0 }
  0x79   : > { %318 = vst.msk [vmem:[#allocation2 + $0x1b0] sm:$0xff] %vm262_vm1, %v3947_v0  ;;  %321 = vst.msk [vmem:[#allocation2 + $0x1c8] sm:$0xff] %vm262_vm1, %v3947_v0  ;;  %vm3537_vm1 = vcmask 1043459  }
  0x7a   : > { %333 = vst.msk [vmem:[#allocation2 + $0x38] sm:$0xff] %vm324_vm2, %v3947_v0  ;;  %336 = vst.msk [vmem:[#allocation2 + $0x50] sm:$0xff] %vm324_vm2, %v3947_v0 }
  0x7b   : > { %339 = vst.msk [vmem:[#allocation2 + $0x68] sm:$0xff] %vm324_vm2, %v3947_v0  ;;  %342 = vst.msk [vmem:[#allocation2 + $0x80] sm:$0xff] %vm324_vm2, %v3947_v0  ;;  %492 = vrot.lane.b32.xlu0 %v472_v21, %s3948_s20  ;;  %494 = vrot.lane.b32.xlu1 %v473_v22, %s3948_s20 }
  0x7c   : > { %345 = vst.msk [vmem:[#allocation2 + $0x98] sm:$0xff] %vm324_vm2, %v3947_v0  ;;  %348 = vst.msk [vmem:[#allocation2 + $0xb0] sm:$0xff] %vm324_vm2, %v3947_v0 }
  0x7d   : > { %351 = vst.msk [vmem:[#allocation2 + $0xc8] sm:$0xff] %vm324_vm2, %v3947_v0  ;;  %354 = vst.msk [vmem:[#allocation2 + $0xe0] sm:$0xff] %vm324_vm2, %v3947_v0 }
  0x7e   : > { %357 = vst.msk [vmem:[#allocation2 + $0xf8] sm:$0xff] %vm324_vm2, %v3947_v0  ;;  %360 = vst.msk [vmem:[#allocation2 + $0x110] sm:$0xff] %vm324_vm2, %v3947_v0 }
  0x7f   : > { %363 = vst.msk [vmem:[#allocation2 + $0x128] sm:$0xff] %vm324_vm2, %v3947_v0  ;;  %366 = vst.msk [vmem:[#allocation2 + $0x140] sm:$0xff] %vm324_vm2, %v3947_v0  ;;  %498 = vrot.lane.b32.xlu1 %v475_v23, %s3948_s20  ;;  %496 = vrot.lane.b32.xlu0 %v474_v24, %s3948_s20 }
  0x80   : > { %369 = vst.msk [vmem:[#allocation2 + $0x158] sm:$0xff] %vm324_vm2, %v3947_v0  ;;  %372 = vst.msk [vmem:[#allocation2 + $0x170] sm:$0xff] %vm324_vm2, %v3947_v0 }
  0x81   : > { %375 = vst.msk [vmem:[#allocation2 + $0x188] sm:$0xff] %vm324_vm2, %v3947_v0  ;;  %378 = vst.msk [vmem:[#allocation2 + $0x1a0] sm:$0xff] %vm324_vm2, %v3947_v0 }
  0x82   : > { %381 = vst.msk [vmem:[#allocation2 + $0x1b8] sm:$0xff] %vm324_vm2, %v3947_v0  ;;  %384 = vst.msk [vmem:[#allocation2 + $0x1d0] sm:$0xff] %vm324_vm2, %v3947_v0 }
  0x83   : > { %266 = vst.msk [vmem:[#allocation2 + $0x10] sm:$0xf] %vm265_vm3, %v3947_v0  ;;  %269 = vst.msk [vmem:[#allocation2 + $0x28] sm:$0xf] %vm265_vm3, %v3947_v0  ;;  %533 = vrot.lane.b32.xlu0 %v517_v25, %s3948_s20  ;;  %535 = vrot.lane.b32.xlu1 %v518_v26, %s3948_s20 }
  0x84   : > { %272 = vst.msk [vmem:[#allocation2 + $0x40] sm:$0xf] %vm265_vm3, %v3947_v0  ;;  %275 = vst.msk [vmem:[#allocation2 + $0x58] sm:$0xf] %vm265_vm3, %v3947_v0 }
  0x85   : > { %278 = vst.msk [vmem:[#allocation2 + $0x70] sm:$0xf] %vm265_vm3, %v3947_v0  ;;  %281 = vst.msk [vmem:[#allocation2 + $0x88] sm:$0xf] %vm265_vm3, %v3947_v0 }
  0x86   : > { %284 = vst.msk [vmem:[#allocation2 + $0xa0] sm:$0xf] %vm265_vm3, %v3947_v0  ;;  %287 = vst.msk [vmem:[#allocation2 + $0xb8] sm:$0xf] %vm265_vm3, %v3947_v0 }
  0x87   : > { %290 = vst.msk [vmem:[#allocation2 + $0xd0] sm:$0xf] %vm265_vm3, %v3947_v0  ;;  %293 = vst.msk [vmem:[#allocation2 + $0xe8] sm:$0xf] %vm265_vm3, %v3947_v0  ;;  %539 = vrot.lane.b32.xlu1 %v520_v27, %s3948_s20  ;;  %537 = vrot.lane.b32.xlu0 %v519_v28, %s3948_s20 }
  0x88   : > { %296 = vst.msk [vmem:[#allocation2 + $0x100] sm:$0xf] %vm265_vm3, %v3947_v0  ;;  %299 = vst.msk [vmem:[#allocation2 + $0x118] sm:$0xf] %vm265_vm3, %v3947_v0 }
  0x89   : > { %302 = vst.msk [vmem:[#allocation2 + $0x130] sm:$0xf] %vm265_vm3, %v3947_v0  ;;  %305 = vst.msk [vmem:[#allocation2 + $0x148] sm:$0xf] %vm265_vm3, %v3947_v0 }
  0x8a   : > { %308 = vst.msk [vmem:[#allocation2 + $0x160] sm:$0xf] %vm265_vm3, %v3947_v0  ;;  %311 = vst.msk [vmem:[#allocation2 + $0x178] sm:$0xf] %vm265_vm3, %v3947_v0 }
  0x8b   : > { %314 = vst.msk [vmem:[#allocation2 + $0x190] sm:$0xf] %vm265_vm3, %v3947_v0  ;;  %317 = vst.msk [vmem:[#allocation2 + $0x1a8] sm:$0xf] %vm265_vm3, %v3947_v0  ;;  %541 = vrot.lane.b32.xlu0 %v521_v29, %s3948_s20  ;;  %543 = vrot.lane.b32.xlu1 %v522_v30, %s3948_s20 }
  0x8c   : > { %320 = vst.msk [vmem:[#allocation2 + $0x1c0] sm:$0xf] %vm265_vm3, %v3947_v0  ;;  %323 = vst.msk [vmem:[#allocation2 + $0x1d8] sm:$0xf] %vm265_vm3, %v3947_v0  ;;  %vm3550_vm3 = vcmask 24576  }
  0x8d   : > { %325 = vst.msk [vmem:[#allocation2] sm:$0xff] %vm324_vm2, %v3947_v0  ;;  %329 = vst.msk [vmem:[#allocation2 + $0x18] sm:$0xff] %vm324_vm2, %v3947_v0 }
  0x8e   : > { %332 = vst.msk [vmem:[#allocation2 + $0x30] sm:$0xff] %vm324_vm2, %v3947_v0  ;;  %335 = vst.msk [vmem:[#allocation2 + $0x48] sm:$0xff] %vm324_vm2, %v3947_v0 }
  0x8f   : > { %338 = vst.msk [vmem:[#allocation2 + $0x60] sm:$0xff] %vm324_vm2, %v3947_v0  ;;  %341 = vst.msk [vmem:[#allocation2 + $0x78] sm:$0xff] %vm324_vm2, %v3947_v0  ;;  %547 = vrot.lane.b32.xlu1 %v524_v31, %s3948_s20  ;;  %545 = vrot.lane.b32.xlu0 %v523_v32, %s3948_s20 }
  0x90   : > { %344 = vst.msk [vmem:[#allocation2 + $0x90] sm:$0xff] %vm324_vm2, %v3947_v0  ;;  %347 = vst.msk [vmem:[#allocation2 + $0xa8] sm:$0xff] %vm324_vm2, %v3947_v0 }
  0x91   : > { %350 = vst.msk [vmem:[#allocation2 + $0xc0] sm:$0xff] %vm324_vm2, %v3947_v0  ;;  %353 = vst.msk [vmem:[#allocation2 + $0xd8] sm:$0xff] %vm324_vm2, %v3947_v0 }
  0x92   : > { %356 = vst.msk [vmem:[#allocation2 + $0xf0] sm:$0xff] %vm324_vm2, %v3947_v0  ;;  %359 = vst.msk [vmem:[#allocation2 + $0x108] sm:$0xff] %vm324_vm2, %v3947_v0 }
  0x93   : > { %362 = vst.msk [vmem:[#allocation2 + $0x120] sm:$0xff] %vm324_vm2, %v3947_v0  ;;  %365 = vst.msk [vmem:[#allocation2 + $0x138] sm:$0xff] %vm324_vm2, %v3947_v0  ;;  %582 = vrot.lane.b32.xlu0 %v566_v33, %s3948_s20  ;;  %584 = vrot.lane.b32.xlu1 %v567_v34, %s3948_s20 }
  0x94   : > { %368 = vst.msk [vmem:[#allocation2 + $0x150] sm:$0xff] %vm324_vm2, %v3947_v0  ;;  %371 = vst.msk [vmem:[#allocation2 + $0x168] sm:$0xff] %vm324_vm2, %v3947_v0 }
  0x95   : > { %374 = vst.msk [vmem:[#allocation2 + $0x180] sm:$0xff] %vm324_vm2, %v3947_v0  ;;  %377 = vst.msk [vmem:[#allocation2 + $0x198] sm:$0xff] %vm324_vm2, %v3947_v0 }
  0x96   : > { %380 = vst.msk [vmem:[#allocation2 + $0x1b0] sm:$0xff] %vm324_vm2, %v3947_v0  ;;  %383 = vst.msk [vmem:[#allocation2 + $0x1c8] sm:$0xff] %vm324_vm2, %v3947_v0  ;;  %vm3540_vm2 = vcmask 125952  }
  0x97   : > { %328 = vst.msk [vmem:[#allocation2 + $0x10] sm:$0xf] %vm327_vm4, %v3947_v0  ;;  %331 = vst.msk [vmem:[#allocation2 + $0x28] sm:$0xf] %vm327_vm4, %v3947_v0  ;;  %588 = vrot.lane.b32.xlu1 %v569_v35, %s3948_s20  ;;  %586 = vrot.lane.b32.xlu0 %v568_v36, %s3948_s20 }
  0x98   : > { %334 = vst.msk [vmem:[#allocation2 + $0x40] sm:$0xf] %vm327_vm4, %v3947_v0  ;;  %337 = vst.msk [vmem:[#allocation2 + $0x58] sm:$0xf] %vm327_vm4, %v3947_v0 }
  0x99   : > { %340 = vst.msk [vmem:[#allocation2 + $0x70] sm:$0xf] %vm327_vm4, %v3947_v0  ;;  %343 = vst.msk [vmem:[#allocation2 + $0x88] sm:$0xf] %vm327_vm4, %v3947_v0 }
  0x9a   : > { %346 = vst.msk [vmem:[#allocation2 + $0xa0] sm:$0xf] %vm327_vm4, %v3947_v0  ;;  %349 = vst.msk [vmem:[#allocation2 + $0xb8] sm:$0xf] %vm327_vm4, %v3947_v0 }
  0x9b   : > { %352 = vst.msk [vmem:[#allocation2 + $0xd0] sm:$0xf] %vm327_vm4, %v3947_v0  ;;  %355 = vst.msk [vmem:[#allocation2 + $0xe8] sm:$0xf] %vm327_vm4, %v3947_v0  ;;  %590 = vrot.lane.b32.xlu0 %v570_v37, %s3948_s20  ;;  %592 = vrot.lane.b32.xlu1 %v571_v38, %s3948_s20 }
  0x9c   : > { %358 = vst.msk [vmem:[#allocation2 + $0x100] sm:$0xf] %vm327_vm4, %v3947_v0  ;;  %361 = vst.msk [vmem:[#allocation2 + $0x118] sm:$0xf] %vm327_vm4, %v3947_v0 }
  0x9d   : > { %364 = vst.msk [vmem:[#allocation2 + $0x130] sm:$0xf] %vm327_vm4, %v3947_v0  ;;  %367 = vst.msk [vmem:[#allocation2 + $0x148] sm:$0xf] %vm327_vm4, %v3947_v0 }
  0x9e   : > { %370 = vst.msk [vmem:[#allocation2 + $0x160] sm:$0xf] %vm327_vm4, %v3947_v0  ;;  %373 = vst.msk [vmem:[#allocation2 + $0x178] sm:$0xf] %vm327_vm4, %v3947_v0 }
  0x9f   : > { %376 = vst.msk [vmem:[#allocation2 + $0x190] sm:$0xf] %vm327_vm4, %v3947_v0  ;;  %379 = vst.msk [vmem:[#allocation2 + $0x1a8] sm:$0xf] %vm327_vm4, %v3947_v0  ;;  %596 = vrot.lane.b32.xlu1 %v573_v39, %s3948_s20  ;;  %594 = vrot.lane.b32.xlu0 %v572_v40, %s3948_s20 }
  0xa0   : > { %382 = vst.msk [vmem:[#allocation2 + $0x1c0] sm:$0xf] %vm327_vm4, %v3947_v0  ;;  %385 = vst.msk [vmem:[#allocation2 + $0x1d8] sm:$0xf] %vm327_vm4, %v3947_v0 }
  0xc5   : > { %v395_v41 = vpop.permute.xlu0 %394  ;;  %v399_v42 = vpop.permute.xlu1 %398 }
  0xc6   : > { %419 = vst.msk [vmem:[#allocation2 + $0x2] sm:$0xff] %vm418_vm5, %v395_v41  ;;  %421 = vst.msk [vmem:[#allocation2 + $0x1a] sm:$0xff] %vm418_vm5, %v399_v42 }
  0xc9   : > { %v397_v43 = vpop.permute.xlu0 %396  ;;  %v401_v44 = vpop.permute.xlu1 %400 }
  0xca   : > { %420 = vst.msk [vmem:[#allocation2 + $0xa] sm:$0xff] %vm418_vm5, %v397_v43  ;;  %422 = vst.msk [vmem:[#allocation2 + $0x22] sm:$0xff] %vm418_vm5, %v401_v44 }
  0xcd   : > { %v4563_v45 = vld [vmem:[#allocation2] sm:$0xff]  ;;  %v403_v46 = vpop.permute.xlu0 %402  ;;  %v405_v47 = vpop.permute.xlu1 %404  ;;  %v4579_v52 = vld [vmem:[#allocation2 + $0x18] sm:$0xff] }
  0xce   : > { %7186 = vst [vmem:[#allocation12_spill] sm:$0xff] %v4563_v45  ;;  %795 = vrot.lane.b32.xlu0 %v4563_v45, %s3949_s5  ;;  %423 = vst.msk [vmem:[#allocation2 + $0x32] sm:$0xff] %vm418_vm5, %v403_v46 }
  0xcf   : > { %424 = vst.msk [vmem:[#allocation2 + $0x3a] sm:$0xff] %vm418_vm5, %v405_v47 }
  0xd1   : > { %v4569_v48 = vld [vmem:[#allocation2 + $0x8] sm:$0xff]  ;;  %v4571_v49 = vld [vmem:[#allocation2 + $0x10] sm:$0xf]  ;;  %v409_v50 = vpop.permute.xlu1 %408  ;;  %v407_v51 = vpop.permute.xlu0 %406  ;;  %v4581_v53 = vld [vmem:[#allocation2 + $0x20] sm:$0xff] }
  0xd2   : > { %7187 = vst [vmem:[#allocation13_spill] sm:$0xff] %v4569_v48  ;;  %7188 = vst [vmem:[#allocation14_spill] sm:$0xff] %v4571_v49  ;;  %797 = vrot.lane.b32.xlu1 %v4569_v48, %s3949_s5  ;;  %799 = vrot.lane.b32.xlu0 %v4571_v49, %s3949_s5  ;;  %v4591_v57 = vld [vmem:[#allocation2 + $0x28] sm:$0xf] }
  0xd3   : > { %426 = vst.msk [vmem:[#allocation2 + $0x52] sm:$0xff] %vm418_vm5, %v409_v50  ;;  %425 = vst.msk [vmem:[#allocation2 + $0x4a] sm:$0xff] %vm418_vm5, %v407_v51 }
  0xd5   : > { %v436_v54 = vpop.permute.xlu0 %435  ;;  %v438_v55 = vpop.permute.xlu1 %437  ;;  %v4589_v56 = vld [vmem:[#allocation2 + $0x30] sm:$0xff] }
  0xd6   : > { %801 = vrot.lane.b32.xlu1 %v4579_v52, %s3949_s5  ;;  %803 = vrot.lane.b32.xlu0 %v4581_v53, %s3949_s5  ;;  %460 = vst.msk [vmem:[#allocation2 + $0x62] sm:$0xff] %vm418_vm5, %v436_v54  ;;  %461 = vst.msk [vmem:[#allocation2 + $0x6a] sm:$0xff] %vm418_vm5, %v438_v55  ;;  %v4599_v60 = vld [vmem:[#allocation2 + $0x40] sm:$0xf]  ;;  %v4601_v61 = vld [vmem:[#allocation2 + $0x38] sm:$0xff] }
  0xd7   : > { %7189 = vst [vmem:[#allocation15_spill] sm:$0xff] %v4589_v56  ;;  %7190 = vst [vmem:[#allocation16_spill] sm:$0xff] %v4599_v60 }
  0xd8   : > { %7191 = vst [vmem:[#allocation17_spill] sm:$0xff] %v4601_v61 }
  0xd9   : > { %v442_v58 = vpop.permute.xlu1 %441  ;;  %v440_v59 = vpop.permute.xlu0 %439 }
  0xda   : > { %805 = vrot.lane.b32.xlu1 %v4591_v57, %s3949_s5  ;;  %807 = vrot.lane.b32.xlu0 %v4589_v56, %s3949_s5  ;;  %463 = vst.msk [vmem:[#allocation2 + $0x82] sm:$0xff] %vm418_vm5, %v442_v58  ;;  %462 = vst.msk [vmem:[#allocation2 + $0x7a] sm:$0xff] %vm418_vm5, %v440_v59  ;;  %v4609_v0 = vld [vmem:[#allocation2 + $0x48] sm:$0xff]  ;;  %v4611_v1 = vld [vmem:[#allocation2 + $0x50] sm:$0xff] }
  0xdb   : > { %v4621_v5 = vld [vmem:[#allocation2 + $0x58] sm:$0xf] }
  0xdd   : > { %v444_v62 = vpop.permute.xlu0 %443  ;;  %v446_v63 = vpop.permute.xlu1 %445  ;;  %v4619_v4 = vld [vmem:[#allocation2 + $0x60] sm:$0xff]  ;;  %v4629_v8 = vld [vmem:[#allocation2 + $0x70] sm:$0xf]  ;;  %v4631_v9 = vld [vmem:[#allocation2 + $0x68] sm:$0xff] }
  0xde   : > { %809 = vrot.lane.b32.xlu1 %v4601_v61, %s3949_s5  ;;  %811 = vrot.lane.b32.xlu0 %v4599_v60, %s3949_s5  ;;  %464 = vst.msk [vmem:[#allocation2 + $0x92] sm:$0xff] %vm418_vm5, %v444_v62  ;;  %465 = vst.msk [vmem:[#allocation2 + $0x9a] sm:$0xff] %vm418_vm5, %v446_v63 }
  0xe1   : > { %v450_v2 = vpop.permute.xlu1 %449  ;;  %v448_v3 = vpop.permute.xlu0 %447  ;;  %v4639_v12 = vld [vmem:[#allocation2 + $0x78] sm:$0xff]  ;;  %v4641_v13 = vld [vmem:[#allocation2 + $0x80] sm:$0xff]  ;;  %v4651_v17 = vld [vmem:[#allocation2 + $0x88] sm:$0xf] }
  0xe2   : > { %813 = vrot.lane.b32.xlu1 %v4609_v0, %s3949_s5  ;;  %815 = vrot.lane.b32.xlu0 %v4611_v1, %s3949_s5  ;;  %467 = vst.msk [vmem:[#allocation2 + $0xb2] sm:$0xff] %vm418_vm5, %v450_v2  ;;  %466 = vst.msk [vmem:[#allocation2 + $0xaa] sm:$0xff] %vm418_vm5, %v448_v3 }
  0xe5   : > { %v485_v6 = vpop.permute.xlu0 %484  ;;  %v487_v7 = vpop.permute.xlu1 %486  ;;  %v4649_v16 = vld [vmem:[#allocation2 + $0x90] sm:$0xff]  ;;  %v4659_v20 = vld [vmem:[#allocation2 + $0xa0] sm:$0xf]  ;;  %v4661_v21 = vld [vmem:[#allocation2 + $0x98] sm:$0xff] }
  0xe6   : > { %817 = vrot.lane.b32.xlu1 %v4621_v5, %s3949_s5  ;;  %819 = vrot.lane.b32.xlu0 %v4619_v4, %s3949_s5  ;;  %509 = vst.msk [vmem:[#allocation2 + $0xc2] sm:$0xff] %vm418_vm5, %v485_v6  ;;  %510 = vst.msk [vmem:[#allocation2 + $0xca] sm:$0xff] %vm418_vm5, %v487_v7 }
  0xe7   : > { %7192 = vst [vmem:[#allocation18_spill] sm:$0xff] %v4649_v16  ;;  %7193 = vst [vmem:[#allocation19_spill] sm:$0xff] %v4659_v20 }
  0xe8   : > { %7194 = vst [vmem:[#allocation20_spill] sm:$0xff] %v4661_v21 }
  0xe9   : > { %v491_v10 = vpop.permute.xlu1 %490  ;;  %v489_v11 = vpop.permute.xlu0 %488  ;;  %v4669_v24 = vld [vmem:[#allocation2 + $0xa8] sm:$0xff]  ;;  %v4671_v25 = vld [vmem:[#allocation2 + $0xb0] sm:$0xff]  ;;  %v4681_v29 = vld [vmem:[#allocation2 + $0xb8] sm:$0xf] }
  0xea   : > { %821 = vrot.lane.b32.xlu1 %v4631_v9, %s3949_s5  ;;  %823 = vrot.lane.b32.xlu0 %v4629_v8, %s3949_s5  ;;  %512 = vst.msk [vmem:[#allocation2 + $0xe2] sm:$0xff] %vm418_vm5, %v491_v10  ;;  %511 = vst.msk [vmem:[#allocation2 + $0xda] sm:$0xff] %vm418_vm5, %v489_v11 }
  0xeb   : > { %7195 = vst [vmem:[#allocation21_spill] sm:$0xff] %v4669_v24  ;;  %7196 = vst [vmem:[#allocation22_spill] sm:$0xff] %v4671_v25 }
  0xec   : > { %7197 = vst [vmem:[#allocation23_spill] sm:$0xff] %v4681_v29 }
  0xed   : > { %v493_v14 = vpop.permute.xlu0 %492  ;;  %v495_v15 = vpop.permute.xlu1 %494  ;;  %v4679_v28 = vld [vmem:[#allocation2 + $0xc0] sm:$0xff]  ;;  %v4689_v32 = vld [vmem:[#allocation2 + $0xd0] sm:$0xf]  ;;  %v4691_v33 = vld [vmem:[#allocation2 + $0xc8] sm:$0xff] }
  0xee   : > { %825 = vrot.lane.b32.xlu1 %v4639_v12, %s3949_s5  ;;  %827 = vrot.lane.b32.xlu0 %v4641_v13, %s3949_s5  ;;  %513 = vst.msk [vmem:[#allocation2 + $0xf2] sm:$0xff] %vm418_vm5, %v493_v14  ;;  %514 = vst.msk [vmem:[#allocation2 + $0xfa] sm:$0xff] %vm418_vm5, %v495_v15 }
  0xf1   : > { %v499_v18 = vpop.permute.xlu1 %498  ;;  %v497_v19 = vpop.permute.xlu0 %496  ;;  %v4699_v36 = vld [vmem:[#allocation2 + $0xe0] sm:$0xff]  ;;  %v4701_v37 = vld [vmem:[#allocation2 + $0xd8] sm:$0xff]  ;;  %v4711_v41 = vld [vmem:[#allocation2 + $0xe8] sm:$0xf] }
  0xf2   : > { %829 = vrot.lane.b32.xlu1 %v4651_v17, %s3949_s5  ;;  %831 = vrot.lane.b32.xlu0 %v4649_v16, %s3949_s5  ;;  %516 = vst.msk [vmem:[#allocation2 + $0x112] sm:$0xff] %vm418_vm5, %v499_v18  ;;  %515 = vst.msk [vmem:[#allocation2 + $0x10a] sm:$0xff] %vm418_vm5, %v497_v19 }
  0xf5   : > { %v534_v22 = vpop.permute.xlu0 %533  ;;  %v536_v23 = vpop.permute.xlu1 %535  ;;  %v4709_v40 = vld [vmem:[#allocation2 + $0xf0] sm:$0xff]  ;;  %v4719_v44 = vld [vmem:[#allocation2 + $0x100] sm:$0xf]  ;;  %v4721_v46 = vld [vmem:[#allocation2 + $0xf8] sm:$0xff] }
  0xf6   : > { %833 = vrot.lane.b32.xlu1 %v4661_v21, %s3949_s5  ;;  %835 = vrot.lane.b32.xlu0 %v4659_v20, %s3949_s5  ;;  %558 = vst.msk [vmem:[#allocation2 + $0x122] sm:$0xff] %vm418_vm5, %v534_v22  ;;  %559 = vst.msk [vmem:[#allocation2 + $0x12a] sm:$0xff] %vm418_vm5, %v536_v23 }
  0xf9   : > { %v540_v26 = vpop.permute.xlu1 %539  ;;  %v538_v27 = vpop.permute.xlu0 %537  ;;  %v4729_v51 = vld [vmem:[#allocation2 + $0x110] sm:$0xff]  ;;  %v4731_v54 = vld [vmem:[#allocation2 + $0x108] sm:$0xff]  ;;  %v4741_v62 = vld [vmem:[#allocation2 + $0x118] sm:$0xf] }
  0xfa   : > { %837 = vrot.lane.b32.xlu1 %v4669_v24, %s3949_s5  ;;  %839 = vrot.lane.b32.xlu0 %v4671_v25, %s3949_s5  ;;  %561 = vst.msk [vmem:[#allocation2 + $0x142] sm:$0xff] %vm418_vm5, %v540_v26  ;;  %560 = vst.msk [vmem:[#allocation2 + $0x13a] sm:$0xff] %vm418_vm5, %v538_v27 }
  0xfd   : > { %v542_v30 = vpop.permute.xlu0 %541  ;;  %v544_v31 = vpop.permute.xlu1 %543  ;;  %v4739_v59 = vld [vmem:[#allocation2 + $0x120] sm:$0xff]  ;;  %v4747_v63 = vld [vmem:[#allocation2 + $0x130] sm:$0xf]  ;;  %v4749_v2 = vld [vmem:[#allocation2 + $0x128] sm:$0xff] }
  0xfe   : > { %841 = vrot.lane.b32.xlu1 %v4681_v29, %s3949_s5  ;;  %843 = vrot.lane.b32.xlu0 %v4679_v28, %s3949_s5  ;;  %562 = vst.msk [vmem:[#allocation2 + $0x152] sm:$0xff] %vm418_vm5, %v542_v30  ;;  %563 = vst.msk [vmem:[#allocation2 + $0x15a] sm:$0xff] %vm418_vm5, %v544_v31 }
 0x101   : > { %v548_v34 = vpop.permute.xlu1 %547  ;;  %v546_v35 = vpop.permute.xlu0 %545  ;;  %v4755_v3 = vld [vmem:[#allocation2 + $0x140] sm:$0xff]  ;;  %v4757_v6 = vld [vmem:[#allocation2 + $0x138] sm:$0xff]  ;;  %v4765_v10 = vld [vmem:[#allocation2 + $0x148] sm:$0xf] }
 0x102   : > { %845 = vrot.lane.b32.xlu1 %v4691_v33, %s3949_s5  ;;  %847 = vrot.lane.b32.xlu0 %v4689_v32, %s3949_s5  ;;  %565 = vst.msk [vmem:[#allocation2 + $0x172] sm:$0xff] %vm418_vm5, %v548_v34  ;;  %564 = vst.msk [vmem:[#allocation2 + $0x16a] sm:$0xff] %vm418_vm5, %v546_v35 }
 0x105   : > { %v583_v38 = vpop.permute.xlu0 %582  ;;  %v585_v39 = vpop.permute.xlu1 %584  ;;  %v4763_v7 = vld [vmem:[#allocation2 + $0x150] sm:$0xff]  ;;  %v4771_v11 = vld [vmem:[#allocation2 + $0x160] sm:$0xf]  ;;  %v4773_v14 = vld [vmem:[#allocation2 + $0x158] sm:$0xff] }
 0x106   : > { %851 = vrot.lane.b32.xlu0 %v4699_v36, %s3949_s5  ;;  %849 = vrot.lane.b32.xlu1 %v4701_v37, %s3949_s5  ;;  %607 = vst.msk [vmem:[#allocation2 + $0x182] sm:$0xff] %vm418_vm5, %v583_v38  ;;  %608 = vst.msk [vmem:[#allocation2 + $0x18a] sm:$0xff] %vm418_vm5, %v585_v39 }
 0x109   : > { %v589_v42 = vpop.permute.xlu1 %588  ;;  %v587_v43 = vpop.permute.xlu0 %586  ;;  %v4779_v15 = vld [vmem:[#allocation2 + $0x170] sm:$0xff]  ;;  %v4781_v18 = vld [vmem:[#allocation2 + $0x168] sm:$0xff]  ;;  %v4789_v22 = vld [vmem:[#allocation2 + $0x178] sm:$0xf] }
 0x10a   : > { %853 = vrot.lane.b32.xlu1 %v4711_v41, %s3949_s5  ;;  %855 = vrot.lane.b32.xlu0 %v4709_v40, %s3949_s5  ;;  %610 = vst.msk [vmem:[#allocation2 + $0x1a2] sm:$0xff] %vm418_vm5, %v589_v42  ;;  %609 = vst.msk [vmem:[#allocation2 + $0x19a] sm:$0xff] %vm418_vm5, %v587_v43 }
 0x10b   : > { %7198 = vst [vmem:[#allocation24_spill] sm:$0xff] %v4779_v15  ;;  %7199 = vst [vmem:[#allocation25_spill] sm:$0xff] %v4789_v22 }
 0x10d   : > { %v591_v47 = vpop.permute.xlu0 %590  ;;  %v593_v50 = vpop.permute.xlu1 %592  ;;  %v4787_v19 = vld [vmem:[#allocation2 + $0x180] sm:$0xff]  ;;  %v4795_v23 = vld [vmem:[#allocation2 + $0x190] sm:$0xf]  ;;  %v4797_v26 = vld [vmem:[#allocation2 + $0x188] sm:$0xff] }
 0x10e   : > { %857 = vrot.lane.b32.xlu1 %v4721_v46, %s3949_s5  ;;  %859 = vrot.lane.b32.xlu0 %v4719_v44, %s3949_s5  ;;  %611 = vst.msk [vmem:[#allocation2 + $0x1b2] sm:$0xff] %vm418_vm5, %v591_v47  ;;  %612 = vst.msk [vmem:[#allocation2 + $0x1ba] sm:$0xff] %vm418_vm5, %v593_v50 }
 0x10f   : > { %7200 = vst [vmem:[#allocation26_spill] sm:$0xff] %v4795_v23 }
 0x111   : > { %v597_v55 = vpop.permute.xlu1 %596  ;;  %v595_v58 = vpop.permute.xlu0 %594  ;;  %v4803_v27 = vld [vmem:[#allocation2 + $0x1a0] sm:$0xff]  ;;  %v4805_v30 = vld [vmem:[#allocation2 + $0x198] sm:$0xff]  ;;  %v4813_v34 = vld [vmem:[#allocation2 + $0x1a8] sm:$0xf] }
 0x112   : > { %863 = vrot.lane.b32.xlu0 %v4729_v51, %s3949_s5  ;;  %861 = vrot.lane.b32.xlu1 %v4731_v54, %s3949_s5  ;;  %614 = vst.msk [vmem:[#allocation2 + $0x1d2] sm:$0xff] %vm418_vm5, %v597_v55  ;;  %613 = vst.msk [vmem:[#allocation2 + $0x1ca] sm:$0xff] %vm418_vm5, %v595_v58 }
 0x113   : > { %7201 = vst [vmem:[#allocation27_spill] sm:$0xff] %v4803_v27  ;;  %7202 = vst [vmem:[#allocation28_spill] sm:$0xff] %v4805_v30 }
 0x114   : > { %7204 = vst [vmem:[#allocation30_spill] sm:$0xff] %v4813_v34 }
 0x115   : > { %v4811_v31 = vld [vmem:[#allocation2 + $0x1b0] sm:$0xff]  ;;  %v4819_v35 = vld [vmem:[#allocation2 + $0x1c0] sm:$0xf]  ;;  %v4821_v38 = vld [vmem:[#allocation2 + $0x1b8] sm:$0xff] }
 0x116   : > { %865 = vrot.lane.b32.xlu1 %v4741_v62, %s3949_s5  ;;  %867 = vrot.lane.b32.xlu0 %v4739_v59, %s3949_s5  ;;  %7203 = vst [vmem:[#allocation29_spill] sm:$0xff] %v4811_v31  ;;  %7205 = vst [vmem:[#allocation31_spill] sm:$0xff] %v4819_v35 }
 0x117   : > { %7206 = vst [vmem:[#allocation32_spill] sm:$0xff] %v4821_v38 }
 0x119   : > { %v4827_v39 = vld [vmem:[#allocation2 + $0x1d0] sm:$0xff]  ;;  %v4829_v42 = vld [vmem:[#allocation2 + $0x1c8] sm:$0xff]  ;;  %v4836_v58 = vld [vmem:[#allocation2 + $0x1d8] sm:$0xf] }
 0x11a   : > { %869 = vrot.lane.b32.xlu1 %v4749_v2, %s3949_s5  ;;  %871 = vrot.lane.b32.xlu0 %v4747_v63, %s3949_s5  ;;  %7207 = vst [vmem:[#allocation33_spill] sm:$0xff] %v4827_v39  ;;  %7208 = vst [vmem:[#allocation34_spill] sm:$0xff] %v4829_v42 }
 0x11b   : > { %7209 = vst [vmem:[#allocation35_spill] sm:$0xff] %v4836_v58 }
 0x11e   : > { %875 = vrot.lane.b32.xlu0 %v4755_v3, %s3949_s5  ;;  %873 = vrot.lane.b32.xlu1 %v4757_v6, %s3949_s5 }
 0x122   : > { %877 = vrot.lane.b32.xlu1 %v4765_v10, %s3949_s5  ;;  %879 = vrot.lane.b32.xlu0 %v4763_v7, %s3949_s5 }
 0x126   : > { %881 = vrot.lane.b32.xlu1 %v4773_v14, %s3949_s5  ;;  %883 = vrot.lane.b32.xlu0 %v4771_v11, %s3949_s5 }
 0x12a   : > { %887 = vrot.lane.b32.xlu0 %v4779_v15, %s3949_s5  ;;  %885 = vrot.lane.b32.xlu1 %v4781_v18, %s3949_s5 }
 0x12e   : > { %889 = vrot.lane.b32.xlu1 %v4789_v22, %s3949_s5  ;;  %891 = vrot.lane.b32.xlu0 %v4787_v19, %s3949_s5 }
 0x132   : > { %893 = vrot.lane.b32.xlu1 %v4797_v26, %s3949_s5  ;;  %895 = vrot.lane.b32.xlu0 %v4795_v23, %s3949_s5 }
 0x136   : > { %899 = vrot.lane.b32.xlu0 %v4803_v27, %s3949_s5  ;;  %897 = vrot.lane.b32.xlu1 %v4805_v30, %s3949_s5 }
 0x13a   : > { %901 = vrot.lane.b32.xlu1 %v4813_v34, %s3949_s5  ;;  %903 = vrot.lane.b32.xlu0 %v4811_v31, %s3949_s5 }
 0x13e   : > { %905 = vrot.lane.b32.xlu1 %v4821_v38, %s3949_s5  ;;  %907 = vrot.lane.b32.xlu0 %v4819_v35, %s3949_s5 }
 0x140   : > { %v796_v43 = vpop.permute.xlu0 %795 }
 0x141   : > { %v975_v47 = vadd.f32 %v796_v43, %v4563_v45 }
 0x142   : > { %911 = vrot.lane.b32.xlu0 %v4827_v39, %s3949_s5  ;;  %909 = vrot.lane.b32.xlu1 %v4829_v42, %s3949_s5 }
 0x143   : > { %v1035_v35 = vmul.f32 0.12007839, %v975_v47 }
 0x144   : > { %v798_v50 = vpop.permute.xlu1 %797  ;;  %v800_v55 = vpop.permute.xlu0 %799 }
 0x145   : > { %v977_v38 = vadd.f32 %v800_v55, %v4571_v49  ;;  %v976_v43 = vadd.f32 %v798_v50, %v4569_v48 }
 0x146   : > { %1397 = vrot.lane.b32.xlu0 %v4569_v48, %s3950_s6  ;;  %913 = vrot.lane.b32.xlu1 %v4836_v58, %s3949_s5 }
 0x147   : > { %v1037_v42 = vmul.f32 0.12007839, %v977_v38  ;;  %v1036_v47 = vmul.f32 0.12007839, %v976_v43 }
 0x148   : > { %v802_v39 = vpop.permute.xlu1 %801  ;;  %v804_v31 = vpop.permute.xlu0 %803 }
 0x149   : > { %v979_v34 = vadd.f32 %v804_v31, %v4581_v53  ;;  %v978_v55 = vadd.f32 %v802_v39, %v4579_v52 }
 0x14a   : > { %1395 = vrot.lane.b32.xlu1 %v4563_v45, %s3950_s6  ;;  %1155 = vrot.lane.b32.xlu0 %v1035_v35, %s3948_s20 }
 0x14b   : > { %v1039_v58 = vmul.f32 0.12007839, %v979_v34  ;;  %v1038_v31 = vmul.f32 0.12007839, %v978_v55 }
 0x14c   : > { %v806_v27 = vpop.permute.xlu1 %805  ;;  %v808_v30 = vpop.permute.xlu0 %807 }
 0x14d   : > { %v981_v45 = vadd.f32 %v808_v30, %v4589_v56  ;;  %v980_v38 = vadd.f32 %v806_v27, %v4591_v57 }
 0x14e   : > { %1399 = vrot.lane.b32.xlu1 %v4571_v49, %s3950_s6  ;;  %1159 = vrot.lane.b32.xlu0 %v1037_v42, %s3948_s20 }
 0x14f   : > { %v1041_v50 = vmul.f32 0.12007839, %v981_v45  ;;  %v1040_v34 = vmul.f32 0.12007839, %v980_v38 }
 0x150   : > { %v810_v23 = vpop.permute.xlu1 %809  ;;  %v812_v35 = vpop.permute.xlu0 %811 }
 0x151   : > { %v983_v49 = vadd.f32 %v812_v35, %v4599_v60  ;;  %v982_v30 = vadd.f32 %v810_v23, %v4601_v61 }
 0x152   : > { %1157 = vrot.lane.b32.xlu1 %v1036_v47, %s3948_s20  ;;  %1163 = vrot.lane.b32.xlu0 %v1039_v58, %s3948_s20 }
 0x153   : > { %v1043_v39 = vmul.f32 0.12007839, %v983_v49  ;;  %v1042_v45 = vmul.f32 0.12007839, %v982_v30 }
 0x154   : > { %v814_v48 = vpop.permute.xlu1 %813  ;;  %v816_v42 = vpop.permute.xlu0 %815 }
 0x155   : > { %v985_v43 = vadd.f32 %v816_v42, %v4611_v1  ;;  %v984_v27 = vadd.f32 %v814_v48, %v4609_v0 }
 0x156   : > { %1161 = vrot.lane.b32.xlu1 %v1038_v31, %s3948_s20  ;;  %1167 = vrot.lane.b32.xlu0 %v1041_v50, %s3948_s20 }
 0x157   : > { %v1045_v55 = vmul.f32 0.12007839, %v985_v43  ;;  %v1044_v49 = vmul.f32 0.12007839, %v984_v27 }
 0x158   : > { %v818_v47 = vpop.permute.xlu1 %817  ;;  %v820_v58 = vpop.permute.xlu0 %819 }
 0x159   : > { %v987_v35 = vadd.f32 %v820_v58, %v4619_v4  ;;  %v986_v23 = vadd.f32 %v818_v47, %v4621_v5 }
 0x15a   : > { %1165 = vrot.lane.b32.xlu1 %v1040_v34, %s3948_s20  ;;  %1171 = vrot.lane.b32.xlu0 %v1043_v39, %s3948_s20 }
 0x15b   : > { %v1047_v38 = vmul.f32 0.12007839, %v987_v35  ;;  %v1046_v48 = vmul.f32 0.12007839, %v986_v23 }
 0x15c   : > { %v822_v31 = vpop.permute.xlu1 %821  ;;  %v824_v50 = vpop.permute.xlu0 %823 }
 0x15d   : > { %v989_v42 = vadd.f32 %v824_v50, %v4629_v8  ;;  %v988_v30 = vadd.f32 %v822_v31, %v4631_v9 }
 0x15e   : > { %1169 = vrot.lane.b32.xlu1 %v1042_v45, %s3948_s20  ;;  %1175 = vrot.lane.b32.xlu0 %v1045_v55, %s3948_s20 }
 0x15f   : > { %v1049_v43 = vmul.f32 0.12007839, %v989_v42  ;;  %v1048_v47 = vmul.f32 0.12007839, %v988_v30 }
 0x160   : > { %v826_v34 = vpop.permute.xlu1 %825  ;;  %v828_v39 = vpop.permute.xlu0 %827 }
 0x161   : > { %v991_v58 = vadd.f32 %v828_v39, %v4641_v13  ;;  %v990_v27 = vadd.f32 %v826_v34, %v4639_v12 }
 0x162   : > { %1173 = vrot.lane.b32.xlu1 %v1044_v49, %s3948_s20  ;;  %1179 = vrot.lane.b32.xlu0 %v1047_v38, %s3948_s20 }
 0x163   : > { %v1051_v35 = vmul.f32 0.12007839, %v991_v58  ;;  %v1050_v31 = vmul.f32 0.12007839, %v990_v27 }
 0x164   : > { %v830_v45 = vpop.permute.xlu1 %829  ;;  %v832_v55 = vpop.permute.xlu0 %831 }
 0x165   : > { %v993_v50 = vadd.f32 %v832_v55, %v4649_v16  ;;  %v992_v23 = vadd.f32 %v830_v45, %v4651_v17 }
 0x166   : > { %1177 = vrot.lane.b32.xlu1 %v1046_v48, %s3948_s20  ;;  %1183 = vrot.lane.b32.xlu0 %v1049_v43, %s3948_s20 }
 0x167   : > { %v1053_v42 = vmul.f32 0.12007839, %v993_v50  ;;  %v1052_v34 = vmul.f32 0.12007839, %v992_v23 }
 0x168   : > { %v834_v49 = vpop.permute.xlu1 %833  ;;  %v836_v38 = vpop.permute.xlu0 %835 }
 0x169   : > { %v995_v39 = vadd.f32 %v836_v38, %v4659_v20  ;;  %v994_v30 = vadd.f32 %v834_v49, %v4661_v21 }
 0x16a   : > { %1181 = vrot.lane.b32.xlu1 %v1048_v47, %s3948_s20  ;;  %1187 = vrot.lane.b32.xlu0 %v1051_v35, %s3948_s20 }
 0x16b   : > { %v1055_v58 = vmul.f32 0.12007839, %v995_v39  ;;  %v1054_v45 = vmul.f32 0.12007839, %v994_v30 }
 0x16c   : > { %v838_v48 = vpop.permute.xlu1 %837  ;;  %v840_v43 = vpop.permute.xlu0 %839 }
 0x16d   : > { %v997_v55 = vadd.f32 %v840_v43, %v4671_v25  ;;  %v996_v35 = vadd.f32 %v838_v48, %v4669_v24 }
 0x16e   : > { %1185 = vrot.lane.b32.xlu1 %v1050_v31, %s3948_s20  ;;  %1191 = vrot.lane.b32.xlu0 %v1053_v42, %s3948_s20 }
 0x16f   : > { %v1057_v50 = vmul.f32 0.12007839, %v997_v55  ;;  %v1056_v49 = vmul.f32 0.12007839, %v996_v35 }
 0x170   : > { %v4885_v47 = vpop.permute.xlu1 %841  ;;  %v4887_v27 = vpop.permute.xlu0 %843 }
 0x172   : > { %1189 = vrot.lane.b32.xlu1 %v1052_v34, %s3948_s20  ;;  %1195 = vrot.lane.b32.xlu0 %v1055_v58, %s3948_s20 }
 0x174   : > { %v4892_v38 = vpop.permute.xlu1 %845  ;;  %v4894_v31 = vpop.permute.xlu0 %847 }
 0x176   : > { %1193 = vrot.lane.b32.xlu1 %v1054_v45, %s3948_s20  ;;  %1199 = vrot.lane.b32.xlu0 %v1057_v50, %s3948_s20 }
 0x178   : > { %v4898_v23 = vpop.permute.xlu1 %849  ;;  %v4900_v42 = vpop.permute.xlu0 %851 }
 0x17a   : > { %1197 = vrot.lane.b32.xlu1 %v1056_v49, %s3948_s20  ;;  %1401 = vrot.lane.b32.xlu0 %v4579_v52, %s3950_s6 }
 0x17c   : > { %v4905_v39 = vpop.permute.xlu1 %853  ;;  %v4907_v48 = vpop.permute.xlu0 %855 }
 0x17e   : > { %1403 = vrot.lane.b32.xlu1 %v4581_v53, %s3950_s6  ;;  %1405 = vrot.lane.b32.xlu0 %v4591_v57, %s3950_s6 }
 0x180   : > { %v4913_v43 = vpop.permute.xlu1 %857  ;;  %v4915_v34 = vpop.permute.xlu0 %859 }
 0x182   : > { %1419 = vrot.lane.b32.xlu1 %v4619_v4, %s3950_s6  ;;  %1421 = vrot.lane.b32.xlu0 %v4631_v9, %s3950_s6 }
 0x184   : > { %v4921_v30 = vpop.permute.xlu1 %861  ;;  %v4923_v58 = vpop.permute.xlu0 %863 }
 0x185   : > { %7210 = vst [vmem:[#allocation36_spill] sm:$0xff] %v4921_v30  ;;  %7211 = vst [vmem:[#allocation37_spill] sm:$0xff] %v4923_v58 }
 0x186   : > { %1423 = vrot.lane.b32.xlu1 %v4629_v8, %s3950_s6  ;;  %1425 = vrot.lane.b32.xlu0 %v4639_v12, %s3950_s6 }
 0x188   : > { %v4929_v55 = vpop.permute.xlu1 %865  ;;  %v4931_v45 = vpop.permute.xlu0 %867 }
 0x189   : > { %7212 = vst [vmem:[#allocation38_spill] sm:$0xff] %v4929_v55 }
 0x18a   : > { %1427 = vrot.lane.b32.xlu1 %v4641_v13, %s3950_s6  ;;  %1429 = vrot.lane.b32.xlu0 %v4651_v17, %s3950_s6 }
 0x18c   : > { %v4937_v35 = vpop.permute.xlu1 %869  ;;  %v4939_v50 = vpop.permute.xlu0 %871 }
 0x18e   : > { %1407 = vrot.lane.b32.xlu1 %v4589_v56, %s3950_s6  ;;  %1409 = vrot.lane.b32.xlu0 %v4601_v61, %s3950_s6 }
 0x190   : > { %v4945_v49 = vpop.permute.xlu1 %873  ;;  %v4947_v55 = vpop.permute.xlu0 %875 }
 0x192   : > { %1411 = vrot.lane.b32.xlu1 %v4599_v60, %s3950_s6  ;;  %1431 = vrot.lane.b32.xlu0 %v4649_v16, %s3950_s6 }
 0x194   : > { %v4953_v58 = vpop.permute.xlu1 %877  ;;  %v4955_v30 = vpop.permute.xlu0 %879 }
 0x196   : > { %1433 = vrot.lane.b32.xlu1 %v4661_v21, %s3950_s6  ;;  %1435 = vrot.lane.b32.xlu0 %v4659_v20, %s3950_s6 }
 0x198   : > { %v4961_v61 = vpop.permute.xlu1 %881  ;;  %v4963_v56 = vpop.permute.xlu0 %883 }
 0x19a   : > { %1413 = vrot.lane.b32.xlu1 %v4609_v0, %s3950_s6  ;;  %1415 = vrot.lane.b32.xlu0 %v4611_v1, %s3950_s6 }
 0x19c   : > { %v4969_v16 = vpop.permute.xlu1 %885  ;;  %v4971_v60 = vpop.permute.xlu0 %887 }
 0x19d   : > { %7213 = vst [vmem:[#allocation39_spill] sm:$0xff] %v4971_v60 }
 0x19e   : > { %1417 = vrot.lane.b32.xlu1 %v4621_v5, %s3950_s6  ;;  %1437 = vrot.lane.b32.xlu0 %v4669_v24, %s3950_s6 }
 0x1a0   : > { %v4977_v20 = vpop.permute.xlu1 %889  ;;  %v4979_v21 = vpop.permute.xlu0 %891 }
 0x1a1   : > { %7214 = vst [vmem:[#allocation40_spill] sm:$0xff] %v4977_v20  ;;  %7215 = vst [vmem:[#allocation41_spill] sm:$0xff] %v4979_v21 }
 0x1a2   : > { %1439 = vrot.lane.b32.xlu1 %v4671_v25, %s3950_s6  ;;  %1441 = vrot.lane.b32.xlu0 %v4681_v29, %s3950_s6 }
 0x1a4   : > { %v4985_v0 = vpop.permute.xlu1 %893  ;;  %v4987_v1 = vpop.permute.xlu0 %895 }
 0x1a5   : > { %7216 = vst [vmem:[#allocation42_spill] sm:$0xff] %v4985_v0  ;;  %7217 = vst [vmem:[#allocation43_spill] sm:$0xff] %v4987_v1 }
 0x1a6   : > { %1443 = vrot.lane.b32.xlu1 %v4679_v28, %s3950_s6  ;;  %1445 = vrot.lane.b32.xlu0 %v4691_v33, %s3950_s6 }
 0x1a8   : > { %v4993_v5 = vpop.permute.xlu1 %897  ;;  %v4995_v24 = vpop.permute.xlu0 %899 }
 0x1a9   : > { %7218 = vst [vmem:[#allocation44_spill] sm:$0xff] %v4993_v5  ;;  %7219 = vst [vmem:[#allocation45_spill] sm:$0xff] %v4995_v24 }
 0x1aa   : > { %1447 = vrot.lane.b32.xlu1 %v4689_v32, %s3950_s6  ;;  %1449 = vrot.lane.b32.xlu0 %v4701_v37, %s3950_s6 }
 0x1ac   : > { %v5001_v21 = vpop.permute.xlu1 %901  ;;  %v5003_v0 = vpop.permute.xlu0 %903 }
 0x1ad   : > { %7220 = vst [vmem:[#allocation46_spill] sm:$0xff] %v5001_v21  ;;  %7221 = vst [vmem:[#allocation47_spill] sm:$0xff] %v5003_v0 }
 0x1ae   : > { %1451 = vrot.lane.b32.xlu1 %v4699_v36, %s3950_s6  ;;  %1453 = vrot.lane.b32.xlu0 %v4711_v41, %s3950_s6 }
 0x1b0   : > { %v5009_v1 = vpop.permute.xlu1 %905  ;;  %v5011_v5 = vpop.permute.xlu0 %907 }
 0x1b1   : > { %7222 = vst [vmem:[#allocation48_spill] sm:$0xff] %v5009_v1  ;;  %7223 = vst [vmem:[#allocation49_spill] sm:$0xff] %v5011_v5 }
 0x1b2   : > { %1467 = vrot.lane.b32.xlu1 %v4739_v59, %s3950_s6  ;;  %1469 = vrot.lane.b32.xlu0 %v4749_v2, %s3950_s6 }
 0x1b4   : > { %v5017_v24 = vpop.permute.xlu1 %909  ;;  %v5019_v21 = vpop.permute.xlu0 %911 }
 0x1b5   : > { %7224 = vst [vmem:[#allocation50_spill] sm:$0xff] %v5017_v24  ;;  %7225 = vst [vmem:[#allocation51_spill] sm:$0xff] %v5019_v21 }
 0x1b6   : > { %1471 = vrot.lane.b32.xlu1 %v4747_v63, %s3950_s6  ;;  %1473 = vrot.lane.b32.xlu0 %v4757_v6, %s3950_s6 }
 0x1b8   : > { %v5025_v0 = vpop.permute.xlu1 %913  ;;  %v5027_v1 = vpop.permute.xlu0 %1397 }
 0x1b9   : > { %7226 = vst [vmem:[#allocation52_spill] sm:$0xff] %v5025_v0 }
 0x1ba   : > { %1475 = vrot.lane.b32.xlu1 %v4755_v3, %s3950_s6  ;;  %1477 = vrot.lane.b32.xlu0 %v4765_v10, %s3950_s6 }
 0x1bc   : > { %v5033_v5 = vpop.permute.xlu1 %1395  ;;  %v5035_v24 = vpop.permute.xlu0 %1155 }
 0x1bd   : > { %7227 = vst [vmem:[#allocation53_spill] sm:$0xff] %v5035_v24 }
 0x1be   : > { %1455 = vrot.lane.b32.xlu1 %v4709_v40, %s3950_s6  ;;  %1457 = vrot.lane.b32.xlu0 %v4721_v46, %s3950_s6 }
 0x1c0   : > { %v5041_v21 = vpop.permute.xlu1 %1399  ;;  %v5043_v0 = vpop.permute.xlu0 %1159 }
 0x1c1   : > { %7228 = vst [vmem:[#allocation54_spill] sm:$0xff] %v5043_v0 }
 0x1c2   : > { %1459 = vrot.lane.b32.xlu1 %v4719_v44, %s3950_s6  ;;  %1479 = vrot.lane.b32.xlu0 %v4763_v7, %s3950_s6 }
 0x1c4   : > { %v5049_v25 = vpop.permute.xlu1 %1157  ;;  %v5051_v20 = vpop.permute.xlu0 %1163 }
 0x1c5   : > { %7229 = vst [vmem:[#allocation55_spill] sm:$0xff] %v5049_v25  ;;  %7230 = vst [vmem:[#allocation56_spill] sm:$0xff] %v5051_v20 }
 0x1c6   : > { %1481 = vrot.lane.b32.xlu1 %v4773_v14, %s3950_s6  ;;  %1483 = vrot.lane.b32.xlu0 %v4771_v11, %s3950_s6 }
 0x1c8   : > { %v5057_v24 = vpop.permute.xlu1 %1161  ;;  %v5059_v60 = vpop.permute.xlu0 %1167 }
 0x1c9   : > { %7231 = vst [vmem:[#allocation57_spill] sm:$0xff] %v5057_v24  ;;  %7232 = vst [vmem:[#allocation58_spill] sm:$0xff] %v5059_v60 }
 0x1ca   : > { %1461 = vrot.lane.b32.xlu1 %v4731_v54, %s3950_s6  ;;  %1463 = vrot.lane.b32.xlu0 %v4729_v51, %s3950_s6 }
 0x1cc   : > { %v5065_v0 = vpop.permute.xlu1 %1165  ;;  %v5067_v25 = vpop.permute.xlu0 %1171 }
 0x1cd   : > { %7233 = vst [vmem:[#allocation59_spill] sm:$0xff] %v5065_v0  ;;  %7234 = vst [vmem:[#allocation60_spill] sm:$0xff] %v5067_v25 }
 0x1ce   : > { %1465 = vrot.lane.b32.xlu1 %v4741_v62, %s3950_s6  ;;  %1485 = vrot.lane.b32.xlu0 %v4781_v18, %s3950_s6 }
 0x1d0   : > { %v5073_v20 = vpop.permute.xlu1 %1169  ;;  %v5075_v24 = vpop.permute.xlu0 %1175 }
 0x1d1   : > { %7235 = vst [vmem:[#allocation61_spill] sm:$0xff] %v5073_v20  ;;  %7236 = vst [vmem:[#allocation62_spill] sm:$0xff] %v5075_v24  ;;  %v7241_v24 = vld [vmem:[#allocation26_spill] sm:$0xff] }
 0x1d2   : > { %1487 = vrot.lane.b32.xlu1 %v4779_v15, %s3950_s6  ;;  %1489 = vrot.lane.b32.xlu0 %v4789_v22, %s3950_s6  ;;  %v7242_v15 = vld [vmem:[#allocation28_spill] sm:$0xff] }
 0x1d4   : > { %v5081_v60 = vpop.permute.xlu1 %1173  ;;  %v5083_v0 = vpop.permute.xlu0 %1179 }
 0x1d5   : > { %7237 = vst [vmem:[#allocation63_spill] sm:$0xff] %v5081_v60  ;;  %7238 = vst [vmem:[#allocation64_spill] sm:$0xff] %v5083_v0  ;;  %v7245_v0 = vld [vmem:[#allocation27_spill] sm:$0xff] }
 0x1d6   : > { %1491 = vrot.lane.b32.xlu1 %v4787_v19, %s3950_s6  ;;  %1493 = vrot.lane.b32.xlu0 %v4797_v26, %s3950_s6  ;;  %v7246_v19 = vld [vmem:[#allocation30_spill] sm:$0xff] }
 0x1d8   : > { %v5089_v25 = vpop.permute.xlu1 %1177  ;;  %v5091_v20 = vpop.permute.xlu0 %1183 }
 0x1d9   : > { %7239 = vst [vmem:[#allocation65_spill] sm:$0xff] %v5089_v25  ;;  %7240 = vst [vmem:[#allocation66_spill] sm:$0xff] %v5091_v20  ;;  %v7249_v20 = vld [vmem:[#allocation29_spill] sm:$0xff] }
 0x1da   : > { %1495 = vrot.lane.b32.xlu1 %v7241_v24, %s3950_s6  ;;  %1497 = vrot.lane.b32.xlu0 %v7242_v15, %s3950_s6  ;;  %v7250_v24 = vld [vmem:[#allocation32_spill] sm:$0xff] }
 0x1dc   : > { %v5097_v22 = vpop.permute.xlu1 %1181  ;;  %v5099_v60 = vpop.permute.xlu0 %1187 }
 0x1dd   : > { %7243 = vst [vmem:[#allocation26_spill] sm:$0xff] %v5097_v22  ;;  %7244 = vst [vmem:[#allocation28_spill] sm:$0xff] %v5099_v60  ;;  %v7253_v60 = vld [vmem:[#allocation31_spill] sm:$0xff] }
 0x1de   : > { %1499 = vrot.lane.b32.xlu1 %v7245_v0, %s3950_s6  ;;  %1501 = vrot.lane.b32.xlu0 %v7246_v19, %s3950_s6  ;;  %v7254_v0 = vld [vmem:[#allocation34_spill] sm:$0xff]  ;;  %v998_v19 = vadd.f32 %v4885_v47, %v4681_v29  ;;  %v1001_v47 = vadd.f32 %v4894_v31, %v4689_v32 }
 0x1e0   : > { %v5105_v26 = vpop.permute.xlu1 %1185  ;;  %v5107_v25 = vpop.permute.xlu0 %1191 }
 0x1e1   : > { %7247 = vst [vmem:[#allocation27_spill] sm:$0xff] %v5105_v26  ;;  %7248 = vst [vmem:[#allocation30_spill] sm:$0xff] %v5107_v25  ;;  %v999_v25 = vadd.f32 %v4887_v27, %v4679_v28 }
 0x1e2   : > { %1503 = vrot.lane.b32.xlu1 %v7249_v20, %s3950_s6  ;;  %1505 = vrot.lane.b32.xlu0 %v7250_v24, %s3950_s6  ;;  %v7257_v24 = vld [vmem:[#allocation33_spill] sm:$0xff] }
 0x1e4   : > { %v5113_v15 = vpop.permute.xlu1 %1189  ;;  %v5115_v22 = vpop.permute.xlu0 %1195 }
 0x1e5   : > { %7251 = vst [vmem:[#allocation29_spill] sm:$0xff] %v5113_v15  ;;  %7252 = vst [vmem:[#allocation32_spill] sm:$0xff] %v5115_v22  ;;  %v7258_v22 = vld [vmem:[#allocation35_spill] sm:$0xff]  ;;  %v1059_v15 = vmul.f32 0.12007839, %v999_v25  ;;  %v1003_v25 = vadd.f32 %v4900_v42, %v4699_v36  ;;  %v1013_v42 = vadd.f32 %v4939_v50, %v4747_v63  ;;  %v7260_v50 = vld [vmem:[#allocation12_spill] sm:$0xff] }
 0x1e6   : > { %1507 = vrot.lane.b32.xlu1 %v7253_v60, %s3950_s6  ;;  %1509 = vrot.lane.b32.xlu0 %v7254_v0, %s3950_s6  ;;  %v1058_v60 = vmul.f32 0.12007839, %v998_v19  ;;  %v1000_v0 = vadd.f32 %v4892_v38, %v4691_v33 }
 0x1e8   : > { %v5125_v20 = vpop.permute.xlu1 %1193  ;;  %v5127_v26 = vpop.permute.xlu0 %1199 }
 0x1e9   : > { %7255 = vst [vmem:[#allocation31_spill] sm:$0xff] %v5125_v20  ;;  %7256 = vst [vmem:[#allocation34_spill] sm:$0xff] %v5127_v26  ;;  %v1060_v26 = vmul.f32 0.12007839, %v1000_v0 }
 0x1ea   : > { %1511 = vrot.lane.b32.xlu1 %v7257_v24, %s3950_s6  ;;  %1513 = vrot.lane.b32.xlu0 %v7258_v22, %s3950_s6  ;;  %v1061_v24 = vmul.f32 0.12007839, %v1001_v47  ;;  %v1002_v22 = vadd.f32 %v4898_v23, %v4701_v37  ;;  %v1012_v23 = vadd.f32 %v4937_v35, %v4749_v2  ;;  %v1016_v35 = vadd.f32 %v4953_v58, %v4765_v10 }
 0x1ec   : > { %v5137_v29 = vpop.permute.xlu1 %1197  ;;  %v1402_v27 = vpop.permute.xlu0 %1401  ;;  %v1062_v31 = vmul.f32 0.12007839, %v1002_v22 }
 0x1ed   : > { %7259 = vst [vmem:[#allocation33_spill] sm:$0xff] %v5137_v29  ;;  %v1063_v29 = vmul.f32 0.12007839, %v1003_v25 }
 0x1ee   : > { %1201 = vrot.lane.b32.xlu1 %v1058_v60, %s3948_s20  ;;  %1203 = vrot.lane.b32.xlu0 %v1059_v15, %s3948_s20  ;;  %v1004_v60 = vadd.f32 %v4905_v39, %v4711_v41  ;;  %v1011_v15 = vadd.f32 %v4931_v45, %v4739_v59  ;;  %v1072_v41 = vmul.f32 0.12007839, %v1012_v23  ;;  %v1073_v39 = vmul.f32 0.12007839, %v1013_v42 }
 0x1ef   : > { %v1014_v45 = vadd.f32 %v4945_v49, %v4757_v6  ;;  %v1578_v42 = vadd.f32 %v1402_v27, %v4579_v52 }
 0x1f0   : > { %v1404_v19 = vpop.permute.xlu1 %1403  ;;  %v1406_v38 = vpop.permute.xlu0 %1405  ;;  %v1064_v36 = vmul.f32 0.12007839, %v1004_v60  ;;  %v1071_v37 = vmul.f32 0.12007839, %v1011_v15 }
 0x1f1   : > { %v1074_v63 = vmul.f32 0.12007839, %v1014_v45 }
 0x1f2   : > { %1205 = vrot.lane.b32.xlu1 %v1060_v26, %s3948_s20  ;;  %1207 = vrot.lane.b32.xlu0 %v1061_v24, %s3948_s20 }
 0x1f4   : > { %v1420_v0 = vpop.permute.xlu1 %1419  ;;  %v1422_v47 = vpop.permute.xlu0 %1421 }
 0x1f5   : > { %v1588_v27 = vadd.f32 %v1422_v47, %v4631_v9 }
 0x1f6   : > { %1209 = vrot.lane.b32.xlu1 %v1062_v31, %s3948_s20  ;;  %1211 = vrot.lane.b32.xlu0 %v1063_v29, %s3948_s20  ;;  %v1015_v29 = vadd.f32 %v4947_v55, %v4755_v3  ;;  %v1575_v31 = vadd.f32 %v5033_v5, %v7260_v50  ;;  %v1076_v3 = vmul.f32 0.12007839, %v1016_v35  ;;  %v7261_v55 = vld [vmem:[#allocation13_spill] sm:$0xff] }
 0x1f7   : > { %v1576_v49 = vadd.f32 %v5027_v1, %v7261_v55 }
 0x1f8   : > { %v1424_v26 = vpop.permute.xlu1 %1423  ;;  %v1426_v24 = vpop.permute.xlu0 %1425  ;;  %v1075_v2 = vmul.f32 0.12007839, %v1015_v29  ;;  %v1635_v15 = vmul.f32 0.23388074, %v1575_v31  ;;  %v1580_v29 = vadd.f32 %v1406_v38, %v4591_v57  ;;  %v1648_v57 = vmul.f32 0.23388074, %v1588_v27 }
 0x1f9   : > { %v1636_v5 = vmul.f32 0.23388074, %v1576_v49  ;;  %v1590_v38 = vadd.f32 %v1426_v24, %v4639_v12  ;;  %v1006_v24 = vadd.f32 %v4913_v43, %v4721_v46  ;;  %v1018_v46 = vadd.f32 %v4961_v61, %v4773_v14  ;;  %v7267_v27 = vld [vmem:[#allocation20_spill] sm:$0xff] }
 0x1fa   : > { %1213 = vrot.lane.b32.xlu1 %v1064_v36, %s3948_s20  ;;  %1227 = vrot.lane.b32.xlu0 %v1071_v37, %s3948_s20  ;;  %v7262_v36 = vld [vmem:[#allocation14_spill] sm:$0xff]  ;;  %v1640_v52 = vmul.f32 0.23388074, %v1580_v29 }
 0x1fb   : > { %v1577_v37 = vadd.f32 %v5041_v21, %v7262_v36  ;;  %v1638_v21 = vmul.f32 0.23388074, %v1578_v42  ;;  %v1650_v9 = vmul.f32 0.23388074, %v1590_v38  ;;  %v1017_v36 = vadd.f32 %v4955_v30, %v4763_v7 }
 0x1fc   : > { %v1428_v22 = vpop.permute.xlu1 %1427  ;;  %v1430_v25 = vpop.permute.xlu0 %1429 }
 0x1fd   : > { %v1637_v23 = vmul.f32 0.23388074, %v1577_v37  ;;  %v1078_v37 = vmul.f32 0.12007839, %v1018_v46  ;;  %v7272_v46 = vld [vmem:[#allocation24_spill] sm:$0xff] }
 0x1fe   : > { %1229 = vrot.lane.b32.xlu1 %v1072_v41, %s3948_s20  ;;  %1231 = vrot.lane.b32.xlu0 %v1073_v39, %s3948_s20  ;;  %v1579_v41 = vadd.f32 %v1404_v19, %v4581_v53  ;;  %v1589_v19 = vadd.f32 %v1424_v26, %v4629_v8  ;;  %v1005_v8 = vadd.f32 %v4907_v48, %v4709_v40 }
 0x1ff   : > { %v1592_v26 = vadd.f32 %v1430_v25, %v4651_v17  ;;  %v1066_v17 = vmul.f32 0.12007839, %v1006_v24  ;;  %v7271_v24 = vld [vmem:[#allocation38_spill] sm:$0xff] }
 0x200   : > { %v5169_v60 = vpop.permute.xlu1 %1407  ;;  %v5171_v6 = vpop.permute.xlu0 %1409  ;;  %v1639_v45 = vmul.f32 0.23388074, %v1579_v41  ;;  %v7264_v41 = vld [vmem:[#allocation17_spill] sm:$0xff] }
 0x201   : > { %v1652_v40 = vmul.f32 0.23388074, %v1592_v26  ;;  %v7270_v26 = vld [vmem:[#allocation37_spill] sm:$0xff] }
 0x202   : > { %1233 = vrot.lane.b32.xlu1 %v1074_v63, %s3948_s20  ;;  %1235 = vrot.lane.b32.xlu0 %v1075_v2, %s3948_s20  ;;  %v1587_v63 = vadd.f32 %v1420_v0, %v4619_v4  ;;  %v1649_v4 = vmul.f32 0.23388074, %v1589_v19  ;;  %v1591_v0 = vadd.f32 %v1428_v22, %v4641_v13  ;;  %v1065_v13 = vmul.f32 0.12007839, %v1005_v8  ;;  %v7269_v8 = vld [vmem:[#allocation19_spill] sm:$0xff] }
 0x203   : > { %v1007_v22 = vadd.f32 %v4915_v34, %v4719_v44  ;;  %v1077_v34 = vmul.f32 0.12007839, %v1017_v36  ;;  %v1020_v36 = vadd.f32 %v4969_v16, %v4781_v18 }
 0x204   : > { %v5179_v10 = vpop.permute.xlu1 %1411  ;;  %v5181_v58 = vpop.permute.xlu0 %1431  ;;  %v1647_v53 = vmul.f32 0.23388074, %v1587_v63  ;;  %v1651_v47 = vmul.f32 0.23388074, %v1591_v0 }
 0x205   : > { %v1067_v25 = vmul.f32 0.12007839, %v1007_v22 }
 0x206   : > { %1237 = vrot.lane.b32.xlu1 %v1076_v3, %s3948_s20  ;;  %1755 = vrot.lane.b32.xlu0 %v1635_v15, %s3951_s14 }
 0x208   : > { %v5187_v1 = vpop.permute.xlu1 %1433  ;;  %v5189_v39 = vpop.permute.xlu0 %1435 }
 0x209   : > { %v1594_v19 = vadd.f32 %v5187_v1, %v7267_v27 }
 0x20a   : > { %1757 = vrot.lane.b32.xlu1 %v1636_v5, %s3951_s14  ;;  %1759 = vrot.lane.b32.xlu0 %v1637_v23, %s3951_s14  ;;  %v1019_v5 = vadd.f32 %v4963_v56, %v4771_v11  ;;  %v7263_v23 = vld [vmem:[#allocation15_spill] sm:$0xff] }
 0x20b   : > { %v1581_v42 = vadd.f32 %v5169_v60, %v7263_v23  ;;  %v1654_v0 = vmul.f32 0.23388074, %v1594_v19 }
 0x20c   : > { %v5195_v2 = vpop.permute.xlu1 %1413  ;;  %v5197_v35 = vpop.permute.xlu0 %1415  ;;  %v1079_v61 = vmul.f32 0.12007839, %v1019_v5  ;;  %v1080_v5 = vmul.f32 0.12007839, %v1020_v36  ;;  %v3762_v36 = vld [vmem:[#allocation2 + $0x18] sm:$0xff] }
 0x20d   : > { %v1641_v14 = vmul.f32 0.23388074, %v1581_v42  ;;  %v7274_v42 = vld [vmem:[#allocation25_spill] sm:$0xff] }
 0x20e   : > { %1763 = vrot.lane.b32.xlu0 %v1639_v45, %s3951_s14  ;;  %1761 = vrot.lane.b32.xlu1 %v1638_v21, %s3951_s14  ;;  %v1582_v21 = vadd.f32 %v5171_v6, %v7264_v41  ;;  %v7265_v45 = vld [vmem:[#allocation16_spill] sm:$0xff] }
 0x20f   : > { %v1583_v29 = vadd.f32 %v5179_v10, %v7265_v45  ;;  %v7268_v10 = vld [vmem:[#allocation36_spill] sm:$0xff] }
 0x210   : > { %v5203_v50 = vpop.permute.xlu1 %1417  ;;  %v5205_v31 = vpop.permute.xlu0 %1437  ;;  %v1642_v60 = vmul.f32 0.23388074, %v1582_v21  ;;  %v3757_v41 = vld [vmem:[#allocation2 + $0x48] sm:$0xff] }
 0x211   : > { %v1643_v63 = vmul.f32 0.23388074, %v1583_v29  ;;  %v1584_v21 = vadd.f32 %v3757_v41, %v5195_v2 }
 0x212   : > { %1779 = vrot.lane.b32.xlu0 %v1647_v53, %s3951_s14  ;;  %1765 = vrot.lane.b32.xlu1 %v1640_v52, %s3951_s14  ;;  %v7266_v52 = vld [vmem:[#allocation18_spill] sm:$0xff] }
 0x213   : > { %v1593_v53 = vadd.f32 %v5181_v58, %v7266_v52  ;;  %v1644_v29 = vmul.f32 0.23388074, %v1584_v21  ;;  %v3759_v52 = vld [vmem:[#allocation2 + $0x58] sm:$0xf] }
 0x214   : > { %v5211_v3 = vpop.permute.xlu1 %1439  ;;  %v5213_v55 = vpop.permute.xlu0 %1441 }
 0x215   : > { %v1653_v38 = vmul.f32 0.23388074, %v1593_v53  ;;  %v1586_v53 = vadd.f32 %v3759_v52, %v5203_v50 }
 0x216   : > { %1783 = vrot.lane.b32.xlu0 %v1649_v4, %s3951_s14  ;;  %1781 = vrot.lane.b32.xlu1 %v1648_v57, %s3951_s14  ;;  %v1008_v4 = vadd.f32 %v7268_v10, %v4731_v54  ;;  %v1010_v54 = vadd.f32 %v7271_v24, %v4741_v62 }
 0x217   : > { %v1646_v10 = vmul.f32 0.23388074, %v1586_v53  ;;  %v3767_v53 = vld [vmem:[#allocation2 + $0x40] sm:$0xf] }
 0x218   : > { %v5220_v49 = vpop.permute.xlu1 %1443  ;;  %v5222_v12 = vpop.permute.xlu0 %1445  ;;  %v1068_v1 = vmul.f32 0.12007839, %v1008_v4  ;;  %v7276_v4 = vld [vmem:[#allocation21_spill] sm:$0xff] }
 0x219   : > { %v1599_v24 = vadd.f32 %v5220_v49, %v4679_v28  ;;  %v3764_v28 = vld [vmem:[#allocation2 + $0x20] sm:$0xff] }
 0x21a   : > { %1787 = vrot.lane.b32.xlu0 %v1651_v47, %s3951_s14  ;;  %1785 = vrot.lane.b32.xlu1 %v1650_v9, %s3951_s14  ;;  %v1595_v9 = vadd.f32 %v5189_v39, %v7269_v8  ;;  %v5351_v49 = vmul.f32 0.2920817, %v3764_v28  ;;  %v3775_v28 = vld [vmem:[#allocation2 + $0x78] sm:$0xff] }
 0x21c   : > { %v5230_v48 = vpop.permute.xlu1 %1447  ;;  %v5232_v15 = vpop.permute.xlu0 %1449  ;;  %v1655_v22 = vmul.f32 0.23388074, %v1595_v9 }
 0x21e   : > { %1215 = vrot.lane.b32.xlu0 %v1065_v13, %s3948_s20  ;;  %1789 = vrot.lane.b32.xlu1 %v1652_v40, %s3951_s14  ;;  %v1009_v13 = vadd.f32 %v7270_v26, %v4729_v51  ;;  %v7279_v26 = vld [vmem:[#allocation23_spill] sm:$0xff] }
 0x220   : > { %v5240_v43 = vpop.permute.xlu1 %1451  ;;  %v5242_v44 = vpop.permute.xlu0 %1453  ;;  %v1069_v39 = vmul.f32 0.12007839, %v1009_v13  ;;  %v1598_v13 = vadd.f32 %v5213_v55, %v7279_v26  ;;  %v3763_v55 = vld [vmem:[#allocation2 + $0x8] sm:$0xff] }
 0x222   : > { %1219 = vrot.lane.b32.xlu0 %v1067_v25, %s3948_s20  ;;  %1217 = vrot.lane.b32.xlu1 %v1066_v17, %s3948_s20  ;;  %v1070_v25 = vmul.f32 0.12007839, %v1010_v54 }
 0x224   : > { %v5250_v7 = vpop.permute.xlu1 %1467  ;;  %v5252_v30 = vpop.permute.xlu0 %1469 }
 0x226   : > { %1241 = vrot.lane.b32.xlu0 %v1078_v37, %s3948_s20  ;;  %1239 = vrot.lane.b32.xlu1 %v1077_v34, %s3948_s20  ;;  %v7273_v34 = vld [vmem:[#allocation39_spill] sm:$0xff] }
 0x227   : > { %v1021_v51 = vadd.f32 %v7273_v34, %v7272_v46  ;;  %v5345_v46 = vmul.f32 0.2920817, %v3762_v36  ;;  %v5349_v34 = vmul.f32 0.2920817, %v3763_v55  ;;  %v3774_v36 = vld [vmem:[#allocation2 + $0x80] sm:$0xff] }
 0x228   : > { %v5260_v56 = vpop.permute.xlu1 %1471  ;;  %v5262_v11 = vpop.permute.xlu0 %1473  ;;  %v5389_v55 = vmul.f32 0.2920817, %v3774_v36  ;;  %v3782_v36 = vld [vmem:[#allocation2 + $0xb8] sm:$0xf] }
 0x229   : > { %v1081_v23 = vmul.f32 0.12007839, %v1021_v51  ;;  %v3765_v51 = vld [vmem:[#allocation2 + $0x28] sm:$0xf] }
 0x22a   : > { %1767 = vrot.lane.b32.xlu0 %v1641_v14, %s3951_s14  ;;  %1243 = vrot.lane.b32.xlu1 %v1079_v61, %s3948_s20  ;;  %v7275_v61 = vld [vmem:[#allocation40_spill] sm:$0xff] }
 0x22b   : > { %v1022_v14 = vadd.f32 %v7275_v61, %v7274_v42  ;;  %v1659_v42 = vmul.f32 0.23388074, %v1599_v24  ;;  %v1600_v61 = vadd.f32 %v5222_v12, %v4691_v33  ;;  %v5373_v33 = vmul.f32 0.2920817, %v3759_v52  ;;  %v3773_v52 = vld [vmem:[#allocation2 + $0xe0] sm:$0xff] }
 0x22c   : > { %v5270_v6 = vpop.permute.xlu1 %1475  ;;  %v5272_v57 = vpop.permute.xlu0 %1477  ;;  %v1603_v24 = vadd.f32 %v3773_v52, %v5240_v43  ;;  %v3779_v43 = vld [vmem:[#allocation2 + $0x98] sm:$0xff] }
 0x22d   : > { %v1082_v45 = vmul.f32 0.12007839, %v1022_v14  ;;  %v1601_v14 = vadd.f32 %v5230_v48, %v4689_v32  ;;  %v3769_v32 = vld [vmem:[#allocation2 + $0x60] sm:$0xff]  ;;  %v3770_v48 = vld [vmem:[#allocation2 + $0x70] sm:$0xf] }
 0x22e   : > { %1771 = vrot.lane.b32.xlu0 %v1643_v63, %s3951_s14  ;;  %1769 = vrot.lane.b32.xlu1 %v1642_v60, %s3951_s14  ;;  %v3758_v60 = vld [vmem:[#allocation2 + $0x50] sm:$0xff]  ;;  %v5377_v12 = vmul.f32 0.2920817, %v3769_v32  ;;  %v1660_v26 = vmul.f32 0.23388074, %v1600_v61 }
 0x22f   : > { %v1585_v63 = vadd.f32 %v3758_v60, %v5197_v35  ;;  %v3777_v61 = vld [vmem:[#allocation2 + $0x90] sm:$0xff] }
 0x230   : > { %v5280_v58 = vpop.permute.xlu1 %1455  ;;  %v5282_v47 = vpop.permute.xlu0 %1457 }
 0x231   : > { %v1645_v2 = vmul.f32 0.23388074, %v1585_v63 }
 0x232   : > { %1793 = vrot.lane.b32.xlu0 %v1654_v0, %s3951_s14  ;;  %1791 = vrot.lane.b32.xlu1 %v1653_v38, %s3951_s14  ;;  %v1596_v38 = vadd.f32 %v5205_v31, %v7276_v4  ;;  %v7277_v0 = vld [vmem:[#allocation22_spill] sm:$0xff] }
 0x233   : > { %v1597_v8 = vadd.f32 %v5211_v3, %v7277_v0  ;;  %v3760_v3 = vld [vmem:[#allocation2] sm:$0xff]  ;;  %v5371_v0 = vmul.f32 0.2920817, %v3757_v41 }
 0x234   : > { %v5290_v40 = vpop.permute.xlu1 %1459  ;;  %v5292_v17 = vpop.permute.xlu0 %1479  ;;  %v1656_v50 = vmul.f32 0.23388074, %v1596_v38  ;;  %v5369_v38 = vmul.f32 0.2920817, %v3758_v60  ;;  %v1661_v60 = vmul.f32 0.23388074, %v1601_v14 }
 0x235   : > { %v5395_v14 = vmul.f32 0.2920817, %v3777_v61  ;;  %v1663_v61 = vmul.f32 0.23388074, %v1603_v24 }
 0x236   : > { %1221 = vrot.lane.b32.xlu0 %v1068_v1, %s3948_s20  ;;  %1795 = vrot.lane.b32.xlu1 %v1655_v22, %s3951_s14  ;;  %v1657_v1 = vmul.f32 0.23388074, %v1597_v8  ;;  %v5341_v22 = vmul.f32 0.2920817, %v3760_v3  ;;  %v5379_v8 = vmul.f32 0.2920817, %v3770_v48 }
 0x237   : > { %v3781_v48 = vld [vmem:[#allocation2 + $0xa8] sm:$0xff] }
 0x238   : > { %v5300_v37 = vpop.permute.xlu1 %1481  ;;  %v5302_v62 = vpop.permute.xlu0 %1483 }
 0x23a   : > { %1225 = vrot.lane.b32.xlu0 %v1070_v25, %s3948_s20  ;;  %1223 = vrot.lane.b32.xlu1 %v1069_v39, %s3948_s20  ;;  %v3761_v39 = vld [vmem:[#allocation2 + $0x10] sm:$0xf] }
 0x23b   : > { %v5343_v25 = vmul.f32 0.2920817, %v3761_v39 }
 0x23c   : > { %v5309_v16 = vpop.permute.xlu1 %1461  ;;  %v5311_v18 = vpop.permute.xlu0 %1463 }
 0x23e   : > { %1247 = vrot.lane.b32.xlu0 %v1081_v23, %s3948_s20  ;;  %1245 = vrot.lane.b32.xlu1 %v1080_v5, %s3948_s20  ;;  %v5353_v5 = vmul.f32 0.2920817, %v3765_v51  ;;  %v1658_v23 = vmul.f32 0.23388074, %v1598_v13  ;;  %v3772_v13 = vld [vmem:[#allocation2 + $0xd8] sm:$0xff] }
 0x23f   : > { %v1602_v41 = vadd.f32 %v3772_v13, %v5232_v15  ;;  %v5391_v51 = vmul.f32 0.2920817, %v3775_v28  ;;  %v3778_v15 = vld [vmem:[#allocation2 + $0xa0] sm:$0xf]  ;;  %v5407_v28 = vmul.f32 0.2920817, %v3782_v36 }
 0x240   : > { %v5317_v27 = vpop.permute.xlu1 %1465  ;;  %v5319_v19 = vpop.permute.xlu0 %1485  ;;  %v3786_v36 = vld [vmem:[#allocation2 + $0xd0] sm:$0xf] }
 0x241   : > { %7289 = vst [vmem:[#allocation19_spill] sm:$0xff] %v5407_v28  ;;  %v5420_v28 = vmul.f32 0.2920817, %v3786_v36  ;;  %v5437_v36 = vld [vmem:[#allocation2 + $0x100] sm:$0xf] }
 0x242   : > { %1773 = vrot.lane.b32.xlu0 %v1644_v29, %s3951_s14  ;;  %1249 = vrot.lane.b32.xlu1 %v1082_v45, %s3948_s20  ;;  %v3766_v29 = vld [vmem:[#allocation2 + $0x30] sm:$0xff] }
 0x243   : > { %v5363_v63 = vmul.f32 0.2920817, %v3766_v29  ;;  %v5397_v29 = vmul.f32 0.2920817, %v3778_v15  ;;  %v3783_v15 = vld [vmem:[#allocation2 + $0xe8] sm:$0xf] }
 0x244   : > { %v5327_v35 = vpop.permute.xlu1 %1487  ;;  %v5329_v9 = vpop.permute.xlu0 %1489  ;;  %7294 = vst [vmem:[#allocation25_spill] sm:$0xff] %v5420_v28  ;;  %v5448_v28 = vld [vmem:[#allocation2 + $0x108] sm:$0xff] }
 0x245   : > { %7278 = vst [vmem:[#allocation35_spill] sm:$0xff] %v5329_v9  ;;  %v7346_v9 = vld [vmem:[#allocation46_spill] sm:$0xff] }
 0x246   : > { %1777 = vrot.lane.b32.xlu0 %v1646_v10, %s3951_s14  ;;  %1775 = vrot.lane.b32.xlu1 %v1645_v2, %s3951_s14  ;;  %v5365_v2 = vmul.f32 0.2920817, %v3767_v53  ;;  %v3768_v10 = vld [vmem:[#allocation2 + $0x38] sm:$0xff]  ;;  %v5399_v53 = vmul.f32 0.2920817, %v3779_v43  ;;  %v1611_v43 = vadd.f32 %v5250_v7, %v4739_v59 }
 0x247   : > { %v5367_v4 = vmul.f32 0.2920817, %v3768_v10  ;;  %v3780_v10 = vld [vmem:[#allocation2 + $0xb0] sm:$0xff]  ;;  %v5426_v59 = vmul.f32 0.2920817, %v3773_v52 }
 0x248   : > { %v5337_v31 = vpop.permute.xlu1 %1491  ;;  %v5339_v54 = vpop.permute.xlu0 %1493  ;;  %7286 = vst [vmem:[#allocation18_spill] sm:$0xff] %v5399_v53  ;;  %v5403_v32 = vmul.f32 0.2920817, %v3780_v10  ;;  %v3784_v10 = vld [vmem:[#allocation2 + $0xc0] sm:$0xff]  ;;  %v5428_v7 = vmul.f32 0.2920817, %v3783_v15 }
 0x249   : > { %7280 = vst [vmem:[#allocation12_spill] sm:$0xff] %v5337_v31  ;;  %7281 = vst [vmem:[#allocation13_spill] sm:$0xff] %v5339_v54 }
 0x24a   : > { %1799 = vrot.lane.b32.xlu0 %v1657_v1, %s3951_s14  ;;  %1797 = vrot.lane.b32.xlu1 %v1656_v50, %s3951_s14  ;;  %v3771_v50 = vld [vmem:[#allocation2 + $0x68] sm:$0xff]  ;;  %7287 = vst [vmem:[#allocation20_spill] sm:$0xff] %v5403_v32  ;;  %v5416_v32 = vmul.f32 0.2920817, %v3784_v10  ;;  %7296 = vst [vmem:[#allocation21_spill] sm:$0xff] %v5426_v59  ;;  %v5432_v10 = vld [vmem:[#allocation2 + $0xf8] sm:$0xff] }
 0x24b   : > { %v5381_v1 = vmul.f32 0.2920817, %v3771_v50  ;;  %v5405_v50 = vmul.f32 0.2920817, %v3781_v48  ;;  %v3785_v48 = vld [vmem:[#allocation2 + $0xc8] sm:$0xff]  ;;  %7297 = vst [vmem:[#allocation22_spill] sm:$0xff] %v5428_v7 }
 0x24c   : > { %v5359_v21 = vpop.permute.xlu1 %1495  ;;  %v5361_v45 = vpop.permute.xlu0 %1497  ;;  %7292 = vst [vmem:[#allocation24_spill] sm:$0xff] %v5416_v32 }
 0x24d   : > { %7282 = vst [vmem:[#allocation14_spill] sm:$0xff] %v5359_v21  ;;  %7283 = vst [vmem:[#allocation15_spill] sm:$0xff] %v5361_v45 }
 0x24e   : > { %1803 = vrot.lane.b32.xlu0 %v1659_v42, %s3951_s14  ;;  %1801 = vrot.lane.b32.xlu1 %v1658_v23, %s3951_s14  ;;  %v3776_v23 = vld [vmem:[#allocation2 + $0x88] sm:$0xf]  ;;  %7288 = vst [vmem:[#allocation36_spill] sm:$0xff] %v5405_v50  ;;  %v5418_v50 = vmul.f32 0.2920817, %v3785_v48 }
 0x24f   : > { %v5393_v42 = vmul.f32 0.2920817, %v3776_v23  ;;  %v1662_v23 = vmul.f32 0.23388074, %v1602_v41  ;;  %v3787_v41 = vld [vmem:[#allocation2 + $0xf0] sm:$0xff] }
 0x250   : > { %v5385_v3 = vpop.permute.xlu1 %1499  ;;  %v5387_v39 = vpop.permute.xlu0 %1501  ;;  %7293 = vst [vmem:[#allocation39_spill] sm:$0xff] %v5418_v50  ;;  %v5430_v24 = vmul.f32 0.2920817, %v3787_v41  ;;  %v5435_v48 = vmul.f32 0.2920817, %v5432_v10  ;;  %v5453_v50 = vld [vmem:[#allocation2 + $0x110] sm:$0xff] }
 0x251   : > { %7284 = vst [vmem:[#allocation17_spill] sm:$0xff] %v5385_v3  ;;  %7285 = vst [vmem:[#allocation16_spill] sm:$0xff] %v5387_v39  ;;  %v1604_v39 = vadd.f32 %v3783_v15, %v5242_v44  ;;  %v5424_v44 = vmul.f32 0.2920817, %v3772_v13  ;;  %v1671_v13 = vmul.f32 0.23388074, %v1611_v43 }
 0x252   : > { %1807 = vrot.lane.b32.xlu0 %v1661_v60, %s3951_s14  ;;  %1805 = vrot.lane.b32.xlu1 %v1660_v26, %s3951_s14  ;;  %7298 = vst [vmem:[#allocation23_spill] sm:$0xff] %v5430_v24  ;;  %7299 = vst [vmem:[#allocation67_spill] sm:$0xff] %v5435_v48  ;;  %v3791_v15 = vld [vmem:[#allocation2 + $0x130] sm:$0xf]  ;;  %v5451_v48 = vmul.f32 0.2920817, %v5448_v28 }
 0x253   : > { %7295 = vst [vmem:[#allocation40_spill] sm:$0xff] %v5424_v44  ;;  %v3790_v44 = vld [vmem:[#allocation2 + $0x128] sm:$0xff]  ;;  %v1613_v7 = vadd.f32 %v3791_v15, %v5260_v56  ;;  %v5458_v43 = vld [vmem:[#allocation2 + $0x118] sm:$0xf]  ;;  %v3795_v56 = vld [vmem:[#allocation2 + $0x120] sm:$0xff] }
 0x254   : > { %v5412_v60 = vpop.permute.xlu1 %1503  ;;  %v5414_v26 = vpop.permute.xlu0 %1505  ;;  %v1612_v52 = vadd.f32 %v3790_v44, %v5252_v30  ;;  %7303 = vst [vmem:[#allocation71_spill] sm:$0xff] %v5451_v48  ;;  %v5461_v30 = vmul.f32 0.2920817, %v5458_v43  ;;  %v5467_v32 = vmul.f32 0.2920817, %v3790_v44 }
 0x255   : > { %7290 = vst [vmem:[#allocation37_spill] sm:$0xff] %v5412_v60  ;;  %7291 = vst [vmem:[#allocation38_spill] sm:$0xff] %v5414_v26  ;;  %v5469_v48 = vmul.f32 0.2920817, %v3791_v15  ;;  %v3798_v60 = vld [vmem:[#allocation2 + $0x148] sm:$0xf] }
 0x256   : > { %1811 = vrot.lane.b32.xlu0 %v1663_v61, %s3951_s14  ;;  %1809 = vrot.lane.b32.xlu1 %v1662_v23, %s3951_s14  ;;  %v5440_v61 = vmul.f32 0.2920817, %v5437_v36  ;;  %v1664_v23 = vmul.f32 0.23388074, %v1604_v39  ;;  %v5456_v39 = vmul.f32 0.2920817, %v5453_v50 }
 0x257   : > { %7305 = vst [vmem:[#allocation73_spill] sm:$0xff] %v5461_v30  ;;  %7307 = vst [vmem:[#allocation75_spill] sm:$0xff] %v5467_v32  ;;  %v5475_v3 = vmul.f32 0.2920817, %v3798_v60  ;;  %v1672_v30 = vmul.f32 0.23388074, %v1612_v52 }
 0x258   : > { %7300 = vst [vmem:[#allocation68_spill] sm:$0xff] %v5440_v61  ;;  %v5444_v59 = vpop.permute.xlu1 %1507  ;;  %v5446_v24 = vpop.permute.xlu0 %1509  ;;  %7304 = vst [vmem:[#allocation72_spill] sm:$0xff] %v5456_v39  ;;  %v5465_v61 = vmul.f32 0.2920817, %v3795_v56  ;;  %v3797_v39 = vld [vmem:[#allocation2 + $0x140] sm:$0xff]  ;;  %v5483_v15 = vld [vmem:[#allocation2 + $0x150] sm:$0xff] }
 0x259   : > { %7301 = vst [vmem:[#allocation69_spill] sm:$0xff] %v5444_v59  ;;  %7302 = vst [vmem:[#allocation70_spill] sm:$0xff] %v5446_v24  ;;  %v3796_v24 = vld [vmem:[#allocation2 + $0x138] sm:$0xff]  ;;  %v5473_v26 = vmul.f32 0.2920817, %v3797_v39  ;;  %v1615_v56 = vadd.f32 %v3797_v39, %v5270_v6  ;;  %v5500_v6 = vld [vmem:[#allocation2 + $0x168] sm:$0xff] }
 0x25a   : > { %1827 = vrot.lane.b32.xlu0 %v1671_v13, %s3951_s14  ;;  %1813 = vrot.lane.b32.xlu1 %v1664_v23, %s3951_s14  ;;  %7306 = vst [vmem:[#allocation74_spill] sm:$0xff] %v5465_v61  ;;  %7308 = vst [vmem:[#allocation76_spill] sm:$0xff] %v5469_v48  ;;  %v5471_v59 = vmul.f32 0.2920817, %v3796_v24  ;;  %v1673_v13 = vmul.f32 0.23388074, %v1613_v7  ;;  %v1614_v23 = vadd.f32 %v3796_v24, %v5262_v11 }
 0x25b   : > { %7310 = vst [vmem:[#allocation78_spill] sm:$0xff] %v5473_v26  ;;  %7311 = vst [vmem:[#allocation79_spill] sm:$0xff] %v5475_v3  ;;  %v5488_v48 = vld [vmem:[#allocation2 + $0x158] sm:$0xff]  ;;  %v5493_v52 = vld [vmem:[#allocation2 + $0x160] sm:$0xf] }
 0x25c   : > { %7309 = vst [vmem:[#allocation77_spill] sm:$0xff] %v5471_v59  ;;  %v5479_v61 = vpop.permute.xlu1 %1511  ;;  %v5481_v44 = vpop.permute.xlu0 %1513  ;;  %v5486_v59 = vmul.f32 0.2920817, %v5483_v15  ;;  %v5491_v26 = vmul.f32 0.2920817, %v5488_v48  ;;  %v5505_v24 = vld [vmem:[#allocation2 + $0x170] sm:$0xff] }
 0x25d   : > { %7312 = vst [vmem:[#allocation80_spill] sm:$0xff] %v5479_v61  ;;  %7313 = vst [vmem:[#allocation81_spill] sm:$0xff] %v5481_v44  ;;  %v5496_v11 = vmul.f32 0.2920817, %v5493_v52  ;;  %v5503_v7 = vmul.f32 0.2920817, %v5500_v6  ;;  %v1616_v61 = vadd.f32 %v3798_v60, %v5272_v57 }
 0x25e   : > { %7314 = vst [vmem:[#allocation82_spill] sm:$0xff] %v5486_v59  ;;  %7315 = vst [vmem:[#allocation83_spill] sm:$0xff] %v5491_v26  ;;  %1831 = vrot.lane.b32.xlu0 %v1673_v13, %s3951_s14  ;;  %1829 = vrot.lane.b32.xlu1 %v1672_v30, %s3951_s14  ;;  %v5508_v39 = vmul.f32 0.2920817, %v5505_v24  ;;  %v5510_v26 = vld [vmem:[#allocation2 + $0x178] sm:$0xf] }
 0x25f   : > { %7316 = vst [vmem:[#allocation84_spill] sm:$0xff] %v5496_v11  ;;  %7317 = vst [vmem:[#allocation85_spill] sm:$0xff] %v5503_v7  ;;  %v5513_v59 = vmul.f32 0.2920817, %v5510_v26  ;;  %v5515_v11 = vld [vmem:[#allocation2 + $0x180] sm:$0xff]  ;;  %v5520_v30 = vld [vmem:[#allocation2 + $0x188] sm:$0xff] }
 0x260   : > { %7318 = vst [vmem:[#allocation86_spill] sm:$0xff] %v5508_v39  ;;  %7319 = vst [vmem:[#allocation87_spill] sm:$0xff] %v5510_v26  ;;  %v5518_v13 = vmul.f32 0.2920817, %v5515_v11  ;;  %v5523_v3 = vmul.f32 0.2920817, %v5520_v30  ;;  %v5532_v45 = vpop.permute.xlu1 %1201  ;;  %v5534_v20 = vpop.permute.xlu0 %1203  ;;  %v1606_v26 = vadd.f32 %v5432_v10, %v5282_v47 }
 0x261   : > { %7320 = vst [vmem:[#allocation88_spill] sm:$0xff] %v5513_v59  ;;  %7321 = vst [vmem:[#allocation89_spill] sm:$0xff] %v5515_v11  ;;  %v5525_v7 = vld [vmem:[#allocation2 + $0x190] sm:$0xf]  ;;  %v1674_v39 = vmul.f32 0.23388074, %v1614_v23  ;;  %v1605_v59 = vadd.f32 %v3787_v41, %v5280_v58 }
 0x262   : > { %7322 = vst [vmem:[#allocation90_spill] sm:$0xff] %v5518_v13  ;;  %7323 = vst [vmem:[#allocation91_spill] sm:$0xff] %v5520_v30  ;;  %v5528_v32 = vmul.f32 0.2920817, %v5525_v7  ;;  %v1675_v44 = vmul.f32 0.23388074, %v1615_v56 }
 0x263   : > { %7324 = vst [vmem:[#allocation92_spill] sm:$0xff] %v5523_v3  ;;  %7325 = vst [vmem:[#allocation93_spill] sm:$0xff] %v5525_v7  ;;  %v5536_v13 = vld [vmem:[#allocation2 + $0x198] sm:$0xff]  ;;  %v5541_v3 = vld [vmem:[#allocation2 + $0x1a0] sm:$0xff]  ;;  %1833 = vrot.lane.b32.xlu1 %v1674_v39, %s3951_s14  ;;  %v1665_v31 = vmul.f32 0.23388074, %v1605_v59 }
 0x264   : > { %7326 = vst [vmem:[#allocation94_spill] sm:$0xff] %v5528_v32  ;;  %7327 = vst [vmem:[#allocation95_spill] sm:$0xff] %v5532_v45  ;;  %v5539_v53 = vmul.f32 0.2920817, %v5536_v13  ;;  %v5544_v21 = vmul.f32 0.2920817, %v5541_v3  ;;  %1835 = vrot.lane.b32.xlu0 %v1675_v44, %s3951_s14 }
 0x265   : > { %7328 = vst [vmem:[#allocation96_spill] sm:$0xff] %v5534_v20  ;;  %v5546_v23 = vld [vmem:[#allocation2 + $0x1a8] sm:$0xf]  ;;  %v5553_v58 = vld [vmem:[#allocation2 + $0x1b0] sm:$0xff]  ;;  %v5558_v41 = vld [vmem:[#allocation2 + $0x1b8] sm:$0xff] }
 0x266   : > { %7329 = vst [vmem:[#allocation97_spill] sm:$0xff] %v5539_v53  ;;  %7330 = vst [vmem:[#allocation98_spill] sm:$0xff] %v5544_v21  ;;  %v5549_v57 = vmul.f32 0.2920817, %v5546_v23  ;;  %v5556_v60 = vmul.f32 0.2920817, %v5553_v58 }
 0x267   : > { %7332 = vst [vmem:[#allocation100_spill] sm:$0xff] %v5553_v58  ;;  %7334 = vst [vmem:[#allocation102_spill] sm:$0xff] %v5558_v41  ;;  %v5561_v56 = vmul.f32 0.2920817, %v5558_v41  ;;  %v5563_v21 = vld [vmem:[#allocation2 + $0x1c0] sm:$0xf] }
 0x268   : > { %7331 = vst [vmem:[#allocation99_spill] sm:$0xff] %v5549_v57  ;;  %7333 = vst [vmem:[#allocation101_spill] sm:$0xff] %v5556_v60  ;;  %v5566_v53 = vmul.f32 0.2920817, %v5563_v21  ;;  %v7338_v57 = vld [vmem:[#allocation41_spill] sm:$0xff]  ;;  %v7339_v32 = vld [vmem:[#allocation42_spill] sm:$0xff]  ;;  %1815 = vrot.lane.b32.xlu0 %v1665_v31, %s3951_s14  ;;  %v1617_v31 = vadd.f32 %v5483_v15, %v5292_v17 }
 0x269   : > { %7335 = vst [vmem:[#allocation103_spill] sm:$0xff] %v5561_v56  ;;  %7336 = vst [vmem:[#allocation104_spill] sm:$0xff] %v5563_v21  ;;  %v1023_v44 = vadd.f32 %v5515_v11, %v7338_v57  ;;  %v1024_v39 = vadd.f32 %v5520_v30, %v7339_v32  ;;  %v7340_v20 = vld [vmem:[#allocation43_spill] sm:$0xff]  ;;  %v5574_v60 = vld [vmem:[#allocation2 + $0x1c8] sm:$0xff]  ;;  %v1676_v56 = vmul.f32 0.23388074, %v1616_v61  ;;  %v5583_v57 = vpop.permute.xlu1 %1205  ;;  %v5585_v11 = vpop.permute.xlu0 %1207  ;;  %v1028_v61 = vadd.f32 %v5546_v23, %v7346_v9 }
 0x26a   : > { %7337 = vst [vmem:[#allocation105_spill] sm:$0xff] %v5566_v53  ;;  %v1025_v45 = vadd.f32 %v5525_v7, %v7340_v20  ;;  %v5577_v54 = vmul.f32 0.2920817, %v5574_v60  ;;  %v1607_v53 = vadd.f32 %v5437_v36, %v5290_v40  ;;  %7342 = vst [vmem:[#allocation42_spill] sm:$0xff] %v5583_v57  ;;  %v7344_v32 = vld [vmem:[#allocation44_spill] sm:$0xff]  ;;  %v7345_v7 = vld [vmem:[#allocation45_spill] sm:$0xff] }
 0x26b   : > { %7343 = vst [vmem:[#allocation43_spill] sm:$0xff] %v5585_v11  ;;  %v1026_v20 = vadd.f32 %v5536_v13, %v7344_v32  ;;  %v1027_v30 = vadd.f32 %v5541_v3, %v7345_v7  ;;  %v5593_v59 = vld [vmem:[#allocation2 + $0x1d0] sm:$0xff]  ;;  %v7348_v10 = vld [vmem:[#allocation47_spill] sm:$0xff]  ;;  %v7349_v36 = vld [vmem:[#allocation48_spill] sm:$0xff]  ;;  %1837 = vrot.lane.b32.xlu1 %v1676_v56, %s3951_s14  ;;  %v5611_v57 = vmul.f32 0.12007839, %v1023_v44  ;;  %v1618_v56 = vadd.f32 %v5488_v48, %v5300_v37 }
 0x26c   : > { %7341 = vst [vmem:[#allocation41_spill] sm:$0xff] %v5577_v54  ;;  %v5596_v47 = vmul.f32 0.2920817, %v5593_v59  ;;  %v1029_v40 = vadd.f32 %v5553_v58, %v7348_v10  ;;  %v1030_v54 = vadd.f32 %v5558_v41, %v7349_v36  ;;  %v7350_v11 = vld [vmem:[#allocation49_spill] sm:$0xff]  ;;  %v5606_v7 = vld [vmem:[#allocation2 + $0x1d8] sm:$0xf] }
 0x26d   : > { %v1031_v32 = vadd.f32 %v5563_v21, %v7350_v11  ;;  %v5609_v9 = vmul.f32 0.2920817, %v5606_v7  ;;  %v5615_v10 = vmul.f32 0.12007839, %v1025_v45  ;;  %v7353_v58 = vld [vmem:[#allocation50_spill] sm:$0xff]  ;;  %v5623_v21 = vpop.permute.xlu1 %1209  ;;  %v7354_v17 = vld [vmem:[#allocation51_spill] sm:$0xff] }
 0x26e   : > { %7347 = vst [vmem:[#allocation44_spill] sm:$0xff] %v5596_v47  ;;  %v5613_v47 = vmul.f32 0.12007839, %v1024_v39  ;;  %v1032_v36 = vadd.f32 %v5574_v60, %v7353_v58  ;;  %v1666_v41 = vmul.f32 0.23388074, %v1606_v26  ;;  %v1033_v15 = vadd.f32 %v5593_v59, %v7354_v17  ;;  %v7355_v48 = vld [vmem:[#allocation52_spill] sm:$0xff] }
 0x26f   : > { %7351 = vst [vmem:[#allocation45_spill] sm:$0xff] %v5609_v9  ;;  %v1667_v11 = vmul.f32 0.23388074, %v1607_v53  ;;  %v5625_v9 = vpop.permute.xlu0 %1211  ;;  %v5627_v44 = vmul.f32 0.12007839, %v1026_v20  ;;  %v7356_v58 = vld [vmem:[#allocation53_spill] sm:$0xff] }
 0x270   : > { %7352 = vst [vmem:[#allocation46_spill] sm:$0xff] %v5613_v47  ;;  %v5629_v39 = vmul.f32 0.12007839, %v1027_v30  ;;  %v5631_v45 = vmul.f32 0.12007839, %v1028_v61  ;;  %1817 = vrot.lane.b32.xlu1 %v1666_v41, %s3951_s14  ;;  %v1034_v30 = vadd.f32 %v5606_v7, %v7355_v48  ;;  %v5649_v20 = vadd.f32 %v7356_v58, %v5341_v22  ;;  %v7358_v48 = vld [vmem:[#allocation55_spill] sm:$0xff] }
 0x271   : > { %v5633_v47 = vmul.f32 0.12007839, %v1029_v40  ;;  %v5635_v26 = vmul.f32 0.12007839, %v1030_v54  ;;  %v5637_v53 = vmul.f32 0.12007839, %v1031_v32  ;;  %1819 = vrot.lane.b32.xlu0 %v1667_v11, %s3951_s14  ;;  %v1619_v11 = vadd.f32 %v5493_v52, %v5302_v62 }
 0x272   : > { %v5643_v37 = vmul.f32 0.12007839, %v1032_v36  ;;  %v7357_v54 = vld [vmem:[#allocation54_spill] sm:$0xff]  ;;  %v1677_v40 = vmul.f32 0.23388074, %v1617_v31  ;;  %v1608_v41 = vadd.f32 %v5448_v28, %v5309_v16  ;;  %v5659_v36 = vpop.permute.xlu1 %1213  ;;  %v5665_v22 = vadd.f32 %v7358_v48, %v5349_v34  ;;  %v7359_v58 = vld [vmem:[#allocation56_spill] sm:$0xff] }
 0x273   : > { %v5653_v61 = vadd.f32 %v7357_v54, %v5343_v25  ;;  %v1678_v32 = vmul.f32 0.23388074, %v1618_v56  ;;  %v5661_v17 = vpop.permute.xlu0 %1227  ;;  %v5669_v25 = vadd.f32 %v7359_v58, %v5351_v49  ;;  %v7360_v31 = vld [vmem:[#allocation57_spill] sm:$0xff]  ;;  %v7361_v62 = vld [vmem:[#allocation58_spill] sm:$0xff]  ;;  %v5679_v16 = vmul.f32 0.12007839, %v1033_v15 }
 0x274   : > { %v5673_v56 = vadd.f32 %v7360_v31, %v5345_v46  ;;  %v5677_v52 = vadd.f32 %v7361_v62, %v5363_v63  ;;  %v7362_v28 = vld [vmem:[#allocation59_spill] sm:$0xff]  ;;  %v7363_v34 = vld [vmem:[#allocation60_spill] sm:$0xff]  ;;  %v7365_v49 = vld [vmem:[#allocation61_spill] sm:$0xff]  ;;  %1839 = vrot.lane.b32.xlu1 %v1677_v40, %s3951_s14  ;;  %v1679_v40 = vmul.f32 0.23388074, %v1619_v11 }
 0x275   : > { %v5683_v54 = vadd.f32 %v7362_v28, %v5353_v5  ;;  %v5687_v48 = vadd.f32 %v7363_v34, %v5365_v2  ;;  %v5691_v58 = vadd.f32 %v7365_v49, %v5367_v4  ;;  %1841 = vrot.lane.b32.xlu0 %v1678_v32, %s3951_s14  ;;  %v7367_v46 = vld [vmem:[#allocation62_spill] sm:$0xff]  ;;  %v7369_v15 = vld [vmem:[#allocation63_spill] sm:$0xff]  ;;  %v7371_v31 = vld [vmem:[#allocation64_spill] sm:$0xff]  ;;  %v1609_v4 = vadd.f32 %v5453_v50, %v5311_v18 }
 0x276   : > { %v5697_v63 = vadd.f32 %v7367_v46, %v5369_v38  ;;  %v5701_v5 = vadd.f32 %v7369_v15, %v5371_v0  ;;  %v5705_v2 = vadd.f32 %v7371_v31, %v5377_v12  ;;  %v7372_v62 = vld [vmem:[#allocation65_spill] sm:$0xff]  ;;  %v1668_v28 = vmul.f32 0.23388074, %v1608_v41  ;;  %v5715_v34 = vpop.permute.xlu1 %1229  ;;  %v7374_v49 = vld [vmem:[#allocation66_spill] sm:$0xff]  ;;  %v7377_v11 = vld [vmem:[#allocation27_spill] sm:$0xff] }
 0x277   : > { %7364 = vst [vmem:[#allocation47_spill] sm:$0xff] %v5687_v48  ;;  %7366 = vst [vmem:[#allocation48_spill] sm:$0xff] %v5691_v58  ;;  %v5711_v32 = vadd.f32 %v7372_v62, %v5373_v33  ;;  %v1610_v38 = vadd.f32 %v5458_v43, %v5317_v27  ;;  %v5717_v0 = vpop.permute.xlu0 %1231  ;;  %v5721_v12 = vadd.f32 %v7374_v49, %v5379_v8  ;;  %v7375_v46 = vld [vmem:[#allocation26_spill] sm:$0xff]  ;;  %v7376_v33 = vld [vmem:[#allocation28_spill] sm:$0xff]  ;;  %v5735_v27 = vmul.f32 0.12007839, %v1034_v30 }
 0x278   : > { %7368 = vst [vmem:[#allocation49_spill] sm:$0xff] %v5697_v63  ;;  %7370 = vst [vmem:[#allocation50_spill] sm:$0xff] %v5701_v5  ;;  %v5725_v18 = vadd.f32 %v7375_v46, %v5381_v1  ;;  %v5729_v50 = vadd.f32 %v7376_v33, %v5389_v55  ;;  %v5733_v41 = vadd.f32 %v7377_v11, %v5391_v51  ;;  %v7378_v43 = vld [vmem:[#allocation30_spill] sm:$0xff]  ;;  %v7380_v8 = vld [vmem:[#allocation29_spill] sm:$0xff]  ;;  %1843 = vrot.lane.b32.xlu1 %v1679_v40, %s3951_s14 }
 0x279   : > { %7373 = vst [vmem:[#allocation51_spill] sm:$0xff] %v5711_v32  ;;  %v5739_v15 = vadd.f32 %v7378_v43, %v5395_v14  ;;  %v5743_v31 = vadd.f32 %v7380_v8, %v5393_v42  ;;  %v1620_v1 = vadd.f32 %v5500_v6, %v5319_v19  ;;  %1821 = vrot.lane.b32.xlu0 %v1668_v28, %s3951_s14  ;;  %v7381_v55 = vld [vmem:[#allocation32_spill] sm:$0xff]  ;;  %v1669_v30 = vmul.f32 0.23388074, %v1609_v4  ;;  %v7383_v62 = vld [vmem:[#allocation35_spill] sm:$0xff]  ;;  %v7386_v11 = vld [vmem:[#allocation89_spill] sm:$0xff] }
 0x27a   : > { %v5751_v51 = vadd.f32 %v7381_v55, %v5397_v29  ;;  %v1621_v14 = vadd.f32 %v5505_v24, %v5327_v35  ;;  %v7384_v49 = vld [vmem:[#allocation87_spill] sm:$0xff]  ;;  %v1670_v42 = vmul.f32 0.23388074, %v1610_v38  ;;  %v7385_v33 = vld [vmem:[#allocation12_spill] sm:$0xff]  ;;  %v7387_v19 = vld [vmem:[#allocation13_spill] sm:$0xff]  ;;  %v1234_v63 = vpop.permute.xlu1 %1233 }
 0x27b   : > { %7379 = vst [vmem:[#allocation52_spill] sm:$0xff] %v5739_v15  ;;  %v1622_v46 = vadd.f32 %v7384_v49, %v7383_v62  ;;  %v1623_v43 = vadd.f32 %v7386_v11, %v7385_v33  ;;  %v7388_v6 = vld [vmem:[#allocation91_spill] sm:$0xff]  ;;  %v7389_v8 = vld [vmem:[#allocation14_spill] sm:$0xff]  ;;  %v7390_v40 = vld [vmem:[#allocation93_spill] sm:$0xff]  ;;  %v1236_v29 = vpop.permute.xlu0 %1235  ;;  %v1680_v11 = vmul.f32 0.23388074, %v1620_v1 }
 0x27c   : > { %7382 = vst [vmem:[#allocation53_spill] sm:$0xff] %v5751_v51  ;;  %v1624_v28 = vadd.f32 %v7388_v6, %v7387_v19  ;;  %v1625_v32 = vadd.f32 %v7390_v40, %v7389_v8  ;;  %v7391_v55 = vld [vmem:[#allocation18_spill] sm:$0xff]  ;;  %v7392_v4 = vld [vmem:[#allocation31_spill] sm:$0xff]  ;;  %v7394_v62 = vld [vmem:[#allocation17_spill] sm:$0xff]  ;;  %1823 = vrot.lane.b32.xlu1 %v1669_v30, %s3951_s14 }
 0x27d   : > { %v5765_v5 = vadd.f32 %v7392_v4, %v7391_v55  ;;  %v7393_v35 = vld [vmem:[#allocation15_spill] sm:$0xff]  ;;  %v1627_v38 = vadd.f32 %v5541_v3, %v7394_v62  ;;  %v7395_v49 = vld [vmem:[#allocation16_spill] sm:$0xff]  ;;  %v7396_v19 = vld [vmem:[#allocation37_spill] sm:$0xff]  ;;  %1825 = vrot.lane.b32.xlu0 %v1670_v42, %s3951_s14  ;;  %v1682_v3 = vmul.f32 0.23388074, %v1622_v46 }
 0x27e   : > { %v1626_v24 = vadd.f32 %v5536_v13, %v7393_v35  ;;  %v1628_v33 = vadd.f32 %v5546_v23, %v7395_v49  ;;  %v7397_v6 = vld [vmem:[#allocation100_spill] sm:$0xff]  ;;  %v7398_v8 = vld [vmem:[#allocation38_spill] sm:$0xff]  ;;  %v7400_v48 = vld [vmem:[#allocation69_spill] sm:$0xff]  ;;  %v1681_v13 = vmul.f32 0.23388074, %v1621_v14  ;;  %v1238_v30 = vpop.permute.xlu1 %1237 }
 0x27f   : > { %v1629_v51 = vadd.f32 %v7397_v6, %v7396_v19  ;;  %v7399_v40 = vld [vmem:[#allocation102_spill] sm:$0xff]  ;;  %v7401_v58 = vld [vmem:[#allocation104_spill] sm:$0xff]  ;;  %v5789_v6 = vmul.f32 0.23388074, %v1623_v43  ;;  %v1756_v14 = vpop.permute.xlu0 %1755  ;;  %v7408_v42 = vld [vmem:[#allocation33_spill] sm:$0xff] }
 0x280   : > { %v1630_v15 = vadd.f32 %v7399_v40, %v7398_v8  ;;  %v1631_v55 = vadd.f32 %v7401_v58, %v7400_v48  ;;  %v7402_v4 = vld [vmem:[#allocation70_spill] sm:$0xff]  ;;  %v7403_v1 = vld [vmem:[#allocation80_spill] sm:$0xff]  ;;  %v5791_v48 = vmul.f32 0.23388074, %v1624_v28  ;;  %v5793_v58 = vmul.f32 0.23388074, %v1625_v32  ;;  %1845 = vrot.lane.b32.xlu1 %v1680_v11, %s3951_s14 }
 0x281   : > { %v1632_v23 = vadd.f32 %v5574_v60, %v7402_v4  ;;  %v1633_v35 = vadd.f32 %v5593_v59, %v7403_v1  ;;  %v7404_v62 = vld [vmem:[#allocation20_spill] sm:$0xff]  ;;  %v7405_v49 = vld [vmem:[#allocation34_spill] sm:$0xff]  ;;  %v5799_v60 = vmul.f32 0.23388074, %v1626_v24  ;;  %v5801_v59 = vmul.f32 0.23388074, %v1627_v38  ;;  %1847 = vrot.lane.b32.xlu0 %v1681_v13, %s3951_s14 }
 0x282   : > { %v5787_v19 = vadd.f32 %v7405_v49, %v7404_v62  ;;  %v7407_v46 = vld [vmem:[#allocation36_spill] sm:$0xff]  ;;  %v5803_v40 = vmul.f32 0.23388074, %v1628_v33  ;;  %v5805_v4 = vmul.f32 0.23388074, %v1629_v51  ;;  %v7409_v32 = vld [vmem:[#allocation81_spill] sm:$0xff] }
 0x283   : > { %v5797_v8 = vadd.f32 %v7408_v42, %v7407_v46  ;;  %v5807_v43 = vmul.f32 0.23388074, %v1630_v15  ;;  %v5809_v28 = vmul.f32 0.23388074, %v1631_v55  ;;  %v1634_v1 = vadd.f32 %v5606_v7, %v7409_v32  ;;  %v7410_v38 = vld [vmem:[#allocation19_spill] sm:$0xff]  ;;  %v7412_v51 = vld [vmem:[#allocation24_spill] sm:$0xff] }
 0x284   : > { %7406 = vst [vmem:[#allocation54_spill] sm:$0xff] %v5787_v19  ;;  %v5815_v62 = vmul.f32 0.23388074, %v1632_v23  ;;  %v5817_v24 = vmul.f32 0.23388074, %v1633_v35  ;;  %v7411_v33 = vld [vmem:[#allocation95_spill] sm:$0xff]  ;;  %v5824_v15 = vadd.f32 %v1756_v14, %v5649_v20  ;;  %1849 = vrot.lane.b32.xlu1 %v1682_v3, %s3951_s14 }
 0x285   : > { %v5821_v49 = vadd.f32 %v7411_v33, %v7410_v38  ;;  %v7413_v55 = vld [vmem:[#allocation96_spill] sm:$0xff]  ;;  %v7414_v7 = vld [vmem:[#allocation39_spill] sm:$0xff]  ;;  %v7415_v42 = vld [vmem:[#allocation42_spill] sm:$0xff]  ;;  %v1758_v38 = vpop.permute.xlu1 %1757  ;;  %v1760_v33 = vpop.permute.xlu0 %1759  ;;  %1251 = vrot.lane.b32.xlu0 %v5611_v57, %s3948_s20 }
 0x286   : > { %v5828_v46 = vadd.f32 %v7413_v55, %v7412_v51  ;;  %v5832_v13 = vadd.f32 %v7415_v42, %v7414_v7  ;;  %v7416_v11 = vld [vmem:[#allocation25_spill] sm:$0xff]  ;;  %v7417_v23 = vld [vmem:[#allocation43_spill] sm:$0xff]  ;;  %v7418_v35 = vld [vmem:[#allocation40_spill] sm:$0xff]  ;;  %v1936_v7 = vadd.f32 %v1758_v38, %v5665_v22  ;;  %v1937_v42 = vadd.f32 %v1760_v33, %v5653_v61 }
 0x287   : > { %v5836_v32 = vadd.f32 %v7417_v23, %v7416_v11  ;;  %v5840_v19 = vadd.f32 %v5623_v21, %v7418_v35  ;;  %v7420_v20 = vld [vmem:[#allocation21_spill] sm:$0xff]  ;;  %v7421_v51 = vld [vmem:[#allocation22_spill] sm:$0xff]  ;;  %v5852_v11 = vmul.f32 0.23388074, %v1634_v1  ;;  %v7425_v35 = vld [vmem:[#allocation75_spill] sm:$0xff]  ;;  %v2116_v22 = vrot.slane %v5824_v15, 4 }
 0x288   : > { %v5844_v14 = vadd.f32 %v5625_v9, %v7420_v20  ;;  %v5848_v55 = vadd.f32 %v5659_v36, %v7421_v51  ;;  %v7423_v23 = vld [vmem:[#allocation74_spill] sm:$0xff]  ;;  %v7427_v9 = vld [vmem:[#allocation76_spill] sm:$0xff]  ;;  %v7429_v61 = vld [vmem:[#allocation77_spill] sm:$0xff]  ;;  %v2559_v1 = vrot.slane %v1936_v7, 2  ;;  %v5880_v3 = vmul.f32 0.2920817, %v5824_v15 }
 0x289   : > { %7419 = vst [vmem:[#allocation55_spill] sm:$0xff] %v5840_v19  ;;  %v5856_v21 = vadd.f32 %v5661_v17, %v7423_v23  ;;  %v5860_v19 = vadd.f32 %v5715_v34, %v7425_v35  ;;  %v5864_v20 = vadd.f32 %v5717_v0, %v7427_v9  ;;  %v5870_v36 = vadd.f32 %v1234_v63, %v7429_v61  ;;  %v7431_v38 = vld [vmem:[#allocation78_spill] sm:$0xff]  ;;  %v7433_v33 = vld [vmem:[#allocation79_spill] sm:$0xff]  ;;  %v1762_v35 = vpop.permute.xlu1 %1761  ;;  %v1764_v57 = vpop.permute.xlu0 %1763 }
 0x28a   : > { %7422 = vst [vmem:[#allocation56_spill] sm:$0xff] %v5848_v55  ;;  %v2117_v17 = vrot.slane %v1936_v7, 4  ;;  %v5874_v34 = vadd.f32 %v1236_v29, %v7431_v38  ;;  %v5877_v51 = vadd.f32 %v1238_v30, %v7433_v33  ;;  %v2119_v0 = vrot.slane %v1937_v42, 4  ;;  %1255 = vrot.lane.b32.xlu0 %v5615_v10, %s3948_s20 }
 0x28b   : > { %7424 = vst [vmem:[#allocation57_spill] sm:$0xff] %v5856_v21  ;;  %7426 = vst [vmem:[#allocation58_spill] sm:$0xff] %v5860_v19  ;;  %v2561_v23 = vrot.slane %v1937_v42, 2  ;;  %v5884_v9 = vadd.f32 %v1762_v35, %v5673_v56  ;;  %v1939_v61 = vadd.f32 %v1764_v57, %v5669_v25  ;;  %v7436_v56 = vld [vmem:[#allocation46_spill] sm:$0xff]  ;;  %v2558_v25 = vrot.slane %v5824_v15, 2 }
 0x28c   : > { %7428 = vst [vmem:[#allocation59_spill] sm:$0xff] %v5864_v20  ;;  %7430 = vst [vmem:[#allocation60_spill] sm:$0xff] %v5870_v36  ;;  %v2118_v63 = vsel %vm2115_vm6, %v2116_v22, %v2117_v17  ;;  %v2120_v30 = vsel %vm2115_vm6, %v2117_v17, %v2119_v0  ;;  %1253 = vrot.lane.b32.xlu1 %v7436_v56, %s3948_s20 }
 0x28d   : > { %7432 = vst [vmem:[#allocation61_spill] sm:$0xff] %v5874_v34  ;;  %7434 = vst [vmem:[#allocation62_spill] sm:$0xff] %v5877_v51  ;;  %v2256_v29 = vadd.f32 %v2118_v63, %v5824_v15  ;;  %v2562_v38 = vsel %vm2557_vm7, %v2559_v1, %v2561_v23  ;;  %v2720_v33 = vadd.f32 %v2561_v23, %v1937_v42  ;;  %v5892_v51 = vmul.f32 0.2920817, %v1936_v7  ;;  %v1766_v57 = vpop.permute.xlu1 %1765  ;;  %v1780_v23 = vpop.permute.xlu0 %1779 }
 0x28e   : > { %7435 = vst [vmem:[#allocation63_spill] sm:$0xff] %v5884_v9  ;;  %v2257_v34 = vadd.f32 %v2120_v30, %v1936_v7  ;;  %v2719_v22 = vadd.f32 %v2562_v38, %v1936_v7  ;;  %v2121_v36 = vrot.slane %v5884_v9, 4  ;;  %v2122_v0 = vrot.slane %v1939_v61, 4  ;;  %1259 = vrot.lane.b32.xlu0 %v5629_v39, %s3948_s20 }
 0x28f   : > { %v5898_v35 = vmul.f32 0.12007839, %v2256_v29  ;;  %v2780_v17 = vmul.f32 0.23388074, %v2720_v33  ;;  %v1997_v63 = vmul.f32 0.2920817, %v1937_v42  ;;  %v1940_v30 = vadd.f32 %v1766_v57, %v5683_v54 }
 0x290   : > { %v2297_v20 = vmul.f32 0.12007839, %v2257_v34  ;;  %v5900_v10 = vmul.f32 0.23388074, %v2719_v22  ;;  %v5904_v7 = vsel %vm2557_vm7, %v2558_v25, %v2559_v1  ;;  %v2563_v56 = vrot.slane %v5884_v9, 2  ;;  %1257 = vrot.lane.b32.xlu1 %v5627_v44, %s3948_s20 }
 0x291   : > { %v2902_v38 = vrot.slane %v2780_v17, 7  ;;  %v2123_v19 = vsel %vm2115_vm6, %v2121_v36, %v2122_v0  ;;  %v2564_v34 = vrot.slane %v1939_v61, 2  ;;  %v2124_v1 = vrot.slane %v1940_v30, 4  ;;  %v1782_v36 = vpop.permute.xlu1 %1781  ;;  %v1784_v17 = vpop.permute.xlu0 %1783 }
 0x292   : > { %v2378_v29 = vrot.slane %v2297_v20, 6  ;;  %v7117_v33 = vrot.slane %v5900_v10, 7  ;;  %v2258_v42 = vadd.f32 %v2123_v19, %v5884_v9  ;;  %v2566_v22 = vrot.slane %v1940_v30, 2  ;;  %1263 = vrot.lane.b32.xlu0 %v5633_v47, %s3948_s20 }
 0x293   : > { %v5916_v25 = vadd.f32 %v1780_v23, %v5705_v2  ;;  %v5919_v39 = vmul.f32 0.2920817, %v5884_v9  ;;  %v5921_v20 = vmul.f32 0.2920817, %v1939_v61  ;;  %v2000_v19 = vmul.f32 0.2920817, %v1940_v30 }
 0x294   : > { %v2499_v57 = vadd.f32 %v2378_v29, %v1997_v63  ;;  %v2903_v44 = vsel %vm2898_vm8, %v7117_v33, %v2902_v38  ;;  %v2125_v54 = vsel %vm2115_vm6, %v2122_v0, %v2124_v1  ;;  %v2567_v21 = vsel %vm2557_vm7, %v2564_v34, %v2566_v22  ;;  %1261 = vrot.lane.b32.xlu1 %v5631_v45, %s3948_s20 }
 0x295   : > { %7437 = vst [vmem:[#allocation64_spill] sm:$0xff] %v5919_v39  ;;  %7438 = vst [vmem:[#allocation65_spill] sm:$0xff] %v5921_v20  ;;  %v2723_v55 = vadd.f32 %v2566_v22, %v1940_v30  ;;  %v5930_v2 = vmul.f32 0.12007839, %v2258_v42  ;;  %v5933_v23 = vsel %vm2557_vm7, %v2563_v56, %v2564_v34  ;;  %v2259_v63 = vadd.f32 %v2125_v54, %v1939_v61  ;;  %v1786_v42 = vpop.permute.xlu1 %1785  ;;  %v1788_v22 = vpop.permute.xlu0 %1787 }
 0x296   : > { %7440 = vst [vmem:[#allocation26_spill] sm:$0xff] %v5933_v23  ;;  %v2722_v20 = vadd.f32 %v2567_v21, %v1939_v61  ;;  %v7441_v38 = vrot.slane %v5898_v35, 6  ;;  %v5943_v30 = vmul.f32 0.2920817, %v5916_v25  ;;  %v1948_v47 = vadd.f32 %v1782_v36, %v5725_v18  ;;  %1267 = vrot.lane.b32.xlu0 %v5637_v53, %s3948_s20 }
 0x297   : > { %7439 = vst [vmem:[#allocation66_spill] sm:$0xff] %v5930_v2  ;;  %v2783_v1 = vmul.f32 0.23388074, %v2723_v55  ;;  %v5946_v56 = vadd.f32 %v2903_v44, %v2499_v57  ;;  %v2299_v34 = vmul.f32 0.12007839, %v2259_v63  ;;  %v1949_v45 = vadd.f32 %v1784_v17, %v5721_v12 }
 0x298   : > { %v5940_v0 = vsel %vm2376_vm9, %v7441_v38, %v2378_v29  ;;  %v5948_v21 = vmul.f32 0.23388074, %v2722_v20  ;;  %v2136_v54 = vrot.slane %v5916_v25, 4  ;;  %v2137_v29 = vrot.slane %v1948_v47, 4  ;;  %1265 = vrot.lane.b32.xlu1 %v5635_v26, %s3948_s20 }
 0x299   : > { %7442 = vst [vmem:[#allocation28_spill] sm:$0xff] %v5946_v56  ;;  %v2907_v61 = vrot.slane %v2783_v1, 7  ;;  %v2579_v38 = vrot.slane %v1948_v47, 2  ;;  %v2381_v18 = vrot.slane %v2299_v34, 6  ;;  %v2139_v57 = vrot.slane %v1949_v45, 4  ;;  %v1790_v63 = vpop.permute.xlu1 %1789  ;;  %v1216_v1 = vpop.permute.xlu0 %1215 }
 0x29a   : > { %7443 = vst [vmem:[#allocation27_spill] sm:$0xff] %v5948_v21  ;;  %v7119_v36 = vrot.slane %v5948_v21, 7  ;;  %v2578_v20 = vrot.slane %v5916_v25, 2  ;;  %v2138_v12 = vsel %vm2115_vm6, %v2136_v54, %v2137_v29  ;;  %v2581_v17 = vrot.slane %v1949_v45, 2  ;;  %1271 = vrot.lane.b32.xlu0 %v5679_v16, %s3948_s20 }
 0x29b   : > { %v5961_v44 = vadd.f32 %v1786_v42, %v5733_v41  ;;  %v5965_v53 = vmul.f32 %v5946_v56, %v5946_v56  ;;  %v2502_v34 = vadd.f32 %v2381_v18, %v2000_v19  ;;  %v2264_v26 = vadd.f32 %v2138_v12, %v5916_v25 }
 0x29c   : > { %v2908_v33 = vsel %vm2898_vm8, %v7119_v36, %v2907_v61  ;;  %v5971_v55 = vmul.f32 0.2920817, %v1948_v47  ;;  %v2140_v54 = vsel %vm2115_vm6, %v2137_v29, %v2139_v57  ;;  %v2582_v41 = vsel %vm2557_vm7, %v2579_v38, %v2581_v17  ;;  %1269 = vrot.lane.b32.xlu1 %v5643_v37, %s3948_s20 }
 0x29d   : > { %7444 = vst [vmem:[#allocation30_spill] sm:$0xff] %v5961_v44  ;;  %7445 = vst [vmem:[#allocation29_spill] sm:$0xff] %v5965_v53  ;;  %v2732_v42 = vadd.f32 %v2581_v17, %v1949_v45  ;;  %v2304_v39 = vmul.f32 0.12007839, %v2264_v26  ;;  %v2009_v56 = vmul.f32 0.2920817, %v1949_v45  ;;  %v2265_v23 = vadd.f32 %v2140_v54, %v1948_v47  ;;  %v1218_v57 = vpop.permute.xlu1 %1217  ;;  %v1220_v21 = vpop.permute.xlu0 %1219 }
 0x29e   : > { %v2731_v19 = vadd.f32 %v2582_v41, %v1948_v47  ;;  %v5979_v61 = vadd.f32 %v2908_v33, %v2502_v34  ;;  %v2141_v36 = vrot.slane %v5961_v44, 4  ;;  %v1951_v29 = vadd.f32 %v1788_v22, %v5729_v50  ;;  %1851 = vrot.lane.b32.xlu0 %v5789_v6, %s3951_s14 }
 0x29f   : > { %v2792_v12 = vmul.f32 0.23388074, %v2732_v42  ;;  %v7447_v17 = vrot.slane %v5930_v2, 6  ;;  %v2580_v45 = vsel %vm2557_vm7, %v2578_v20, %v2579_v38  ;;  %v2305_v47 = vmul.f32 0.12007839, %v2265_v23  ;;  %v7459_v2 = vld [vmem:[#allocation83_spill] sm:$0xff] }
 0x2a0   : > { %7446 = vst [vmem:[#allocation32_spill] sm:$0xff] %v5979_v61  ;;  %v5989_v26 = vmul.f32 0.23388074, %v2731_v19  ;;  %v2583_v33 = vrot.slane %v5961_v44, 2  ;;  %v2142_v34 = vrot.slane %v1951_v29, 4  ;;  %v2584_v54 = vrot.slane %v1951_v29, 2  ;;  %1273 = vrot.lane.b32.xlu1 %v5735_v27, %s3948_s20 }
 0x2a1   : > { %v5986_v16 = vsel %vm2376_vm9, %v7447_v17, %v2381_v18  ;;  %v2922_v37 = vrot.slane %v2792_v12, 7  ;;  %v2389_v50 = vrot.slane %v2304_v39, 6  ;;  %v2390_v22 = vrot.slane %v2305_v47, 6  ;;  %v1240_v39 = vpop.permute.xlu1 %1239  ;;  %v1242_v42 = vpop.permute.xlu0 %1241 }
 0x2a2   : > { %7448 = vst [vmem:[#allocation35_spill] sm:$0xff] %v5986_v16  ;;  %v7122_v41 = vrot.slane %v5989_v26, 7  ;;  %v1952_v18 = vadd.f32 %v1790_v63, %v5743_v31  ;;  %v6000_v23 = vmul.f32 %v5979_v61, %v5979_v61  ;;  %v6003_v38 = vmul.f32 0.2920817, %v5961_v44  ;;  %v7452_v63 = vld [vmem:[#allocation23_spill] sm:$0xff]  ;;  %1855 = vrot.lane.b32.xlu0 %v5793_v58, %s3951_s14 }
 0x2a3   : > { %v6005_v20 = vmul.f32 0.2920817, %v1951_v29  ;;  %v2143_v6 = vsel %vm2115_vm6, %v2141_v36, %v2142_v34  ;;  %v2511_v19 = vadd.f32 %v2390_v22, %v2009_v56  ;;  %v6013_v12 = vadd.f32 %v1216_v1, %v7452_v63 }
 0x2a4   : > { %7449 = vst [vmem:[#allocation87_spill] sm:$0xff] %v6000_v23  ;;  %7450 = vst [vmem:[#allocation12_spill] sm:$0xff] %v6003_v38  ;;  %v2923_v31 = vsel %vm2898_vm8, %v7122_v41, %v2922_v37  ;;  %v2266_v27 = vadd.f32 %v2143_v6, %v5961_v44  ;;  %v6016_v17 = vsel %vm2557_vm7, %v2583_v33, %v2584_v54  ;;  %v2144_v47 = vrot.slane %v1952_v18, 4  ;;  %v7456_v6 = vld [vmem:[#allocation68_spill] sm:$0xff] }
 0x2a5   : > { %7451 = vst [vmem:[#allocation89_spill] sm:$0xff] %v6005_v20  ;;  %7453 = vst [vmem:[#allocation13_spill] sm:$0xff] %v6016_v17  ;;  %v2586_v61 = vrot.slane %v1952_v18, 2  ;;  %v7454_v20 = vld [vmem:[#allocation67_spill] sm:$0xff]  ;;  %v2391_v56 = vsel %vm2376_vm9, %v2389_v50, %v2390_v22  ;;  %v6024_v36 = vadd.f32 %v2923_v31, %v2511_v19  ;;  %v2012_v37 = vmul.f32 0.2920817, %v1952_v18  ;;  %1853 = vrot.lane.b32.xlu1 %v5791_v48, %s3951_s14  ;;  %v1244_v63 = vpop.permute.xlu1 %1243  ;;  %v1768_v58 = vpop.permute.xlu0 %1767 }
 0x2a6   : > { %v6019_v16 = vadd.f32 %v1218_v57, %v7454_v20  ;;  %v6027_v41 = vadd.f32 %v1220_v21, %v7456_v6  ;;  %v6031_v1 = vmul.f32 0.12007839, %v2266_v27  ;;  %v2145_v33 = vsel %vm2115_vm6, %v2142_v34, %v2144_v47  ;;  %v7458_v19 = vld [vmem:[#allocation82_spill] sm:$0xff]  ;;  %1859 = vrot.lane.b32.xlu0 %v5801_v59, %s3951_s14  ;;  %v7463_v27 = vld [vmem:[#allocation48_spill] sm:$0xff] }
 0x2a7   : > { %7455 = vst [vmem:[#allocation91_spill] sm:$0xff] %v6024_v36  ;;  %v2587_v57 = vsel %vm2557_vm7, %v2584_v54, %v2586_v61  ;;  %v2735_v20 = vadd.f32 %v2586_v61, %v1952_v18  ;;  %v2267_v38 = vadd.f32 %v2145_v33, %v1951_v29  ;;  %v6036_v31 = vadd.f32 %v1240_v39, %v7458_v19 }
 0x2a8   : > { %7457 = vst [vmem:[#allocation14_spill] sm:$0xff] %v6031_v1  ;;  %v2734_v22 = vadd.f32 %v2587_v57, %v1951_v29  ;;  %v6039_v21 = vadd.f32 %v1242_v42, %v7459_v2  ;;  %v1941_v48 = vadd.f32 %v1768_v58, %v5677_v52  ;;  %v7460_v34 = vrot.slane %v5898_v35, 6 }
 0x2a9   : > { %v2795_v6 = vmul.f32 0.23388074, %v2735_v20  ;;  %v6050_v54 = vadd.f32 %v2389_v50, %v5943_v30  ;;  %v2307_v29 = vmul.f32 0.12007839, %v2267_v38  ;;  %1857 = vrot.lane.b32.xlu1 %v5799_v60, %s3951_s14  ;;  %v2718_v52 = vadd.f32 %v5904_v7, %v5824_v15  ;;  %v7462_v30 = vld [vmem:[#allocation84_spill] sm:$0xff]  ;;  %v1770_v38 = vpop.permute.xlu1 %1769  ;;  %v1772_v39 = vpop.permute.xlu0 %1771  ;;  %v7464_v15 = vld [vmem:[#allocation47_spill] sm:$0xff] }
 0x2aa   : > { %v6047_v61 = vadd.f32 %v7460_v34, %v5880_v3  ;;  %v6052_v18 = vmul.f32 0.23388074, %v2734_v22  ;;  %v2730_v2 = vadd.f32 %v2580_v45, %v5916_v25  ;;  %v6061_v59 = vmul.f32 %v6024_v36, %v6024_v36  ;;  %1863 = vrot.lane.b32.xlu0 %v5805_v4, %s3951_s14 }
 0x2ab   : > { %v7126_v3 = vrot.slane %v6031_v1, 6  ;;  %v2927_v35 = vrot.slane %v2795_v6, 7  ;;  %v6065_v50 = vadd.f32 %v1244_v63, %v7462_v30  ;;  %v2393_v42 = vrot.slane %v2307_v29, 6  ;;  %v7519_v1 = vld [vmem:[#allocation57_spill] sm:$0xff] }
 0x2ac   : > { %7461 = vst [vmem:[#allocation93_spill] sm:$0xff] %v6052_v18  ;;  %v7124_v60 = vrot.slane %v6052_v18, 7  ;;  %v1942_v47 = vadd.f32 %v1770_v38, %v7463_v27  ;;  %v1943_v7 = vadd.f32 %v1772_v39, %v7464_v15  ;;  %v6070_v25 = vmul.f32 0.2920817, %v1941_v48 }
 0x2ad   : > { %v2126_v45 = vrot.slane %v1941_v48, 4  ;;  %v2568_v33 = vrot.slane %v1941_v48, 2  ;;  %v6076_v57 = vadd.f32 %v5940_v0, %v5892_v51  ;;  %v6081_v20 = vsel %vm2376_vm9, %v7126_v3, %v2393_v42  ;;  %1861 = vrot.lane.b32.xlu1 %v5803_v40, %s3951_s14  ;;  %v1792_v0 = vpop.permute.xlu1 %1791  ;;  %v1794_v34 = vpop.permute.xlu0 %1793 }
 0x2ae   : > { %7465 = vst [vmem:[#allocation18_spill] sm:$0xff] %v6070_v25  ;;  %7466 = vst [vmem:[#allocation31_spill] sm:$0xff] %v6081_v20  ;;  %v6085_v63 = vmul.f32 0.23388074, %v2718_v52  ;;  %v6087_v58 = vmul.f32 0.23388074, %v2730_v2  ;;  %v6090_v22 = vadd.f32 %v2391_v56, %v5971_v55  ;;  %v2514_v4 = vadd.f32 %v2393_v42, %v2012_v37  ;;  %1867 = vrot.lane.b32.xlu0 %v5809_v28, %s3951_s14 }
 0x2af   : > { %v2127_v19 = vrot.slane %v1942_v47, 4  ;;  %v2569_v6 = vrot.slane %v1942_v47, 2  ;;  %v2129_v51 = vrot.slane %v1943_v7, 4  ;;  %v2928_v29 = vsel %vm2898_vm8, %v7124_v60, %v2927_v35  ;;  %v7468_v52 = vld [vmem:[#allocation52_spill] sm:$0xff] }
 0x2b0   : > { %v6095_v30 = vmul.f32 0.2920817, %v1942_v47  ;;  %v2571_v40 = vrot.slane %v1943_v7, 2  ;;  %v1953_v38 = vadd.f32 %v1792_v0, %v7468_v52  ;;  %v1954_v37 = vadd.f32 %v1794_v34, %v5765_v5 }
 0x2b1   : > { %v2128_v2 = vsel %vm2115_vm6, %v2126_v45, %v2127_v19  ;;  %v2570_v55 = vsel %vm2557_vm7, %v2568_v33, %v2569_v6  ;;  %v2130_v56 = vsel %vm2115_vm6, %v2127_v19, %v2129_v51  ;;  %v2003_v35 = vmul.f32 0.2920817, %v1943_v7  ;;  %1865 = vrot.lane.b32.xlu1 %v5807_v43, %s3951_s14  ;;  %v1796_v19 = vpop.permute.xlu1 %1795  ;;  %v1222_v51 = vpop.permute.xlu0 %1221 }
 0x2b2   : > { %7467 = vst [vmem:[#allocation15_spill] sm:$0xff] %v6095_v30  ;;  %v2260_v39 = vadd.f32 %v2128_v2, %v1941_v48  ;;  %v6104_v42 = vadd.f32 %v2570_v55, %v1941_v48  ;;  %v2261_v27 = vadd.f32 %v2130_v56, %v1942_v47  ;;  %v6108_v15 = vadd.f32 %v2928_v29, %v2514_v4  ;;  %v7473_v29 = vld [vmem:[#allocation53_spill] sm:$0xff] }
 0x2b3   : > { %v2572_v45 = vsel %vm2557_vm7, %v2569_v6, %v2571_v40  ;;  %v2726_v33 = vadd.f32 %v2571_v40, %v1943_v7  ;;  %v2146_v0 = vrot.slane %v1953_v38, 4  ;;  %v2588_v52 = vrot.slane %v1953_v38, 2  ;;  %1871 = vrot.lane.b32.xlu0 %v5817_v24, %s3951_s14  ;;  %v7482_v30 = vld [vmem:[#allocation73_spill] sm:$0xff] }
 0x2b4   : > { %7469 = vst [vmem:[#allocation17_spill] sm:$0xff] %v6104_v42  ;;  %7470 = vst [vmem:[#allocation16_spill] sm:$0xff] %v6108_v15  ;;  %v6111_v5 = vmul.f32 0.12007839, %v2260_v39  ;;  %v2301_v34 = vmul.f32 0.12007839, %v2261_v27  ;;  %v2725_v28 = vadd.f32 %v2572_v45, %v1942_v47  ;;  %v1955_v40 = vadd.f32 %v1796_v19, %v7473_v29 }
 0x2b5   : > { %v2786_v48 = vmul.f32 0.23388074, %v2726_v33  ;;  %v2147_v2 = vrot.slane %v1954_v37, 4  ;;  %v2589_v55 = vrot.slane %v1954_v37, 2  ;;  %v2899_v43 = vrot.slane %v6085_v63, 7  ;;  %1869 = vrot.lane.b32.xlu1 %v5815_v62, %s3951_s14  ;;  %v1224_v63 = vpop.permute.xlu1 %1223  ;;  %v1226_v27 = vpop.permute.xlu0 %1225 }
 0x2b6   : > { %7471 = vst [vmem:[#allocation37_spill] sm:$0xff] %v6111_v5  ;;  %v7125_v4 = vrot.slane %v6111_v5, 6  ;;  %v2384_v6 = vrot.slane %v2301_v34, 6  ;;  %v6117_v7 = vmul.f32 0.23388074, %v2725_v28  ;;  %v6124_v47 = vmul.f32 %v6108_v15, %v6108_v15  ;;  %v7500_v15 = vld [vmem:[#allocation54_spill] sm:$0xff] }
 0x2b7   : > { %v2912_v56 = vrot.slane %v2786_v48, 7  ;;  %v2148_v39 = vsel %vm2115_vm6, %v2146_v0, %v2147_v2  ;;  %v2590_v24 = vsel %vm2557_vm7, %v2588_v52, %v2589_v55  ;;  %v6134_v34 = vmul.f32 0.2920817, %v1953_v38 }
 0x2b8   : > { %7472 = vst [vmem:[#allocation100_spill] sm:$0xff] %v6117_v7  ;;  %v6131_v45 = vsel %vm2376_vm9, %v7125_v4, %v2384_v6  ;;  %v2505_v33 = vadd.f32 %v2384_v6, %v2003_v35  ;;  %v7128_v19 = vrot.slane %v6117_v7, 7  ;;  %v2268_v62 = vadd.f32 %v2148_v39, %v1953_v38  ;;  %v7479_v4 = vld [vmem:[#allocation71_spill] sm:$0xff] }
 0x2b9   : > { %7474 = vst [vmem:[#allocation38_spill] sm:$0xff] %v6131_v45  ;;  %7475 = vst [vmem:[#allocation102_spill] sm:$0xff] %v6134_v34  ;;  %v6136_v28 = vadd.f32 %v2590_v24, %v1953_v38  ;;  %v2149_v48 = vrot.slane %v1955_v40, 4  ;;  %v2591_v29 = vrot.slane %v1955_v40, 2  ;;  %v6141_v52 = vmul.f32 0.2920817, %v1954_v37  ;;  %1873 = vrot.lane.b32.xlu1 %v5852_v11, %s3951_s14  ;;  %v1246_v24 = vpop.permute.xlu1 %1245  ;;  %v1248_v7 = vpop.permute.xlu0 %1247 }
 0x2ba   : > { %v2913_v0 = vsel %vm2898_vm8, %v7128_v19, %v2912_v56  ;;  %v6143_v60 = vmul.f32 0.12007839, %v2268_v62  ;;  %v6146_v3 = vadd.f32 %v1222_v51, %v7479_v4  ;;  %v2015_v56 = vmul.f32 0.2920817, %v1955_v40  ;;  %v7481_v62 = vld [vmem:[#allocation72_spill] sm:$0xff] }
 0x2bb   : > { %7476 = vst [vmem:[#allocation69_spill] sm:$0xff] %v6136_v28  ;;  %7477 = vst [vmem:[#allocation104_spill] sm:$0xff] %v6141_v52  ;;  %v6150_v35 = vadd.f32 %v2913_v0, %v2505_v33  ;;  %v2150_v38 = vsel %vm2115_vm6, %v2147_v2, %v2149_v48  ;;  %v2592_v6 = vsel %vm2557_vm7, %v2589_v55, %v2591_v29  ;;  %v2919_v33 = vrot.slane %v6087_v58, 7  ;;  %v7484_v55 = vld [vmem:[#allocation85_spill] sm:$0xff] }
 0x2bc   : > { %7478 = vst [vmem:[#allocation70_spill] sm:$0xff] %v6143_v60  ;;  %v2738_v39 = vadd.f32 %v2591_v29, %v1955_v40  ;;  %v2269_v19 = vadd.f32 %v2150_v38, %v1954_v37  ;;  %v2737_v52 = vadd.f32 %v2592_v6, %v1954_v37  ;;  %v6155_v45 = vadd.f32 %v1224_v63, %v7481_v62  ;;  %v7486_v6 = vld [vmem:[#allocation50_spill] sm:$0xff] }
 0x2bd   : > { %7480 = vst [vmem:[#allocation80_spill] sm:$0xff] %v6150_v35  ;;  %v7130_v51 = vrot.slane %v6143_v60, 6  ;;  %v6159_v11 = vadd.f32 %v1226_v27, %v7482_v30  ;;  %v6165_v29 = vadd.f32 %v1246_v24, %v7484_v55  ;;  %v3059_v40 = vadd.f32 %v2899_v43, %v6047_v61  ;;  %v1250_v0 = vpop.permute.xlu1 %1249  ;;  %v1774_v38 = vpop.permute.xlu0 %1773 }
 0x2be   : > { %v2798_v4 = vmul.f32 0.23388074, %v2738_v39  ;;  %v2309_v2 = vmul.f32 0.12007839, %v2269_v19  ;;  %v6162_v48 = vmul.f32 0.23388074, %v2737_v52  ;;  %v6170_v37 = vmul.f32 %v6150_v35, %v6150_v35 }
 0x2bf   : > { %v3071_v30 = vadd.f32 %v2919_v33, %v6050_v54  ;;  %v7485_v27 = vrot.slane %v5900_v10, 7  ;;  %v1944_v39 = vadd.f32 %v1774_v38, %v7486_v6  ;;  %v7487_v61 = vrot.slane %v5989_v26, 7 }
 0x2c0   : > { %7483 = vst [vmem:[#allocation20_spill] sm:$0xff] %v6162_v48  ;;  %v2932_v63 = vrot.slane %v2798_v4, 7  ;;  %v2396_v19 = vrot.slane %v2309_v2, 6  ;;  %v7129_v52 = vrot.slane %v6162_v48, 7  ;;  %v6181_v62 = vmul.f32 %v3059_v40, %v3059_v40  ;;  %v7490_v2 = vld [vmem:[#allocation86_spill] sm:$0xff] }
 0x2c1   : > { %v2901_v58 = vsel %vm2898_vm8, %v2899_v43, %v7485_v27  ;;  %v2921_v24 = vsel %vm2898_vm8, %v2919_v33, %v7487_v61  ;;  %v6183_v4 = vmul.f32 %v3071_v30, %v3071_v30  ;;  %v6185_v55 = vmul.f32 %v3071_v30, %v3059_v40  ;;  %v7491_v40 = vld [vmem:[#allocation88_spill] sm:$0xff]  ;;  %v1778_v27 = vpop.permute.xlu0 %1777  ;;  %v7495_v61 = vld [vmem:[#allocation51_spill] sm:$0xff] }
 0x2c2   : > { %v3060_v54 = vadd.f32 %v2901_v58, %v6076_v57  ;;  %v6191_v10 = vsel %vm2376_vm9, %v7130_v51, %v2396_v19  ;;  %v2517_v43 = vadd.f32 %v2396_v19, %v2015_v56  ;;  %v2933_v26 = vsel %vm2898_vm8, %v7129_v52, %v2932_v63  ;;  %v1776_v57 = vpop.permute.xlu1 %1775  ;;  %v7494_v63 = vld [vmem:[#allocation49_spill] sm:$0xff] }
 0x2c3   : > { %7488 = vst [vmem:[#allocation34_spill] sm:$0xff] %v6185_v55  ;;  %7489 = vst [vmem:[#allocation36_spill] sm:$0xff] %v6191_v10  ;;  %v6197_v33 = vadd.f32 %v2921_v24, %v6090_v22  ;;  %v6200_v38 = vadd.f32 %v1248_v7, %v7490_v2  ;;  %v6203_v30 = vadd.f32 %v1250_v0, %v7491_v40  ;;  %v3191_v58 = vmul.f32 2.0, %v6185_v55 }
 0x2c4   : > { %v3251_v56 = vadd.f32 %v6183_v4, %v6181_v62  ;;  %v6208_v19 = vadd.f32 %v2933_v26, %v2517_v43  ;;  %v6210_v6 = vmul.f32 0.2920817, %v1944_v39  ;;  %v1945_v22 = vadd.f32 %v1776_v57, %v7494_v63 }
 0x2c5   : > { %v1946_v24 = vadd.f32 %v1778_v27, %v7495_v61  ;;  %v2131_v7 = vrot.slane %v1944_v39, 4  ;;  %v2573_v2 = vrot.slane %v1944_v39, 2  ;;  %v6214_v52 = vadd.f32 0.0001, %v3191_v58  ;;  %v1800_v27 = vpop.permute.xlu0 %1799 }
 0x2c6   : > { %7492 = vst [vmem:[#allocation33_spill] sm:$0xff] %v6208_v19  ;;  %7493 = vst [vmem:[#allocation81_spill] sm:$0xff] %v6210_v6  ;;  %v6216_v0 = vmul.f32 %v3060_v54, %v3060_v54  ;;  %v2132_v40 = vrot.slane %v1945_v22, 4  ;;  %v2574_v51 = vrot.slane %v1945_v22, 2  ;;  %v6218_v48 = vadd.f32 0.0001, %v3251_v56  ;;  %v1798_v63 = vpop.permute.xlu1 %1797 }
 0x2c7   : > { %7496 = vst [vmem:[#allocation19_spill] sm:$0xff] %v6214_v52  ;;  %v6221_v10 = vmul.f32 %v6197_v33, %v3060_v54  ;;  %v6223_v43 = vmul.f32 0.2920817, %v1945_v22  ;;  %v2006_v26 = vmul.f32 0.2920817, %v1946_v24  ;;  %v2134_v6 = vrot.slane %v1946_v24, 4 }
 0x2c8   : > { %7497 = vst [vmem:[#allocation95_spill] sm:$0xff] %v6218_v48  ;;  %v2576_v57 = vrot.slane %v1946_v24, 2  ;;  %v2133_v61 = vsel %vm2115_vm6, %v2131_v7, %v2132_v40  ;;  %v2575_v58 = vsel %vm2557_vm7, %v2573_v2, %v2574_v51  ;;  %v1956_v35 = vadd.f32 %v1798_v63, %v5797_v8 }
 0x2c9   : > { %7498 = vst [vmem:[#allocation24_spill] sm:$0xff] %v6221_v10  ;;  %7499 = vst [vmem:[#allocation96_spill] sm:$0xff] %v6223_v43  ;;  %v1957_v28 = vadd.f32 %v1800_v27, %v7500_v15  ;;  %v2262_v56 = vadd.f32 %v2133_v61, %v1944_v39  ;;  %v6229_v42 = vadd.f32 %v2575_v58, %v1944_v39  ;;  %v3192_v25 = vmul.f32 2.0, %v6221_v10  ;;  %v1804_v15 = vpop.permute.xlu0 %1803 }
 0x2ca   : > { %v2135_v54 = vsel %vm2115_vm6, %v2132_v40, %v2134_v6  ;;  %v2577_v43 = vsel %vm2557_vm7, %v2574_v51, %v2576_v57  ;;  %v2729_v5 = vadd.f32 %v2576_v57, %v1946_v24  ;;  %v6236_v7 = vmul.f32 0.2920817, %v1956_v35  ;;  %v1802_v63 = vpop.permute.xlu1 %1801 }
 0x2cb   : > { %7501 = vst [vmem:[#allocation39_spill] sm:$0xff] %v6229_v42  ;;  %v2263_v60 = vadd.f32 %v2135_v54, %v1945_v22  ;;  %v2728_v34 = vadd.f32 %v2577_v43, %v1945_v22  ;;  %v6234_v18 = vmul.f32 0.12007839, %v2262_v56  ;;  %v2151_v2 = vrot.slane %v1956_v35, 4 }
 0x2cc   : > { %7503 = vst [vmem:[#allocation25_spill] sm:$0xff] %v6236_v7  ;;  %v2593_v8 = vrot.slane %v1956_v35, 2  ;;  %v2789_v61 = vmul.f32 0.23388074, %v2729_v5  ;;  %v1958_v6 = vadd.f32 %v1802_v63, %v5821_v49  ;;  %v6242_v22 = vmul.f32 0.2920817, %v1957_v28 }
 0x2cd   : > { %7502 = vst [vmem:[#allocation42_spill] sm:$0xff] %v6234_v18  ;;  %v2303_v27 = vmul.f32 0.12007839, %v2263_v60  ;;  %v6238_v39 = vmul.f32 0.23388074, %v2728_v34  ;;  %v7138_v51 = vrot.slane %v6234_v18, 6  ;;  %v1959_v56 = vadd.f32 %v1804_v15, %v5828_v46  ;;  %v1808_v49 = vpop.permute.xlu0 %1807 }
 0x2ce   : > { %7505 = vst [vmem:[#allocation40_spill] sm:$0xff] %v6242_v22  ;;  %v2152_v24 = vrot.slane %v1957_v28, 4  ;;  %v2594_v40 = vrot.slane %v1957_v28, 2  ;;  %v2917_v58 = vrot.slane %v2789_v61, 7  ;;  %v2154_v34 = vrot.slane %v1958_v6, 4  ;;  %v1806_v42 = vpop.permute.xlu1 %1805 }
 0x2cf   : > { %7504 = vst [vmem:[#allocation43_spill] sm:$0xff] %v6238_v39  ;;  %v2387_v43 = vrot.slane %v2303_v27, 6  ;;  %v7140_v57 = vrot.slane %v6238_v39, 7  ;;  %v2596_v5 = vrot.slane %v1958_v6, 2 }
 0x2d0   : > { %v2153_v54 = vsel %vm2115_vm6, %v2151_v2, %v2152_v24  ;;  %v2595_v60 = vsel %vm2557_vm7, %v2593_v8, %v2594_v40  ;;  %v2155_v2 = vsel %vm2115_vm6, %v2152_v24, %v2154_v34  ;;  %v6272_v24 = vmul.f32 %v6208_v19, %v6208_v19 }
 0x2d1   : > { %v6251_v63 = vsel %vm2376_vm9, %v7138_v51, %v2387_v43  ;;  %v2508_v22 = vadd.f32 %v2387_v43, %v2006_v26  ;;  %v2918_v27 = vsel %vm2898_vm8, %v7140_v57, %v2917_v58  ;;  %v2270_v61 = vadd.f32 %v2153_v54, %v1956_v35  ;;  %v1812_v58 = vpop.permute.xlu0 %1811 }
 0x2d2   : > { %7506 = vst [vmem:[#allocation21_spill] sm:$0xff] %v6251_v63  ;;  %v6256_v46 = vadd.f32 %v2595_v60, %v1956_v35  ;;  %v2597_v8 = vsel %vm2557_vm7, %v2594_v40, %v2596_v5  ;;  %v2741_v15 = vadd.f32 %v2596_v5, %v1958_v6  ;;  %v2271_v18 = vadd.f32 %v2155_v2, %v1957_v28  ;;  %v1810_v39 = vpop.permute.xlu1 %1809 }
 0x2d3   : > { %v6260_v7 = vadd.f32 %v2918_v27, %v2508_v22  ;;  %v6262_v20 = vmul.f32 0.12007839, %v2270_v61  ;;  %v2740_v51 = vadd.f32 %v2597_v8, %v1957_v28  ;;  %v2018_v63 = vmul.f32 0.2920817, %v1958_v6  ;;  %v7512_v61 = vld [vmem:[#allocation55_spill] sm:$0xff] }
 0x2d4   : > { %7507 = vst [vmem:[#allocation22_spill] sm:$0xff] %v6256_v46  ;;  %v2801_v26 = vmul.f32 0.23388074, %v2741_v15  ;;  %v6264_v43 = vmul.f32 0.2920817, %v1959_v56  ;;  %v6268_v35 = vmul.f32 %v6197_v33, %v6197_v33  ;;  %v2156_v54 = vrot.slane %v1959_v56, 4 }
 0x2d5   : > { %7508 = vst [vmem:[#allocation74_spill] sm:$0xff] %v6260_v7  ;;  %7509 = vst [vmem:[#allocation75_spill] sm:$0xff] %v6262_v20  ;;  %v2311_v22 = vmul.f32 0.12007839, %v2271_v18  ;;  %v6274_v40 = vmul.f32 0.23388074, %v2740_v51  ;;  %v1960_v6 = vadd.f32 %v1806_v42, %v5832_v13  ;;  %v1961_v34 = vadd.f32 %v1808_v49, %v5836_v32  ;;  %v1828_v57 = vpop.permute.xlu0 %1827 }
 0x2d6   : > { %7510 = vst [vmem:[#allocation76_spill] sm:$0xff] %v6268_v35  ;;  %v2937_v60 = vrot.slane %v2801_v26, 7  ;;  %v2598_v28 = vrot.slane %v1959_v56, 2  ;;  %v7142_v5 = vrot.slane %v6262_v20, 6  ;;  %v1962_v2 = vadd.f32 %v1810_v39, %v7512_v61  ;;  %v1814_v51 = vpop.permute.xlu1 %1813 }
 0x2d7   : > { %7511 = vst [vmem:[#allocation77_spill] sm:$0xff] %v6274_v40  ;;  %v2399_v27 = vrot.slane %v2311_v22, 6  ;;  %v7144_v33 = vrot.slane %v6274_v40, 7  ;;  %v2157_v8 = vrot.slane %v1960_v6, 4  ;;  %v2599_v15 = vrot.slane %v1960_v6, 2 }
 0x2d8   : > { %v6282_v18 = vadd.f32 %v1812_v58, %v5844_v14  ;;  %v6284_v26 = vadd.f32 0.0001, %v3192_v25  ;;  %v2159_v39 = vrot.slane %v1961_v34, 4  ;;  %v2020_v49 = vmul.f32 0.2920817, %v1960_v6 }
 0x2d9   : > { %v6289_v13 = vsel %vm2376_vm9, %v7142_v5, %v2399_v27  ;;  %v2520_v32 = vadd.f32 %v2399_v27, %v2018_v63  ;;  %v2938_v42 = vsel %vm2898_vm8, %v7144_v33, %v2937_v60  ;;  %v2158_v22 = vsel %vm2115_vm6, %v2156_v54, %v2157_v8  ;;  %v1832_v60 = vpop.permute.xlu0 %1831 }
 0x2da   : > { %7513 = vst [vmem:[#allocation78_spill] sm:$0xff] %v6284_v26  ;;  %7514 = vst [vmem:[#allocation79_spill] sm:$0xff] %v6289_v13  ;;  %v2600_v14 = vsel %vm2557_vm7, %v2598_v28, %v2599_v15  ;;  %v2601_v58 = vrot.slane %v1961_v34, 2  ;;  %v2272_v25 = vadd.f32 %v2158_v22, %v1959_v56  ;;  %v2160_v20 = vsel %vm2115_vm6, %v2157_v8, %v2159_v39  ;;  %v1830_v13 = vpop.permute.xlu1 %1829 }
 0x2db   : > { %v6296_v61 = vadd.f32 %v2938_v42, %v2520_v32  ;;  %v2742_v46 = vadd.f32 %v2600_v14, %v1959_v56  ;;  %v2273_v5 = vadd.f32 %v2160_v20, %v1960_v6  ;;  %v2161_v40 = vrot.slane %v1962_v2, 4 }
 0x2dc   : > { %v2602_v63 = vsel %vm2557_vm7, %v2599_v15, %v2601_v58  ;;  %v2744_v27 = vadd.f32 %v2601_v58, %v1961_v34  ;;  %v2312_v33 = vmul.f32 0.12007839, %v2272_v25  ;;  %v2021_v54 = vmul.f32 0.2920817, %v1961_v34 }
 0x2dd   : > { %7515 = vst [vmem:[#allocation46_spill] sm:$0xff] %v6296_v61  ;;  %v6300_v19 = vmul.f32 0.23388074, %v2742_v46  ;;  %v2743_v26 = vadd.f32 %v2602_v63, %v1960_v6  ;;  %v2313_v28 = vmul.f32 0.12007839, %v2273_v5  ;;  %v2603_v32 = vrot.slane %v1962_v2, 2  ;;  %v6311_v5 = vpop.permute.xlu0 %1835 }
 0x2de   : > { %v2804_v36 = vmul.f32 0.23388074, %v2744_v27  ;;  %v2162_v42 = vrot.slane %v6282_v18, 4  ;;  %v6305_v56 = vmul.f32 %v6260_v7, %v6260_v7  ;;  %v2401_v20 = vrot.slane %v2312_v33, 6  ;;  %v1834_v6 = vpop.permute.xlu1 %1833  ;;  %v7517_v63 = vld [vmem:[#allocation56_spill] sm:$0xff] }
 0x2df   : > { %v2803_v8 = vmul.f32 0.23388074, %v2743_v26  ;;  %v6307_v15 = vmul.f32 0.2920817, %v1962_v2  ;;  %v2402_v39 = vrot.slane %v2313_v28, 6  ;;  %v2604_v34 = vrot.slane %v6282_v18, 2 }
 0x2e0   : > { %7516 = vst [vmem:[#allocation23_spill] sm:$0xff] %v6305_v56  ;;  %v2942_v22 = vrot.slane %v2804_v36, 7  ;;  %v2163_v46 = vsel %vm2115_vm6, %v2161_v40, %v2162_v42  ;;  %v1964_v27 = vadd.f32 %v1814_v51, %v7517_v63  ;;  %v6317_v33 = vmul.f32 %v6296_v61, %v6296_v61 }
 0x2e1   : > { %v2940_v58 = vrot.slane %v2803_v8, 7  ;;  %v2274_v25 = vadd.f32 %v2163_v46, %v1962_v2  ;;  %v2403_v26 = vsel %vm2376_vm9, %v2401_v20, %v2402_v39  ;;  %v2523_v36 = vadd.f32 %v2402_v39, %v2021_v54  ;;  %v6328_v61 = vpop.permute.xlu0 %1815 }
 0x2e2   : > { %7518 = vst [vmem:[#allocation67_spill] sm:$0xff] %v6317_v33  ;;  %v2605_v40 = vsel %vm2557_vm7, %v2603_v32, %v2604_v34  ;;  %v2522_v28 = vadd.f32 %v2403_v26, %v2020_v49  ;;  %v1971_v17 = vadd.f32 %v1828_v57, %v7519_v1  ;;  %v2023_v8 = vmul.f32 0.2920817, %v6282_v18  ;;  %v6326_v63 = vpop.permute.xlu1 %1837 }
 0x2e3   : > { %v2943_v7 = vsel %vm2898_vm8, %v2940_v58, %v2942_v22  ;;  %v2314_v52 = vmul.f32 0.12007839, %v2274_v25  ;;  %v2745_v51 = vadd.f32 %v2605_v40, %v1962_v2  ;;  %v2164_v46 = vrot.slane %v1964_v27, 4 }
 0x2e4   : > { %v6323_v14 = vadd.f32 %v2943_v7, %v2523_v36  ;;  %v6331_v54 = vadd.f32 %v2401_v20, %v6264_v43  ;;  %v7521_v49 = vrot.slane %v6300_v19, 7  ;;  %v2024_v39 = vmul.f32 0.2920817, %v1964_v27 }
 0x2e5   : > { %v2606_v22 = vrot.slane %v1964_v27, 2  ;;  %v2404_v7 = vrot.slane %v2314_v52, 6  ;;  %v6338_v57 = vmul.f32 0.23388074, %v2745_v51  ;;  %v2165_v2 = vsel %vm2115_vm6, %v2162_v42, %v2164_v46  ;;  %v6349_v51 = vpop.permute.xlu0 %1819 }
 0x2e6   : > { %7520 = vst [vmem:[#allocation68_spill] sm:$0xff] %v6323_v14  ;;  %v2941_v32 = vsel %vm2898_vm8, %v7521_v49, %v2940_v58  ;;  %v2275_v25 = vadd.f32 %v2165_v2, %v6282_v18  ;;  %v6343_v43 = vmul.f32 0.2920817, %v1971_v17  ;;  %v2176_v40 = vrot.slane %v1971_v17, 4  ;;  %v1818_v52 = vpop.permute.xlu1 %1817  ;;  %v7525_v2 = vld [vmem:[#allocation59_spill] sm:$0xff] }
 0x2e7   : > { %v6336_v1 = vadd.f32 %v2941_v32, %v2522_v28  ;;  %7523 = vst [vmem:[#allocation83_spill] sm:$0xff] %v6338_v57  ;;  %v2607_v26 = vsel %vm2557_vm7, %v2604_v34, %v2606_v22  ;;  %v2747_v36 = vadd.f32 %v2606_v22, %v1964_v27  ;;  %v7524_v28 = vld [vmem:[#allocation58_spill] sm:$0xff]  ;;  %v1973_v34 = vadd.f32 %v1832_v60, %v7525_v2 }
 0x2e8   : > { %v2746_v58 = vadd.f32 %v2607_v26, %v6282_v18  ;;  %v1972_v49 = vadd.f32 %v1830_v13, %v7524_v28  ;;  %v2315_v46 = vmul.f32 0.12007839, %v2275_v25  ;;  %v2618_v22 = vrot.slane %v1971_v17, 2  ;;  %v7526_v18 = vld [vmem:[#allocation60_spill] sm:$0xff] }
 0x2e9   : > { %7522 = vst [vmem:[#allocation82_spill] sm:$0xff] %v6336_v1  ;;  %v2807_v32 = vmul.f32 0.23388074, %v2747_v36  ;;  %v2179_v14 = vrot.slane %v1973_v34, 4  ;;  %v1974_v26 = vadd.f32 %v1834_v6, %v7526_v18  ;;  %v2621_v10 = vrot.slane %v1973_v34, 2  ;;  %v6358_v25 = vpop.permute.xlu0 %1841 }
 0x2ea   : > { %v2806_v27 = vmul.f32 0.23388074, %v2746_v58  ;;  %v2177_v44 = vrot.slane %v1972_v49, 4  ;;  %v2619_v9 = vrot.slane %v1972_v49, 2  ;;  %v2405_v48 = vrot.slane %v2315_v46, 6  ;;  %v6356_v42 = vpop.permute.xlu1 %1839 }
 0x2eb   : > { %v2947_v20 = vrot.slane %v2807_v32, 7  ;;  %v7527_v32 = vrot.slane %v6338_v57, 7  ;;  %v2032_v18 = vmul.f32 0.2920817, %v1972_v49 }
 0x2ec   : > { %v2945_v53 = vrot.slane %v2806_v27, 7  ;;  %v2178_v13 = vsel %vm2115_vm6, %v2176_v40, %v2177_v44  ;;  %v2620_v28 = vsel %vm2557_vm7, %v2618_v22, %v2619_v9  ;;  %v2406_v60 = vsel %vm2376_vm9, %v2404_v7, %v2405_v48 }
 0x2ed   : > { %v2526_v36 = vadd.f32 %v2405_v48, %v2024_v39  ;;  %v2280_v58 = vadd.f32 %v2178_v13, %v1971_v17  ;;  %v2754_v2 = vadd.f32 %v2620_v28, %v1971_v17  ;;  %v2525_v46 = vadd.f32 %v2406_v60, %v2023_v8  ;;  %v6374_v13 = vpop.permute.xlu0 %1821 }
 0x2ee   : > { %v2946_v6 = vsel %vm2898_vm8, %v7527_v32, %v2945_v53  ;;  %v2948_v27 = vsel %vm2898_vm8, %v2945_v53, %v2947_v20  ;;  %v2180_v40 = vsel %vm2115_vm6, %v2177_v44, %v2179_v14  ;;  %v6367_v22 = vadd.f32 %v2404_v7, %v6307_v15  ;;  %v6372_v39 = vpop.permute.xlu1 %1843  ;;  %v7530_v32 = vld [vmem:[#allocation61_spill] sm:$0xff] }
 0x2ef   : > { %v2320_v35 = vmul.f32 0.12007839, %v2280_v58  ;;  %v2281_v55 = vadd.f32 %v2180_v40, %v1972_v49  ;;  %v6369_v1 = vadd.f32 %v2946_v6, %v2525_v46  ;;  %v2033_v48 = vmul.f32 0.2920817, %v1973_v34 }
 0x2f0   : > { %v2622_v17 = vsel %vm2557_vm7, %v2619_v9, %v2621_v10  ;;  %v2756_v8 = vadd.f32 %v2621_v10, %v1973_v34  ;;  %v6376_v28 = vadd.f32 %v2948_v27, %v2526_v36  ;;  %v6378_v44 = vmul.f32 0.23388074, %v2754_v2  ;;  %v7531_v10 = vld [vmem:[#allocation62_spill] sm:$0xff] }
 0x2f1   : > { %7528 = vst [vmem:[#allocation84_spill] sm:$0xff] %v6369_v1  ;;  %v2413_v53 = vrot.slane %v2320_v35, 6  ;;  %v2321_v15 = vmul.f32 0.12007839, %v2281_v55  ;;  %v2755_v14 = vadd.f32 %v2622_v17, %v1972_v49  ;;  %v6380_v20 = vmul.f32 0.2920817, %v1974_v26  ;;  %v6393_v2 = vpop.permute.xlu0 %1825 }
 0x2f2   : > { %7529 = vst [vmem:[#allocation48_spill] sm:$0xff] %v6376_v28  ;;  %v2816_v7 = vmul.f32 0.23388074, %v2756_v8  ;;  %v2181_v60 = vrot.slane %v1974_v26, 4  ;;  %v2623_v46 = vrot.slane %v1974_v26, 2  ;;  %v1975_v9 = vadd.f32 %v6311_v5, %v7530_v32  ;;  %v6391_v49 = vpop.permute.xlu1 %1823 }
 0x2f3   : > { %v2414_v58 = vrot.slane %v2321_v15, 6  ;;  %v1976_v34 = vadd.f32 %v6326_v63, %v7531_v10  ;;  %v2815_v6 = vmul.f32 0.23388074, %v2755_v14  ;;  %v1965_v35 = vadd.f32 %v6328_v61, %v6013_v12 }
 0x2f4   : > { %v2962_v36 = vrot.slane %v2816_v7, 7  ;;  %v6389_v55 = vadd.f32 %v1818_v52, %v6019_v16  ;;  %v2182_v17 = vrot.slane %v1975_v9, 4  ;;  %v6399_v63 = vadd.f32 %v2413_v53, %v6343_v43 }
 0x2f5   : > { %v2415_v5 = vsel %vm2376_vm9, %v2413_v53, %v2414_v58  ;;  %v2535_v40 = vadd.f32 %v2414_v58, %v2033_v48  ;;  %v2960_v12 = vrot.slane %v2815_v6, 7  ;;  %v2624_v61 = vrot.slane %v1975_v9, 2  ;;  %v6407_v58 = vpop.permute.xlu0 %1847 }
 0x2f6   : > { %v2035_v16 = vmul.f32 0.2920817, %v1975_v9  ;;  %v2183_v52 = vsel %vm2115_vm6, %v2181_v60, %v2182_v17  ;;  %v2184_v15 = vrot.slane %v1976_v34, 4  ;;  %v2626_v14 = vrot.slane %v1976_v34, 2  ;;  %v6405_v48 = vpop.permute.xlu1 %1845 }
 0x2f7   : > { %v2534_v7 = vadd.f32 %v2415_v5, %v2032_v18  ;;  %v2963_v32 = vsel %vm2898_vm8, %v2960_v12, %v2962_v36  ;;  %v2282_v10 = vadd.f32 %v2183_v52, %v1974_v26  ;;  %v2625_v27 = vsel %vm2557_vm7, %v2623_v46, %v2624_v61 }
 0x2f8   : > { %v6409_v43 = vadd.f32 %v2963_v32, %v2535_v40  ;;  %v2757_v53 = vadd.f32 %v2625_v27, %v1974_v26  ;;  %v2036_v6 = vmul.f32 0.2920817, %v1976_v34  ;;  %v2185_v8 = vsel %vm2115_vm6, %v2182_v17, %v2184_v15 }
 0x2f9   : > { %v2322_v28 = vmul.f32 0.12007839, %v2282_v10  ;;  %v2283_v60 = vadd.f32 %v2185_v8, %v1975_v9  ;;  %v2627_v23 = vsel %vm2557_vm7, %v2624_v61, %v2626_v14  ;;  %v2759_v18 = vadd.f32 %v2626_v14, %v1976_v34  ;;  %v6424_v8 = vpop.permute.xlu0 %1251 }
 0x2fa   : > { %7532 = vst [vmem:[#allocation47_spill] sm:$0xff] %v6409_v43  ;;  %v7533_v36 = vrot.slane %v6378_v44, 7  ;;  %v6416_v46 = vmul.f32 0.23388074, %v2757_v53  ;;  %v2758_v52 = vadd.f32 %v2627_v23, %v1975_v9  ;;  %v2025_v1 = vmul.f32 0.2920817, %v1965_v35  ;;  %v6422_v17 = vpop.permute.xlu1 %1849 }
 0x2fb   : > { %v2323_v27 = vmul.f32 0.12007839, %v2283_v60  ;;  %v2819_v40 = vmul.f32 0.23388074, %v2759_v18  ;;  %v2416_v34 = vrot.slane %v2322_v28, 6  ;;  %v2166_v15 = vrot.slane %v1965_v35, 4 }
 0x2fc   : > { %v2961_v5 = vsel %vm2898_vm8, %v7533_v36, %v2960_v12  ;;  %7534 = vst [vmem:[#allocation52_spill] sm:$0xff] %v6416_v46  ;;  %v2818_v61 = vmul.f32 0.23388074, %v2758_v52  ;;  %v2167_v12 = vrot.slane %v6389_v55, 4  ;;  %v2608_v23 = vrot.slane %v1965_v35, 2 }
 0x2fd   : > { %v6418_v57 = vadd.f32 %v2961_v5, %v2534_v7  ;;  %v2417_v14 = vrot.slane %v2323_v27, 6  ;;  %v2967_v32 = vrot.slane %v2819_v40, 7  ;;  %v2609_v9 = vrot.slane %v6389_v55, 2  ;;  %v6434_v52 = vpop.permute.xlu0 %1255 }
 0x2fe   : > { %v2965_v10 = vrot.slane %v2818_v61, 7  ;;  %v2168_v53 = vsel %vm2115_vm6, %v2166_v15, %v2167_v12  ;;  %v1967_v60 = vadd.f32 %v6349_v51, %v6027_v41  ;;  %v1977_v61 = vadd.f32 %v6356_v42, %v6036_v31  ;;  %v6439_v7 = vpop.permute.xlu1 %1253 }
 0x2ff   : > { %v2418_v18 = vsel %vm2376_vm9, %v2416_v34, %v2417_v14  ;;  %v2538_v28 = vadd.f32 %v2417_v14, %v2036_v6  ;;  %v2276_v36 = vadd.f32 %v2168_v53, %v1965_v35  ;;  %v2610_v5 = vsel %vm2557_vm7, %v2608_v23, %v2609_v9 }
 0x300   : > { %v2537_v27 = vadd.f32 %v2418_v18, %v2035_v16  ;;  %v2968_v40 = vsel %vm2898_vm8, %v2965_v10, %v2967_v32  ;;  %v2748_v26 = vadd.f32 %v2610_v5, %v1965_v35  ;;  %v6442_v15 = vadd.f32 %v2416_v34, %v6380_v20 }
 0x301   : > { %v2026_v41 = vmul.f32 0.2920817, %v6389_v55  ;;  %v2316_v51 = vmul.f32 0.12007839, %v2276_v36  ;;  %v2169_v6 = vrot.slane %v1967_v60, 4  ;;  %v7536_v14 = vrot.slane %v6416_v46, 7  ;;  %v6455_v34 = vpop.permute.xlu0 %1259 }
 0x302   : > { %7535 = vst [vmem:[#allocation53_spill] sm:$0xff] %v6442_v15  ;;  %v6448_v16 = vadd.f32 %v2968_v40, %v2538_v28  ;;  %v2027_v32 = vmul.f32 0.2920817, %v1967_v60  ;;  %v2611_v35 = vrot.slane %v1967_v60, 2  ;;  %v6452_v42 = vmul.f32 0.23388074, %v2748_v26 }
 0x303   : > { %v2966_v23 = vsel %vm2898_vm8, %v7536_v14, %v2965_v10  ;;  %v2407_v31 = vrot.slane %v2316_v51, 6  ;;  %v2170_v20 = vsel %vm2115_vm6, %v2167_v12, %v2169_v6  ;;  %v2186_v46 = vrot.slane %v1977_v61, 4  ;;  %v6459_v10 = vpop.permute.xlu1 %1257 }
 0x304   : > { %v6450_v53 = vadd.f32 %v2966_v23, %v2537_v27  ;;  %v2277_v18 = vadd.f32 %v2170_v20, %v6389_v55  ;;  %v2612_v36 = vsel %vm2557_vm7, %v2609_v9, %v2611_v35  ;;  %v2750_v5 = vadd.f32 %v2611_v35, %v1967_v60 }
 0x305   : > { %v6461_v28 = vadd.f32 %v2407_v31, %v2025_v1  ;;  %v2749_v27 = vadd.f32 %v2612_v36, %v6389_v55  ;;  %v2628_v40 = vrot.slane %v1977_v61, 2  ;;  %v1978_v26 = vadd.f32 %v6358_v25, %v6039_v21 }
 0x306   : > { %7537 = vst [vmem:[#allocation71_spill] sm:$0xff] %v6450_v53  ;;  %v2317_v51 = vmul.f32 0.12007839, %v2277_v18  ;;  %v2810_v12 = vmul.f32 0.23388074, %v2750_v5  ;;  %v1979_v6 = vadd.f32 %v6372_v39, %v6065_v50  ;;  %v6470_v9 = vadd.f32 %v6374_v13, %v6146_v3  ;;  %v6477_v18 = vpop.permute.xlu0 %1263 }
 0x307   : > { %7538 = vst [vmem:[#allocation72_spill] sm:$0xff] %v6461_v28  ;;  %v2809_v14 = vmul.f32 0.23388074, %v2749_v27  ;;  %v2187_v1 = vrot.slane %v1978_v26, 4  ;;  %v2629_v23 = vrot.slane %v1978_v26, 2  ;;  %v6473_v28 = vpop.permute.xlu1 %1261 }
 0x308   : > { %v2408_v35 = vrot.slane %v2317_v51, 6  ;;  %v2952_v55 = vrot.slane %v2810_v12, 7  ;;  %v2037_v20 = vmul.f32 0.2920817, %v1977_v61  ;;  %v2189_v36 = vrot.slane %v1979_v6, 4 }
 0x309   : > { %v2950_v21 = vrot.slane %v2809_v14, 7  ;;  %v2188_v25 = vsel %vm2115_vm6, %v2186_v46, %v2187_v1  ;;  %v2630_v50 = vsel %vm2557_vm7, %v2628_v40, %v2629_v23  ;;  %v2631_v39 = vrot.slane %v1979_v6, 2 }
 0x30a   : > { %v2409_v3 = vsel %vm2376_vm9, %v2407_v31, %v2408_v35  ;;  %v2529_v13 = vadd.f32 %v2408_v35, %v2027_v32  ;;  %v2284_v5 = vadd.f32 %v2188_v25, %v1977_v61  ;;  %v2760_v27 = vadd.f32 %v2630_v50, %v1977_v61 }
 0x30b   : > { %v2528_v60 = vadd.f32 %v2409_v3, %v2026_v41  ;;  %v7539_v51 = vrot.slane %v6452_v42, 7  ;;  %v2953_v53 = vsel %vm2898_vm8, %v2950_v21, %v2952_v55  ;;  %v2190_v14 = vsel %vm2115_vm6, %v2187_v1, %v2189_v36  ;;  %v6494_v35 = vpop.permute.xlu1 %1265 }
 0x30c   : > { %v6485_v46 = vadd.f32 %v2953_v53, %v2529_v13  ;;  %v2324_v40 = vmul.f32 0.12007839, %v2284_v5  ;;  %v6487_v15 = vmul.f32 0.23388074, %v2760_v27  ;;  %v2285_v43 = vadd.f32 %v2190_v14, %v1978_v26  ;;  %v6499_v13 = vpop.permute.xlu0 %1267 }
 0x30d   : > { %v2951_v12 = vsel %vm2898_vm8, %v7539_v51, %v2950_v21  ;;  %v2632_v61 = vsel %vm2557_vm7, %v2629_v23, %v2631_v39  ;;  %v2762_v41 = vadd.f32 %v2631_v39, %v1979_v6  ;;  %v2038_v1 = vmul.f32 0.2920817, %v1978_v26 }
 0x30e   : > { %v6491_v31 = vadd.f32 %v2951_v12, %v2528_v60  ;;  %v2419_v53 = vrot.slane %v2324_v40, 6  ;;  %v2325_v36 = vmul.f32 0.12007839, %v2285_v43  ;;  %v7164_v21 = vrot.slane %v6487_v15, 7 }
 0x30f   : > { %v2039_v25 = vmul.f32 0.2920817, %v1979_v6  ;;  %v2761_v50 = vadd.f32 %v2632_v61, %v1978_v26  ;;  %v2822_v3 = vmul.f32 0.23388074, %v2762_v41  ;;  %v1969_v23 = vadd.f32 %v6391_v49, %v6155_v45 }
 0x310   : > { %7540 = vst [vmem:[#allocation73_spill] sm:$0xff] %v6491_v31  ;;  %v6501_v60 = vadd.f32 %v2419_v53, %v2037_v20  ;;  %v2420_v5 = vrot.slane %v2325_v36, 6  ;;  %v1970_v39 = vadd.f32 %v6393_v2, %v6159_v11  ;;  %v1980_v43 = vadd.f32 %v6405_v48, %v6165_v29  ;;  %v6516_v2 = vpop.permute.xlu1 %1269  ;;  %v6526_v36 = vpop.permute.xlu0 %1271 }
 0x311   : > { %v2821_v27 = vmul.f32 0.23388074, %v2761_v50  ;;  %v2972_v51 = vrot.slane %v2822_v3, 7  ;;  %v6511_v26 = vadd.f32 %v6407_v58, %v6200_v38  ;;  %v2171_v12 = vrot.slane %v6470_v9, 4 }
 0x312   : > { %v2421_v6 = vsel %vm2376_vm9, %v2419_v53, %v2420_v5  ;;  %v2541_v20 = vadd.f32 %v2420_v5, %v2039_v25  ;;  %v2172_v14 = vrot.slane %v1969_v23, 4  ;;  %v2613_v49 = vrot.slane %v6470_v9, 2 }
 0x313   : > { %v2540_v40 = vadd.f32 %v2421_v6, %v2038_v1  ;;  %v2970_v45 = vrot.slane %v2821_v27, 7  ;;  %v2614_v11 = vrot.slane %v1969_v23, 2  ;;  %v2028_v61 = vmul.f32 0.2920817, %v6470_v9 }
 0x314   : > { %v2173_v29 = vsel %vm2115_vm6, %v2171_v12, %v2172_v14  ;;  %v2174_v48 = vrot.slane %v1970_v39, 4  ;;  %v2616_v38 = vrot.slane %v1970_v39, 2  ;;  %v6539_v32 = vpop.permute.xlu1 %1273 }
 0x315   : > { %v2971_v58 = vsel %vm2898_vm8, %v7164_v21, %v2970_v45  ;;  %v2973_v41 = vsel %vm2898_vm8, %v2970_v45, %v2972_v51  ;;  %v2278_v1 = vadd.f32 %v2173_v29, %v6470_v9  ;;  %v2615_v53 = vsel %vm2557_vm7, %v2613_v49, %v2614_v11 }
 0x316   : > { %v6528_v25 = vadd.f32 %v2971_v58, %v2540_v40  ;;  %v6530_v50 = vadd.f32 %v2973_v41, %v2541_v20  ;;  %v2751_v3 = vadd.f32 %v2615_v53, %v6470_v9  ;;  %v2175_v5 = vsel %vm2115_vm6, %v2172_v14, %v2174_v48 }
 0x317   : > { %v2318_v27 = vmul.f32 0.12007839, %v2278_v1  ;;  %v2279_v6 = vadd.f32 %v2175_v5, %v1969_v23  ;;  %v2617_v12 = vsel %vm2557_vm7, %v2614_v11, %v2616_v38  ;;  %v2753_v55 = vadd.f32 %v2616_v38, %v1970_v39  ;;  %v1852_v5 = vpop.permute.xlu0 %1851 }
 0x318   : > { %7541 = vst [vmem:[#allocation85_spill] sm:$0xff] %v6528_v25  ;;  %v6537_v45 = vmul.f32 0.23388074, %v2751_v3  ;;  %v2752_v49 = vadd.f32 %v2617_v12, %v1969_v23  ;;  %v2191_v29 = vrot.slane %v1980_v43, 4  ;;  %v2633_v41 = vrot.slane %v1980_v43, 2 }
 0x319   : > { %v2410_v40 = vrot.slane %v2318_v27, 6  ;;  %v2319_v58 = vmul.f32 0.12007839, %v2279_v6  ;;  %v2813_v20 = vmul.f32 0.23388074, %v2753_v55  ;;  %v2192_v11 = vrot.slane %v6511_v26, 4 }
 0x31a   : > { %7542 = vst [vmem:[#allocation50_spill] sm:$0xff] %v6537_v45  ;;  %v7165_v9 = vrot.slane %v6537_v45, 7  ;;  %v2030_v14 = vmul.f32 0.2920817, %v1970_v39  ;;  %v2812_v48 = vmul.f32 0.23388074, %v2752_v49  ;;  %v1982_v6 = vadd.f32 %v6422_v17, %v6203_v30  ;;  %v1854_v30 = vpop.permute.xlu1 %1853 }
 0x31b   : > { %v6543_v38 = vadd.f32 %v2410_v40, %v2028_v61  ;;  %v2411_v1 = vrot.slane %v2319_v58, 6  ;;  %v2957_v53 = vrot.slane %v2813_v20, 7  ;;  %v2634_v3 = vrot.slane %v6511_v26, 2 }
 0x31c   : > { %v2029_v12 = vmul.f32 0.2920817, %v1969_v23  ;;  %v2955_v27 = vrot.slane %v2812_v48, 7  ;;  %v2193_v55 = vsel %vm2115_vm6, %v2191_v29, %v2192_v11  ;;  %v2040_v29 = vmul.f32 0.2920817, %v1980_v43 }
 0x31d   : > { %7543 = vst [vmem:[#allocation86_spill] sm:$0xff] %v6543_v38  ;;  %v2412_v51 = vsel %vm2376_vm9, %v2410_v40, %v2411_v1  ;;  %v2532_v39 = vadd.f32 %v2411_v1, %v2030_v14  ;;  %v2286_v49 = vadd.f32 %v2193_v55, %v1980_v43  ;;  %v2635_v21 = vsel %vm2557_vm7, %v2633_v41, %v2634_v3  ;;  %v7551_v41 = vld [vmem:[#allocation97_spill] sm:$0xff] }
 0x31e   : > { %v2531_v61 = vadd.f32 %v2412_v51, %v2029_v12  ;;  %v2956_v58 = vsel %vm2898_vm8, %v7165_v9, %v2955_v27  ;;  %v2958_v20 = vsel %vm2898_vm8, %v2955_v27, %v2957_v53  ;;  %v2763_v23 = vadd.f32 %v2635_v21, %v1980_v43  ;;  %v7547_v21 = vld [vmem:[#allocation90_spill] sm:$0xff]  ;;  %v1856_v43 = vpop.permute.xlu0 %1855 }
 0x31f   : > { %v6555_v48 = vadd.f32 %v2958_v20, %v2532_v39  ;;  %v2326_v38 = vmul.f32 0.12007839, %v2286_v49  ;;  %v2194_v25 = vrot.slane %v1982_v6, 4  ;;  %v2041_v40 = vmul.f32 0.2920817, %v6511_v26  ;;  %v7549_v20 = vld [vmem:[#allocation92_spill] sm:$0xff] }
 0x320   : > { %v6557_v17 = vadd.f32 %v2956_v58, %v2531_v61  ;;  %v6560_v14 = vmul.f32 0.23388074, %v2763_v23  ;;  %v2636_v51 = vrot.slane %v1982_v6, 2  ;;  %v1383_v12 = vadd.f32 %v6424_v8, %v7547_v21 }
 0x321   : > { %7544 = vst [vmem:[#allocation88_spill] sm:$0xff] %v6555_v48  ;;  %v2422_v1 = vrot.slane %v2326_v38, 6  ;;  %v2195_v53 = vsel %vm2115_vm6, %v2192_v11, %v2194_v25  ;;  %v2042_v27 = vmul.f32 0.2920817, %v1982_v6  ;;  %v1384_v23 = vadd.f32 %v6439_v7, %v7549_v20  ;;  %v7550_v38 = vld [vmem:[#allocation94_spill] sm:$0xff] }
 0x322   : > { %7545 = vst [vmem:[#allocation49_spill] sm:$0xff] %v6557_v17  ;;  %7546 = vst [vmem:[#allocation51_spill] sm:$0xff] %v6560_v14  ;;  %v2287_v55 = vadd.f32 %v2195_v53, %v6511_v26  ;;  %v2637_v39 = vsel %vm2557_vm7, %v2634_v3, %v2636_v51  ;;  %v2765_v49 = vadd.f32 %v2636_v51, %v1982_v6  ;;  %v7166_v11 = vrot.slane %v6560_v14, 7  ;;  %v7552_v3 = vld [vmem:[#allocation98_spill] sm:$0xff]  ;;  %v7554_v51 = vld [vmem:[#allocation101_spill] sm:$0xff] }
 0x323   : > { %v6569_v61 = vadd.f32 %v2422_v1, %v2040_v29  ;;  %v2764_v58 = vadd.f32 %v2637_v39, %v6511_v26  ;;  %v1385_v25 = vadd.f32 %v6434_v52, %v7550_v38  ;;  %v1386_v53 = vadd.f32 %v6459_v10, %v7551_v41  ;;  %v7553_v29 = vld [vmem:[#allocation99_spill] sm:$0xff]  ;;  %v1858_v39 = vpop.permute.xlu1 %1857 }
 0x324   : > { %v2327_v8 = vmul.f32 0.12007839, %v2287_v55  ;;  %v2825_v21 = vmul.f32 0.23388074, %v2765_v49  ;;  %v1387_v6 = vadd.f32 %v6455_v34, %v7552_v3  ;;  %v1388_v26 = vadd.f32 %v6473_v28, %v7553_v29  ;;  %v7555_v38 = vld [vmem:[#allocation103_spill] sm:$0xff]  ;;  %v7556_v49 = vld [vmem:[#allocation105_spill] sm:$0xff] }
 0x325   : > { %7548 = vst [vmem:[#allocation54_spill] sm:$0xff] %v6569_v61  ;;  %v2824_v9 = vmul.f32 0.23388074, %v2764_v58  ;;  %v1389_v7 = vadd.f32 %v6477_v18, %v7554_v51  ;;  %v6587_v55 = vadd.f32 %v6494_v35, %v7555_v38  ;;  %v6591_v10 = vadd.f32 %v6499_v13, %v7556_v49  ;;  %v7557_v58 = vld [vmem:[#allocation41_spill] sm:$0xff]  ;;  %v1860_v18 = vpop.permute.xlu0 %1859  ;;  %v7558_v29 = vld [vmem:[#allocation44_spill] sm:$0xff] }
 0x326   : > { %v2423_v20 = vrot.slane %v2327_v8, 6  ;;  %v2977_v52 = vrot.slane %v2825_v21, 7  ;;  %v6595_v34 = vadd.f32 %v6516_v2, %v7557_v58  ;;  %v6597_v28 = vadd.f32 %v1852_v5, %v1383_v12 }
 0x327   : > { %v2975_v41 = vrot.slane %v2824_v9, 7  ;;  %v1984_v3 = vadd.f32 %v1854_v30, %v1384_v23  ;;  %v6602_v35 = vadd.f32 %v6526_v36, %v7558_v29  ;;  %v1985_v51 = vadd.f32 %v1856_v43, %v1385_v25  ;;  %v7560_v30 = vld [vmem:[#allocation45_spill] sm:$0xff]  ;;  %v1862_v25 = vpop.permute.xlu1 %1861 }
 0x328   : > { %v2424_v8 = vsel %vm2376_vm9, %v2422_v1, %v2423_v20  ;;  %v2544_v21 = vadd.f32 %v2423_v20, %v2042_v27  ;;  %v6608_v9 = vadd.f32 %v1858_v39, %v1386_v53  ;;  %v6614_v1 = vadd.f32 %v6539_v32, %v7560_v30 }
 0x329   : > { %v2543_v38 = vadd.f32 %v2424_v8, %v2041_v40  ;;  %v2976_v13 = vsel %vm2898_vm8, %v7166_v11, %v2975_v41  ;;  %v2978_v2 = vsel %vm2898_vm8, %v2975_v41, %v2977_v52  ;;  %v6617_v12 = vmul.f32 0.2920817, %v6597_v28  ;;  %v1864_v29 = vpop.permute.xlu0 %1863 }
 0x32a   : > { %v6610_v5 = vadd.f32 %v2978_v2, %v2544_v21  ;;  %v1987_v36 = vadd.f32 %v1860_v18, %v1387_v6  ;;  %v2196_v40 = vrot.slane %v6597_v28, 4  ;;  %v2197_v27 = vrot.slane %v1984_v3, 4 }
 0x32b   : > { %v6619_v43 = vadd.f32 %v2976_v13, %v2543_v38  ;;  %v2639_v23 = vrot.slane %v1984_v3, 2  ;;  %v2638_v39 = vrot.slane %v6597_v28, 2  ;;  %v2199_v20 = vrot.slane %v1985_v51, 4 }
 0x32c   : > { %7559 = vst [vmem:[#allocation55_spill] sm:$0xff] %v6610_v5  ;;  %v2641_v52 = vrot.slane %v1985_v51, 2  ;;  %v6625_v32 = vmul.f32 0.2920817, %v1984_v3  ;;  %v2198_v49 = vsel %vm2115_vm6, %v2196_v40, %v2197_v27  ;;  %v2045_v41 = vmul.f32 0.2920817, %v1985_v51 }
 0x32d   : > { %7561 = vst [vmem:[#allocation56_spill] sm:$0xff] %v6619_v43  ;;  %v2201_v6 = vrot.slane %v6608_v9, 4  ;;  %v2288_v58 = vadd.f32 %v2198_v49, %v6597_v28  ;;  %v2200_v18 = vsel %vm2115_vm6, %v2197_v27, %v2199_v20  ;;  %v2643_v2 = vrot.slane %v6608_v9, 2  ;;  %v1866_v20 = vpop.permute.xlu1 %1865 }
 0x32e   : > { %v2642_v8 = vsel %vm2557_vm7, %v2639_v23, %v2641_v52  ;;  %v2768_v21 = vadd.f32 %v2641_v52, %v1985_v51  ;;  %v2289_v38 = vadd.f32 %v2200_v18, %v1984_v3  ;;  %v2202_v30 = vrot.slane %v1987_v36, 4 }
 0x32f   : > { %v2767_v13 = vadd.f32 %v2642_v8, %v1984_v3  ;;  %v6633_v53 = vmul.f32 0.12007839, %v2288_v58  ;;  %v2644_v40 = vrot.slane %v1987_v36, 2  ;;  %v1988_v43 = vadd.f32 %v1862_v25, %v1388_v26 }
 0x330   : > { %v2828_v11 = vmul.f32 0.23388074, %v2768_v21  ;;  %v2329_v17 = vmul.f32 0.12007839, %v2289_v38  ;;  %v2203_v49 = vsel %vm2115_vm6, %v2201_v6, %v2202_v30  ;;  %v6638_v27 = vadd.f32 %v1864_v29, %v1389_v7 }
 0x331   : > { %v6635_v5 = vmul.f32 0.23388074, %v2767_v13  ;;  %v6641_v51 = vsel %vm2557_vm7, %v2638_v39, %v2639_v23  ;;  %v6644_v52 = vmul.f32 0.2920817, %v6608_v9  ;;  %v2290_v58 = vadd.f32 %v2203_v49, %v6608_v9  ;;  %v1868_v13 = vpop.permute.xlu0 %1867  ;;  %v1870_v33 = vpop.permute.xlu1 %1869 }
 0x332   : > { %v2982_v3 = vrot.slane %v2828_v11, 7  ;;  %v2426_v26 = vrot.slane %v2329_v17, 6  ;;  %v2204_v8 = vrot.slane %v1988_v43, 4  ;;  %v6649_v21 = vmul.f32 0.2920817, %v1987_v36 }
 0x333   : > { %v7174_v25 = vrot.slane %v6635_v5, 7  ;;  %v6651_v7 = vmul.f32 0.12007839, %v2290_v58  ;;  %v6654_v6 = vsel %vm2557_vm7, %v2643_v2, %v2644_v40  ;;  %v2646_v23 = vrot.slane %v1988_v43, 2 }
 0x334   : > { %v2547_v11 = vadd.f32 %v2426_v26, %v2045_v41  ;;  %v2048_v39 = vmul.f32 0.2920817, %v1988_v43  ;;  %v2205_v29 = vsel %vm2115_vm6, %v2202_v30, %v2204_v8  ;;  %v6658_v38 = vmul.f32 0.2920817, %v6638_v27 }
 0x335   : > { %v2983_v17 = vsel %vm2898_vm8, %v7174_v25, %v2982_v3  ;;  %v2291_v49 = vadd.f32 %v2205_v29, %v1987_v36  ;;  %v2647_v58 = vsel %vm2557_vm7, %v2644_v40, %v2646_v23  ;;  %v2771_v18 = vadd.f32 %v2646_v23, %v1988_v43  ;;  %v1874_v56 = vpop.permute.xlu1 %1873 }
 0x336   : > { %v7562_v2 = vrot.slane %v6633_v53, 6  ;;  %v2770_v41 = vadd.f32 %v2647_v58, %v1987_v36  ;;  %v2206_v30 = vrot.slane %v6638_v27, 4  ;;  %v1990_v8 = vadd.f32 %v1866_v20, %v6587_v55 }
 0x337   : > { %v2331_v14 = vmul.f32 0.12007839, %v2291_v49  ;;  %v2831_v61 = vmul.f32 0.23388074, %v2771_v18  ;;  %v1991_v3 = vadd.f32 %v1868_v13, %v6591_v10  ;;  %v6673_v29 = vadd.f32 %v2983_v17, %v2547_v11 }
 0x338   : > { %v6667_v48 = vsel %vm2376_vm9, %v7562_v2, %v2426_v26  ;;  %v6675_v43 = vmul.f32 0.23388074, %v2770_v41  ;;  %v2207_v40 = vrot.slane %v1990_v8, 4  ;;  %v2649_v23 = vrot.slane %v1990_v8, 2 }
 0x339   : > { %v2429_v26 = vrot.slane %v2331_v14, 6  ;;  %v2987_v2 = vrot.slane %v2831_v61, 7  ;;  %v2648_v36 = vrot.slane %v6638_v27, 2  ;;  %v2209_v58 = vrot.slane %v1991_v3, 4 }
 0x33a   : > { %v7176_v55 = vrot.slane %v6675_v43, 7  ;;  %v2208_v20 = vsel %vm2115_vm6, %v2206_v30, %v2207_v40  ;;  %v2651_v25 = vrot.slane %v1991_v3, 2  ;;  %v6681_v18 = vadd.f32 %v1870_v33, %v6595_v34  ;;  %v1872_v30 = vpop.permute.xlu0 %1871 }
 0x33b   : > { %v2550_v10 = vadd.f32 %v2429_v26, %v2048_v39  ;;  %v6683_v11 = vmul.f32 0.2920817, %v1990_v8  ;;  %v2292_v13 = vadd.f32 %v2208_v20, %v6638_v27  ;;  %v2210_v17 = vsel %vm2115_vm6, %v2207_v40, %v2209_v58 }
 0x33c   : > { %7563 = vst [vmem:[#allocation57_spill] sm:$0xff] %v6681_v18  ;;  %v2988_v14 = vsel %vm2898_vm8, %v7176_v55, %v2987_v2  ;;  %v2293_v61 = vadd.f32 %v2210_v17, %v1990_v8  ;;  %v2652_v49 = vsel %vm2557_vm7, %v2649_v23, %v2651_v25  ;;  %v2774_v41 = vadd.f32 %v2651_v25, %v1991_v3 }
 0x33d   : > { %7564 = vst [vmem:[#allocation58_spill] sm:$0xff] %v6683_v11  ;;  %v6691_v45 = vmul.f32 0.12007839, %v2292_v13  ;;  %v6694_v33 = vsel %vm2557_vm7, %v2648_v36, %v2649_v23  ;;  %v2051_v34 = vmul.f32 0.2920817, %v1991_v3  ;;  %v2773_v39 = vadd.f32 %v2652_v49, %v1990_v8 }
 0x33e   : > { %v7565_v20 = vrot.slane %v6651_v7, 6  ;;  %v6701_v58 = vadd.f32 %v2988_v14, %v2550_v10  ;;  %v2333_v2 = vmul.f32 0.12007839, %v2293_v61  ;;  %v2834_v17 = vmul.f32 0.23388074, %v2774_v41 }
 0x33f   : > { %v6703_v55 = vmul.f32 0.23388074, %v2773_v39  ;;  %v2211_v25 = vrot.slane %v6681_v18, 4  ;;  %v1993_v13 = vadd.f32 %v1872_v30, %v6602_v35  ;;  %v1994_v23 = vadd.f32 %v1874_v56, %v6614_v1 }
 0x340   : > { %v6699_v40 = vsel %vm2376_vm9, %v7565_v20, %v2429_v26  ;;  %v2432_v36 = vrot.slane %v2333_v2, 6  ;;  %v2992_v3 = vrot.slane %v2834_v17, 7  ;;  %v6709_v8 = vmul.f32 0.2920817, %v6681_v18 }
 0x341   : > { %v2766_v26 = vadd.f32 %v6641_v51, %v6597_v28  ;;  %v7177_v14 = vrot.slane %v6703_v55, 7  ;;  %v2653_v61 = vrot.slane %v6681_v18, 2  ;;  %v2212_v49 = vrot.slane %v1993_v13, 4 }
 0x342   : > { %7566 = vst [vmem:[#allocation59_spill] sm:$0xff] %v6709_v8  ;;  %v6716_v41 = vmul.f32 0.2920817, %v1993_v13  ;;  %v2654_v35 = vrot.slane %v1993_v13, 2  ;;  %v2214_v30 = vrot.slane %v1994_v23, 4  ;;  %v7568_v56 = vrot.slane %v6633_v53, 6 }
 0x343   : > { %v2553_v39 = vadd.f32 %v2432_v36, %v2051_v34  ;;  %v2213_v20 = vsel %vm2115_vm6, %v2211_v25, %v2212_v49  ;;  %v2054_v2 = vmul.f32 0.2920817, %v1994_v23  ;;  %v2656_v28 = vrot.slane %v1994_v23, 2 }
 0x344   : > { %7567 = vst [vmem:[#allocation60_spill] sm:$0xff] %v6716_v41  ;;  %v2545_v1 = vadd.f32 %v7568_v56, %v6617_v12  ;;  %v2993_v51 = vsel %vm2898_vm8, %v7177_v14, %v2992_v3  ;;  %v2294_v17 = vadd.f32 %v2213_v20, %v6681_v18  ;;  %v2215_v10 = vsel %vm2115_vm6, %v2212_v49, %v2214_v30 }
 0x345   : > { %v2826_v41 = vmul.f32 0.23388074, %v2766_v26  ;;  %v2295_v8 = vadd.f32 %v2215_v10, %v1993_v13  ;;  %v2657_v31 = vsel %vm2557_vm7, %v2654_v35, %v2656_v28  ;;  %v2777_v11 = vadd.f32 %v2656_v28, %v1994_v23 }
 0x346   : > { %v7569_v12 = vrot.slane %v6300_v19, 7  ;;  %v6731_v34 = vmul.f32 0.12007839, %v2294_v17  ;;  %v2776_v25 = vadd.f32 %v2657_v31, %v1993_v13  ;;  %v7570_v3 = vrot.slane %v6378_v44, 7 }
 0x347   : > { %v2979_v56 = vrot.slane %v2826_v41, 7  ;;  %v2335_v20 = vmul.f32 0.12007839, %v2295_v8  ;;  %v2837_v18 = vmul.f32 0.23388074, %v2777_v11  ;;  %v2546_v10 = vadd.f32 %v6667_v48, %v6625_v32  ;;  %v7573_v8 = vld [vmem:[#allocation34_spill] sm:$0xff] }
 0x348   : > { %v3083_v53 = vadd.f32 %v7569_v12, %v6331_v54  ;;  %v3095_v14 = vadd.f32 %v7570_v3, %v6399_v63  ;;  %v2434_v23 = vrot.slane %v6731_v34, 6  ;;  %v6740_v49 = vmul.f32 0.23388074, %v2776_v25  ;;  %v7572_v63 = vld [vmem:[#allocation82_spill] sm:$0xff] }
 0x349   : > { %v3107_v19 = vadd.f32 %v2979_v56, %v2545_v1  ;;  %v2435_v31 = vrot.slane %v2335_v20, 6  ;;  %v2997_v13 = vrot.slane %v2837_v18, 7  ;;  %v7571_v41 = vrot.slane %v6635_v5, 7  ;;  %v7574_v18 = vld [vmem:[#allocation76_spill] sm:$0xff]  ;;  %v7658_v34 = vld [vmem:[#allocation86_spill] sm:$0xff] }
 0x34a   : > { %v3155_v26 = vsub.f32 %v3083_v53, %v6181_v62  ;;  %v3167_v54 = vsub.f32 %v3095_v14, %v6183_v4  ;;  %v3156_v11 = vsub.f32 %v7572_v63, %v6216_v0  ;;  %v2995_v62 = vrot.slane %v6740_v49, 7  ;;  %v7575_v53 = vld [vmem:[#allocation24_spill] sm:$0xff]  ;;  %v7675_v49 = vld [vmem:[#allocation23_spill] sm:$0xff] }
 0x34b   : > { %v2981_v44 = vsel %vm2898_vm8, %v2979_v56, %v7571_v41  ;;  %v3179_v48 = vsub.f32 %v3107_v19, %v7573_v8  ;;  %v6753_v1 = vsel %vm2376_vm9, %v2434_v23, %v2435_v31  ;;  %v2556_v4 = vadd.f32 %v2435_v31, %v2054_v2  ;;  %v7578_v41 = vld [vmem:[#allocation63_spill] sm:$0xff]  ;;  %v7581_v8 = vld [vmem:[#allocation13_spill] sm:$0xff] }
 0x34c   : > { %v3275_v32 = vadd.f32 %v3167_v54, %v3155_v26  ;;  %v3108_v30 = vadd.f32 %v2981_v44, %v2546_v10  ;;  %v3168_v5 = vsub.f32 %v6418_v57, %v7574_v18  ;;  %v3252_v14 = vadd.f32 %v7574_v18, %v6216_v0  ;;  %v7577_v10 = vld [vmem:[#allocation95_spill] sm:$0xff]  ;;  %v7579_v44 = vld [vmem:[#allocation26_spill] sm:$0xff] }
 0x34d   : > { %v2998_v28 = vsel %vm2898_vm8, %v2995_v62, %v2997_v13  ;;  %v3215_v17 = vmul.f32 2.0, %v3179_v48  ;;  %v7576_v56 = vrot.slane %v6691_v45, 6  ;;  %v6768_v2 = vadd.f32 %v2993_v51, %v2553_v39  ;;  %v7585_v48 = vld [vmem:[#allocation12_spill] sm:$0xff] }
 0x34e   : > { %v3287_v12 = vadd.f32 0.0009, %v3275_v32  ;;  %v3180_v25 = vsub.f32 %v3108_v30, %v7575_v53  ;;  %v6771_v57 = vsel %vm2557_vm7, %v2653_v61, %v2654_v35  ;;  %v3276_v20 = vadd.f32 %v3168_v5, %v3156_v11  ;;  %v7582_v61 = vld [vmem:[#allocation64_spill] sm:$0xff]  ;;  %v7583_v35 = vld [vmem:[#allocation66_spill] sm:$0xff] }
 0x34f   : > { %v6766_v3 = vsel %vm2376_vm9, %v7576_v56, %v2432_v36  ;;  %v6773_v0 = vadd.f32 %v2998_v28, %v2556_v4  ;;  %v3227_v26 = vadd.f32 0.0009, %v3215_v17  ;;  %v3264_v31 = vadd.f32 0.0001, %v3252_v14  ;;  %v7580_v36 = vld [vmem:[#allocation30_spill] sm:$0xff] }
 0x350   : > { %v6776_v19 = vmul.f32 %v3287_v12, %v7577_v10  ;;  %v3216_v54 = vmul.f32 2.0, %v3180_v25  ;;  %v3288_v13 = vadd.f32 0.0009, %v3276_v20  ;;  %v2721_v63 = vadd.f32 %v7579_v44, %v7578_v41  ;;  %v7586_v32 = vld [vmem:[#allocation14_spill] sm:$0xff]  ;;  %v7588_v12 = vld [vmem:[#allocation19_spill] sm:$0xff]  ;;  %v7590_v10 = vld [vmem:[#allocation28_spill] sm:$0xff] }
 0x351   : > { %v2733_v39 = vadd.f32 %v7581_v8, %v7580_v36  ;;  %v7584_v51 = vrot.slane %v7583_v35, 6  ;;  %v7587_v30 = vrot.slane %v7586_v32, 6  ;;  %v2769_v18 = vadd.f32 %v6654_v6, %v6608_v9  ;;  %v7591_v41 = vld [vmem:[#allocation91_spill] sm:$0xff]  ;;  %v7592_v6 = vld [vmem:[#allocation29_spill] sm:$0xff] }
 0x352   : > { %3733 = vrcp.f32 %v6776_v19  ;;  %v3228_v5 = vadd.f32 0.0009, %v3216_v54  ;;  %v6791_v14 = vmul.f32 %v3288_v13, %v3264_v31  ;;  %v2781_v28 = vmul.f32 0.23388074, %v2721_v63  ;;  %v7593_v13 = vld [vmem:[#allocation83_spill] sm:$0xff] }
 0x353   : > { %v2500_v11 = vadd.f32 %v7584_v51, %v7582_v61  ;;  %v2512_v4 = vadd.f32 %v7587_v30, %v7585_v48  ;;  %v2793_v17 = vmul.f32 0.23388074, %v2733_v39  ;;  %v6794_v53 = vmul.f32 %v3227_v26, %v7588_v12  ;;  %v7597_v39 = vld [vmem:[#allocation47_spill] sm:$0xff]  ;;  %v7599_v51 = vld [vmem:[#allocation78_spill] sm:$0xff] }
 0x354   : > { %v7589_v25 = vrot.slane %v6651_v7, 6  ;;  %v2829_v20 = vmul.f32 0.23388074, %v2769_v18  ;;  %v3145_v44 = vmul.f32 %v7591_v41, %v7590_v10  ;;  %3735 = vrcp.f32 %v6791_v14  ;;  %v7595_v7 = vld [vmem:[#allocation68_spill] sm:$0xff]  ;;  %v7600_v18 = vld [vmem:[#allocation53_spill] sm:$0xff] }
 0x355   : > { %v2904_v36 = vrot.slane %v2781_v28, 7  ;;  %v2924_v9 = vrot.slane %v2793_v17, 7  ;;  %v3253_v54 = vadd.f32 %v6061_v59, %v7592_v6  ;;  %v7594_v26 = vrot.slane %v7593_v13, 7  ;;  %v7601_v28 = vld [vmem:[#allocation52_spill] sm:$0xff] }
 0x356   : > { %v2548_v56 = vadd.f32 %v7589_v25, %v6644_v52  ;;  %v2984_v31 = vrot.slane %v2829_v20, 7  ;;  %v3181_v8 = vsub.f32 %v6673_v29, %v3145_v44  ;;  %v7596_v52 = vsub.f32 %v7595_v7, %v7592_v6  ;;  %v7604_v7 = vld [vmem:[#allocation35_spill] sm:$0xff] }
 0x357   : > { %v3086_v63 = vadd.f32 %v7594_v26, %v6367_v22  ;;  %v7598_v61 = vsub.f32 %v7597_v39, %v6061_v59  ;;  %v6815_v48 = vmul.f32 %v3228_v5, %v7599_v51  ;;  %v3062_v32 = vadd.f32 %v2904_v36, %v2500_v11  ;;  %v7603_v59 = vld [vmem:[#allocation65_spill] sm:$0xff]  ;;  %v7606_v11 = vld [vmem:[#allocation31_spill] sm:$0xff] }
 0x358   : > { %v3074_v30 = vadd.f32 %v2924_v9, %v2512_v4  ;;  %v7602_v17 = vrot.slane %v7601_v28, 7  ;;  %v3110_v25 = vadd.f32 %v2984_v31, %v2548_v56  ;;  %v3217_v22 = vmul.f32 2.0, %v3181_v8 }
 0x359   : > { %v3277_v35 = vadd.f32 %v7598_v61, %v7596_v52  ;;  %v3265_v20 = vadd.f32 0.0001, %v3253_v54  ;;  %v3122_v10 = vmul.f32 %v3062_v32, %v3062_v32  ;;  %v3193_v13 = vmul.f32 2.0, %v3145_v44  ;;  %v7605_v52 = vld [vmem:[#allocation89_spill] sm:$0xff]  ;;  %v7607_v44 = vld [vmem:[#allocation27_spill] sm:$0xff] }
 0x35a   : > { %v3098_v12 = vadd.f32 %v7602_v17, %v7600_v18  ;;  %v3134_v41 = vmul.f32 %v3074_v30, %v3074_v30  ;;  %v3146_v6 = vmul.f32 %v3074_v30, %v3062_v32  ;;  %v2501_v5 = vadd.f32 %v7604_v7, %v7603_v59  ;;  %v7609_v17 = vld [vmem:[#allocation93_spill] sm:$0xff]  ;;  %v7612_v59 = vld [vmem:[#allocation18_spill] sm:$0xff] }
 0x35b   : > { %v3289_v29 = vadd.f32 0.0009, %v3277_v35  ;;  %v2513_v4 = vadd.f32 %v7606_v11, %v7605_v52  ;;  %v2549_v39 = vadd.f32 %v6699_v40, %v6649_v21  ;;  %v3158_v61 = vsub.f32 %v3086_v63, %v3122_v10  ;;  %v7613_v7 = vld [vmem:[#allocation37_spill] sm:$0xff]  ;;  %v7615_v11 = vld [vmem:[#allocation102_spill] sm:$0xff] }
 0x35c   : > { %v3170_v56 = vsub.f32 %v3098_v12, %v3134_v41  ;;  %v3182_v8 = vsub.f32 %v3110_v25, %v3146_v6  ;;  %v3229_v54 = vadd.f32 0.0009, %v3217_v22  ;;  %v3194_v35 = vmul.f32 2.0, %v3146_v6 }
 0x35d   : > { %v6820_v26 = vmul.f32 %v3289_v29, %v3265_v20  ;;  %v3254_v51 = vadd.f32 %v3134_v41, %v3122_v10  ;;  %v7608_v32 = vrot.slane %v7607_v44, 7  ;;  %v7610_v20 = vrot.slane %v7609_v17, 7  ;;  %v7619_v17 = vld [vmem:[#allocation71_spill] sm:$0xff] }
 0x35e   : > { %v3218_v18 = vmul.f32 2.0, %v3182_v8  ;;  %v3278_v28 = vadd.f32 %v3170_v56, %v3158_v61  ;;  %v7611_v21 = vrot.slane %v6675_v43, 7  ;;  %v3205_v63 = vadd.f32 0.0001, %v3193_v13  ;;  %v7616_v61 = vld [vmem:[#allocation70_spill] sm:$0xff] }
 0x35f   : > { %3737 = vrcp.f32 %v6820_v26  ;;  %v2906_v30 = vsel %vm2898_vm8, %v2904_v36, %v7608_v32  ;;  %v2926_v29 = vsel %vm2898_vm8, %v2924_v9, %v7610_v20  ;;  %v3734_v10 = vpop.eup %3733  ;;  %v3266_v41 = vadd.f32 0.0001, %v3254_v51 }
 0x360   : > { %v2986_v40 = vsel %vm2898_vm8, %v2984_v31, %v7611_v21  ;;  %v3063_v12 = vadd.f32 %v2906_v30, %v2501_v5  ;;  %v3075_v25 = vadd.f32 %v2926_v29, %v2513_v4  ;;  %v3290_v6 = vadd.f32 0.0009, %v3278_v28  ;;  %v7618_v30 = vld [vmem:[#allocation84_spill] sm:$0xff] }
 0x361   : > { %v3111_v22 = vadd.f32 %v2986_v40, %v2549_v39  ;;  %v7614_v36 = vrot.slane %v7613_v7, 6  ;;  %v7617_v56 = vrot.slane %v7616_v61, 6  ;;  %v3323_v9 = vmul.f32 %v3734_v10, %v6776_v19  ;;  %v3736_v51 = vpop.eup %3735 }
 0x362   : > { %v3123_v43 = vmul.f32 %v3063_v12, %v3063_v12  ;;  %v3135_v44 = vmul.f32 %v3075_v25, %v3075_v25  ;;  %v3147_v31 = vmul.f32 %v3075_v25, %v3063_v12  ;;  %v3206_v13 = vadd.f32 0.0001, %v3194_v35  ;;  %v7621_v12 = vld [vmem:[#allocation17_spill] sm:$0xff] }
 0x363   : > { %v2503_v52 = vadd.f32 %v7614_v36, %v7612_v59  ;;  %v2515_v8 = vadd.f32 %v7617_v56, %v7615_v11  ;;  %v3230_v5 = vadd.f32 0.0009, %v3218_v18  ;;  %v6845_v4 = vmul.f32 %v3290_v6, %v3266_v41  ;;  %v7622_v59 = vld [vmem:[#allocation72_spill] sm:$0xff] }
 0x364   : > { %v6847_v39 = vmul.f32 %v3229_v54, %v3205_v63  ;;  %v3335_v32 = vsub.f32 2.0, %v3323_v9  ;;  %v3159_v28 = vsub.f32 %v7618_v30, %v3123_v43  ;;  %v3171_v20 = vsub.f32 %v7619_v17, %v3135_v44 }
 0x365   : > { %v3183_v29 = vsub.f32 %v3111_v22, %v3147_v31  ;;  %v3324_v21 = vmul.f32 %v3736_v51, %v6791_v14  ;;  %3739 = vrcp.f32 %v6845_v4  ;;  %v3255_v19 = vadd.f32 %v3135_v44, %v3123_v43  ;;  %v7626_v44 = vld [vmem:[#allocation32_spill] sm:$0xff] }
 0x366   : > { %v2772_v35 = vadd.f32 %v6694_v33, %v6638_v27  ;;  %v3347_v18 = vmul.f32 %v3734_v10, %v3335_v32  ;;  %v3279_v40 = vadd.f32 %v3171_v20, %v3159_v28  ;;  %v7620_v54 = vrot.slane %v6691_v45, 6  ;;  %v7624_v33 = vld [vmem:[#allocation69_spill] sm:$0xff] }
 0x367   : > { %v6859_v25 = vmul.f32 0.23388074, %v7621_v12  ;;  %v3336_v41 = vsub.f32 2.0, %v3324_v21  ;;  %v3195_v6 = vmul.f32 2.0, %v3147_v31  ;;  %v3219_v22 = vmul.f32 2.0, %v3183_v29  ;;  %v7627_v31 = vld [vmem:[#allocation16_spill] sm:$0xff] }
 0x368   : > { %v2551_v63 = vadd.f32 %v7620_v54, %v6658_v38  ;;  %v7623_v14 = vrot.slane %v6452_v42, 7  ;;  %v3359_v36 = vmul.f32 %v3347_v18, %v6794_v53  ;;  %v3267_v11 = vadd.f32 0.0001, %v3255_v19  ;;  %v7628_v21 = vld [vmem:[#allocation87_spill] sm:$0xff]  ;;  %v7629_v12 = vld [vmem:[#allocation48_spill] sm:$0xff] }
 0x369   : > { %v3291_v27 = vadd.f32 0.0009, %v3279_v40  ;;  %v6866_v10 = vmul.f32 0.23388074, %v7624_v33  ;;  %v3348_v61 = vmul.f32 %v3736_v51, %v3336_v41  ;;  %v6868_v45 = vmul.f32 0.23388074, %v2772_v35 }
 0x36a   : > { %v3089_v7 = vadd.f32 %v7623_v14, %v7622_v59  ;;  %v2909_v38 = vrot.slane %v6859_v25, 7  ;;  %v7625_v56 = vrot.slane %v6487_v15, 7  ;;  %3383 = vrot.lane.b32.xlu0 %v3359_v36, %s3950_s6  ;;  %v6875_v42 = vmul.f32 %v3230_v5, %v3206_v13 }
 0x36b   : > { %v6877_v43 = vmul.f32 %v3291_v27, %v3267_v11  ;;  %v2929_v53 = vrot.slane %v6866_v10, 7  ;;  %v3148_v32 = vmul.f32 %v7627_v31, %v7626_v44  ;;  %v3360_v30 = vmul.f32 %v3348_v61, %v6815_v48 }
 0x36c   : > { %v3101_v9 = vadd.f32 %v7625_v56, %v6501_v60  ;;  %v3738_v51 = vpop.eup %3737  ;;  %v3231_v28 = vadd.f32 0.0009, %v3219_v22  ;;  %v2989_v17 = vrot.slane %v6868_v45, 7  ;;  %v3065_v15 = vadd.f32 %v2909_v38, %v2503_v52  ;;  %v7633_v22 = vld [vmem:[#allocation33_spill] sm:$0xff] }
 0x36d   : > { %v3325_v60 = vmul.f32 %v3738_v51, %v6820_v26  ;;  %3741 = vrcp.f32 %v6877_v43  ;;  %v3077_v13 = vadd.f32 %v2929_v53, %v2515_v8  ;;  %v3184_v5 = vsub.f32 %v6701_v58, %v3148_v32  ;;  %3385 = vrot.lane.b32.xlu1 %v3360_v30, %s3950_s6 }
 0x36e   : > { %v3207_v20 = vadd.f32 0.0001, %v3195_v6  ;;  %v3113_v48 = vadd.f32 %v2989_v17, %v2551_v63  ;;  %v3125_v29 = vmul.f32 %v3065_v15, %v3065_v15  ;;  %v3256_v19 = vadd.f32 %v6124_v47, %v7628_v21  ;;  %v7632_v6 = vld [vmem:[#allocation80_spill] sm:$0xff] }
 0x36f   : > { %v3337_v52 = vsub.f32 2.0, %v3325_v60  ;;  %v3137_v35 = vmul.f32 %v3077_v13, %v3077_v13  ;;  %v3149_v26 = vmul.f32 %v3077_v13, %v3065_v15  ;;  %v3220_v18 = vmul.f32 2.0, %v3184_v5 }
 0x370   : > { %v3161_v40 = vsub.f32 %v3089_v7, %v3125_v29  ;;  %v3196_v54 = vmul.f32 2.0, %v3148_v32  ;;  %v7630_v8 = vsub.f32 %v7629_v12, %v7628_v21  ;;  %v7631_v58 = vsub.f32 %v6448_v16, %v6124_v47 }
 0x371   : > { %v3151_v63 = vmul.f32 %v7633_v22, %v7632_v6  ;;  %v6904_v59 = vmul.f32 %v3231_v28, %v3207_v20  ;;  %v3173_v14 = vsub.f32 %v3101_v9, %v3137_v35  ;;  %v3185_v36 = vsub.f32 %v3113_v48, %v3149_v26  ;;  %v7641_v22 = vld [vmem:[#allocation100_spill] sm:$0xff] }
 0x372   : > { %v3280_v41 = vadd.f32 %v7631_v58, %v7630_v8  ;;  %v3197_v11 = vmul.f32 2.0, %v3149_v26  ;;  %v3349_v27 = vmul.f32 %v3738_v51, %v3337_v52  ;;  %v3257_v33 = vadd.f32 %v3137_v35, %v3125_v29  ;;  %v3740_v56 = vpop.eup %3739 }
 0x373   : > { %v3268_v61 = vadd.f32 0.0001, %v3256_v19  ;;  %v3221_v44 = vmul.f32 2.0, %v3185_v36  ;;  %v3281_v31 = vadd.f32 %v3173_v14, %v3161_v40  ;;  %v3232_v32 = vadd.f32 0.0009, %v3220_v18  ;;  %v7636_v18 = vld [vmem:[#allocation15_spill] sm:$0xff] }
 0x374   : > { %v3292_v7 = vadd.f32 0.0009, %v3280_v41  ;;  %v3187_v30 = vsub.f32 %v6768_v2, %v3151_v63  ;;  %v3326_v47 = vmul.f32 %v3740_v56, %v6845_v4  ;;  %v3209_v16 = vadd.f32 0.0001, %v3197_v11  ;;  %v7637_v40 = vld [vmem:[#allocation38_spill] sm:$0xff]  ;;  %v7643_v36 = vld [vmem:[#allocation20_spill] sm:$0xff] }
 0x375   : > { %v3208_v15 = vadd.f32 0.0001, %v3196_v54  ;;  %v3361_v9 = vmul.f32 %v3349_v27, %v6847_v39  ;;  %v3233_v28 = vadd.f32 0.0009, %v3221_v44  ;;  %v3269_v13 = vadd.f32 0.0001, %v3257_v33 }
 0x376   : > { %v6908_v60 = vmul.f32 %v3292_v7, %v3268_v61  ;;  %v3293_v51 = vadd.f32 0.0009, %v3281_v31  ;;  %v3338_v5 = vsub.f32 2.0, %v3326_v47  ;;  %v3259_v20 = vadd.f32 %v6272_v24, %v6170_v37  ;;  %v7650_v31 = vld [vmem:[#allocation75_spill] sm:$0xff] }
 0x377   : > { %v7634_v2 = vsub.f32 %v6485_v46, %v6170_v37  ;;  %v7635_v4 = vsub.f32 %v6530_v50, %v6272_v24  ;;  %v6922_v21 = vmul.f32 %v3232_v32, %v3208_v15  ;;  %v3199_v39 = vmul.f32 2.0, %v3151_v63  ;;  %v7638_v37 = vld [vmem:[#allocation104_spill] sm:$0xff]  ;;  %v7640_v50 = vld [vmem:[#allocation58_spill] sm:$0xff] }
 0x378   : > { %3743 = vrcp.f32 %v6908_v60  ;;  %v6920_v29 = vmul.f32 %v3293_v51, %v3269_v13  ;;  %v3223_v19 = vmul.f32 2.0, %v3187_v30  ;;  %v3350_v52 = vmul.f32 %v3740_v56, %v3338_v5  ;;  %v7639_v46 = vld [vmem:[#allocation36_spill] sm:$0xff]  ;;  %v7647_v56 = vld [vmem:[#allocation42_spill] sm:$0xff] }
 0x379   : > { %v3283_v48 = vadd.f32 %v7635_v4, %v7634_v2  ;;  %v3271_v35 = vadd.f32 0.0001, %v3259_v20  ;;  %v2504_v54 = vadd.f32 %v7637_v40, %v7636_v18  ;;  %v6926_v12 = vmul.f32 %v3233_v28, %v3209_v16  ;;  %v7652_v16 = vld [vmem:[#allocation57_spill] sm:$0xff]  ;;  %v7653_v28 = vld [vmem:[#allocation39_spill] sm:$0xff]  ;;  %v7654_v51 = vld [vmem:[#allocation22_spill] sm:$0xff] }
 0x37a   : > { %3745 = vrcp.f32 %v6920_v29  ;;  %v2516_v24 = vadd.f32 %v7639_v46, %v7638_v37  ;;  %v2552_v8 = vadd.f32 %v6766_v3, %v7640_v50  ;;  %v3742_v58 = vpop.eup %3741  ;;  %v3362_v41 = vmul.f32 %v3350_v52, %v6875_v42  ;;  %v7655_v4 = vld [vmem:[#allocation73_spill] sm:$0xff]  ;;  %v7657_v18 = vld [vmem:[#allocation59_spill] sm:$0xff] }
 0x37b   : > { %v3295_v26 = vadd.f32 0.0009, %v3283_v48  ;;  %v7642_v63 = vrot.slane %v7641_v22, 7  ;;  %v7644_v11 = vrot.slane %v7643_v36, 7  ;;  %v3327_v33 = vmul.f32 %v3742_v58, %v6877_v43  ;;  %v7656_v52 = vld [vmem:[#allocation85_spill] sm:$0xff] }
 0x37c   : > { %v7645_v3 = vrot.slane %v6703_v55, 7  ;;  %3389 = vrot.lane.b32.xlu0 %v3362_v41, %s3950_s6  ;;  %v7648_v10 = vrot.slane %v7647_v56, 6  ;;  %v7651_v43 = vrot.slane %v7650_v31, 6  ;;  %v2775_v15 = vadd.f32 %v6771_v57, %v7652_v16  ;;  %v7664_v31 = vld [vmem:[#allocation96_spill] sm:$0xff] }
 0x37d   : > { %v6934_v6 = vmul.f32 %v3295_v26, %v3271_v35  ;;  %v2911_v14 = vsel %vm2898_vm8, %v2909_v38, %v7642_v63  ;;  %v2931_v27 = vsel %vm2898_vm8, %v2929_v53, %v7644_v11  ;;  %v7646_v38 = vld [vmem:[#allocation81_spill] sm:$0xff]  ;;  %v3339_v55 = vsub.f32 2.0, %v3327_v33  ;;  %v7661_v11 = vld [vmem:[#allocation54_spill] sm:$0xff] }
 0x37e   : > { %v2991_v42 = vsel %vm2898_vm8, %v2989_v17, %v7645_v3  ;;  %v3066_v61 = vadd.f32 %v2911_v14, %v2504_v54  ;;  %v3078_v7 = vadd.f32 %v2931_v27, %v2516_v24  ;;  %v2506_v44 = vadd.f32 %v7648_v10, %v7646_v38  ;;  %v7649_v53 = vld [vmem:[#allocation25_spill] sm:$0xff]  ;;  %v7662_v27 = vld [vmem:[#allocation51_spill] sm:$0xff] }
 0x37f   : > { %3747 = vrcp.f32 %v6934_v6  ;;  %v3114_v25 = vadd.f32 %v2991_v42, %v2552_v8  ;;  %v2518_v32 = vadd.f32 %v7651_v43, %v7649_v53  ;;  %v3235_v17 = vadd.f32 0.0009, %v3223_v19  ;;  %v7665_v43 = vld [vmem:[#allocation21_spill] sm:$0xff] }
 0x380   : > { %v3126_v30 = vmul.f32 %v3066_v61, %v3066_v61  ;;  %v3138_v45 = vmul.f32 %v3078_v7, %v3078_v7  ;;  %v3150_v47 = vmul.f32 %v3078_v7, %v3066_v61  ;;  %v2787_v13 = vmul.f32 0.23388074, %v7653_v28  ;;  %3387 = vrot.lane.b32.xlu0 %v3361_v9, %s3950_s6 }
 0x381   : > { %v2799_v5 = vmul.f32 0.23388074, %v7654_v51  ;;  %v3351_v20 = vmul.f32 %v3742_v58, %v3339_v55  ;;  %v3211_v2 = vadd.f32 0.0001, %v3199_v39  ;;  %v2554_v19 = vadd.f32 %v2434_v23, %v7657_v18  ;;  %v7659_v23 = vld [vmem:[#allocation50_spill] sm:$0xff]  ;;  %v7666_v55 = vld [vmem:[#allocation40_spill] sm:$0xff] }
 0x382   : > { %v3162_v48 = vsub.f32 %v7655_v4, %v3126_v30  ;;  %v3174_v35 = vsub.f32 %v7656_v52, %v3138_v45  ;;  %v3258_v26 = vadd.f32 %v3138_v45, %v3126_v30  ;;  %v2835_v40 = vmul.f32 0.23388074, %v2775_v15  ;;  %v7667_v30 = vld [vmem:[#allocation79_spill] sm:$0xff] }
 0x383   : > { %v2914_v54 = vrot.slane %v2787_v13, 7  ;;  %v3363_v57 = vmul.f32 %v3351_v20, %v6904_v59  ;;  %v3186_v37 = vsub.f32 %v3114_v25, %v3150_v47  ;;  %v2934_v24 = vrot.slane %v2799_v5, 7  ;;  %v7668_v13 = vld [vmem:[#allocation60_spill] sm:$0xff] }
 0x384   : > { %v3282_v46 = vadd.f32 %v3174_v35, %v3162_v48  ;;  %v3247_v50 = vmul.f32 %v3235_v17, %v3211_v2  ;;  %v6971_v39 = vmul.f32 2.0, %v3150_v47  ;;  %v2994_v8 = vrot.slane %v2835_v40, 7  ;;  %v7669_v48 = vld [vmem:[#allocation43_spill] sm:$0xff] }
 0x385   : > { %v3068_v58 = vadd.f32 %v2914_v54, %v2506_v44  ;;  %v3744_v41 = vpop.eup %3743  ;;  %3391 = vrot.lane.b32.xlu1 %v3363_v57, %s3950_s6  ;;  %v3270_v9 = vadd.f32 0.0001, %v3258_v26  ;;  %v3080_v63 = vadd.f32 %v2934_v24, %v2518_v32  ;;  %v7660_v14 = vrot.slane %v7659_v23, 7 }
 0x386   : > { %v3294_v22 = vadd.f32 0.0009, %v3282_v46  ;;  %v3328_v59 = vmul.f32 %v3744_v41, %v6908_v60  ;;  %v7663_v33 = vrot.slane %v7662_v27, 7  ;;  %v3116_v42 = vadd.f32 %v2994_v8, %v2554_v19  ;;  %v7671_v46 = vld [vmem:[#allocation77_spill] sm:$0xff] }
 0x387   : > { %v3092_v36 = vadd.f32 %v7660_v14, %v7658_v34  ;;  %v3128_v61 = vmul.f32 %v3068_v58, %v3068_v58  ;;  %v3222_v7 = vmul.f32 2.0, %v3186_v37  ;;  %v3140_v38 = vmul.f32 %v3080_v63, %v3080_v63  ;;  %v3746_v10 = vpop.eup %3745 }
 0x388   : > { %v3104_v3 = vadd.f32 %v7663_v33, %v7661_v11  ;;  %v6981_v25 = vmul.f32 %v3294_v22, %v3270_v9  ;;  %v3152_v56 = vmul.f32 %v3080_v63, %v3068_v58  ;;  %v3340_v44 = vsub.f32 2.0, %v3328_v59  ;;  %v7674_v11 = vld [vmem:[#allocation46_spill] sm:$0xff]  ;;  %v7676_v33 = vld [vmem:[#allocation67_spill] sm:$0xff] }
 0x389   : > { %v3164_v53 = vsub.f32 %v3092_v36, %v3128_v61  ;;  %v2507_v32 = vadd.f32 %v7665_v43, %v7664_v31  ;;  %v2519_v60 = vadd.f32 %v7667_v30, %v7666_v55  ;;  %v3329_v45 = vmul.f32 %v3746_v10, %v6920_v29 }
 0x38a   : > { %3749 = vrcp.f32 %v6981_v25  ;;  %v3176_v47 = vsub.f32 %v3104_v3, %v3140_v38  ;;  %v3188_v17 = vsub.f32 %v3116_v42, %v3152_v56  ;;  %v3352_v16 = vmul.f32 %v3744_v41, %v3340_v44  ;;  %v7682_v44 = vld [vmem:[#allocation56_spill] sm:$0xff] }
 0x38b   : > { %v3200_v15 = vmul.f32 2.0, %v3152_v56  ;;  %v3260_v28 = vadd.f32 %v3140_v38, %v3128_v61  ;;  %v2555_v51 = vadd.f32 %v6753_v1, %v7668_v13  ;;  %v3341_v20 = vsub.f32 2.0, %v3329_v45  ;;  %v7681_v56 = vld [vmem:[#allocation49_spill] sm:$0xff] }
 0x38c   : > { %v3748_v5 = vpop.eup %3747  ;;  %v3224_v2 = vmul.f32 2.0, %v3188_v17  ;;  %v3284_v4 = vadd.f32 %v3176_v47, %v3164_v53  ;;  %v7670_v52 = vrot.slane %v7669_v48, 7  ;;  %v3364_v29 = vmul.f32 %v3352_v16, %v6922_v21 }
 0x38d   : > { %v3331_v26 = vmul.f32 %v3748_v5, %v6934_v6  ;;  %v3212_v18 = vadd.f32 0.0001, %v3200_v15  ;;  %v3272_v19 = vadd.f32 0.0001, %v3260_v28  ;;  %v3353_v40 = vmul.f32 %v3746_v10, %v3341_v20 }
 0x38e   : > { %v2916_v35 = vsel %vm2898_vm8, %v2914_v54, %v7670_v52  ;;  %v3236_v57 = vadd.f32 0.0009, %v3224_v2  ;;  %v3296_v37 = vadd.f32 0.0009, %v3284_v4  ;;  %v7672_v58 = vrot.slane %v7671_v46, 7  ;;  %3393 = vrot.lane.b32.xlu1 %v3364_v29, %s3950_s6 }
 0x38f   : > { %v3343_v41 = vsub.f32 2.0, %v3331_v26  ;;  %v2996_v54 = vsel %vm2898_vm8, %v2994_v8, %v2995_v62  ;;  %v3069_v9 = vadd.f32 %v2916_v35, %v2507_v32  ;;  %v3365_v6 = vmul.f32 %v3353_v40, %v6926_v12  ;;  %v7677_v8 = vld [vmem:[#allocation88_spill] sm:$0xff]  ;;  %v7679_v12 = vld [vmem:[#allocation55_spill] sm:$0xff] }
 0x390   : > { %v2936_v1 = vsel %vm2898_vm8, %v2934_v24, %v7672_v58  ;;  %v3248_v22 = vmul.f32 %v3236_v57, %v3212_v18  ;;  %v3308_v63 = vmul.f32 %v3296_v37, %v3272_v19  ;;  %v3117_v34 = vadd.f32 %v2996_v54, %v2555_v51  ;;  %v7673_v24 = vld [vmem:[#allocation74_spill] sm:$0xff] }
 0x391   : > { %v3081_v21 = vadd.f32 %v2936_v1, %v2519_v60  ;;  %v3355_v23 = vmul.f32 %v3748_v5, %v3343_v41  ;;  %v3129_v14 = vmul.f32 %v3069_v9, %v3069_v9  ;;  %3395 = vrot.lane.b32.xlu0 %v3365_v6, %s3950_s6  ;;  %v3154_v27 = vmul.f32 %v7674_v11, %v7673_v24 }
 0x392   : > { %3751 = vrcp.f32 %v3308_v63  ;;  %v3262_v62 = vadd.f32 %v7676_v33, %v7675_v49  ;;  %v7678_v3 = vsub.f32 %v7677_v8, %v7675_v49  ;;  %v7680_v42 = vsub.f32 %v7679_v12, %v7676_v33 }
 0x393   : > { %v3141_v36 = vmul.f32 %v3081_v21, %v3081_v21  ;;  %v3153_v59 = vmul.f32 %v3081_v21, %v3069_v9  ;;  %v3367_v38 = vmul.f32 %v3355_v23, %v3247_v50  ;;  %v3165_v10 = vsub.f32 %v7681_v56, %v3129_v14 }
 0x394   : > { %v3286_v61 = vadd.f32 %v7680_v42, %v7678_v3  ;;  %v3190_v55 = vsub.f32 %v6773_v0, %v3154_v27  ;;  %v3202_v30 = vmul.f32 2.0, %v3154_v27  ;;  %v3274_v47 = vadd.f32 0.0001, %v3262_v62 }
 0x395   : > { %v3177_v53 = vsub.f32 %v7682_v44, %v3141_v36  ;;  %v3189_v31 = vsub.f32 %v3117_v34, %v3153_v59  ;;  %v3201_v43 = vmul.f32 2.0, %v3153_v59  ;;  %v3261_v32 = vadd.f32 %v3141_v36, %v3129_v14  ;;  %3399 = vrot.lane.b32.xlu0 %v3367_v38, %s3950_s6 }
 0x396   : > { %v3298_v17 = vadd.f32 0.0009, %v3286_v61  ;;  %v3234_v16 = vadd.f32 0.0009, %v3222_v7  ;;  %v3226_v5 = vmul.f32 2.0, %v3190_v55 }
 0x397   : > { %v3225_v60 = vmul.f32 2.0, %v3189_v31  ;;  %v3285_v45 = vadd.f32 %v3177_v53, %v3165_v10  ;;  %v3213_v15 = vadd.f32 0.0001, %v3201_v43  ;;  %v3273_v28 = vadd.f32 0.0001, %v3261_v32  ;;  %v3750_v50 = vpop.eup %3749 }
 0x398   : > { %v3310_v20 = vmul.f32 %v3298_v17, %v3274_v47  ;;  %v3210_v2 = vadd.f32 0.0001, %v6971_v39  ;;  %v3330_v4 = vmul.f32 %v3750_v50, %v6981_v25  ;;  %v3214_v0 = vadd.f32 0.0001, %v3202_v30 }
 0x399   : > { %v3237_v13 = vadd.f32 0.0009, %v3225_v60  ;;  %v3297_v51 = vadd.f32 0.0009, %v3285_v45  ;;  %v3238_v35 = vadd.f32 0.0009, %v3226_v5  ;;  %v3470_v47 = vlaneseq }
 0x39a   : > { %3753 = vrcp.f32 %v3310_v20  ;;  %v3246_v29 = vmul.f32 %v3234_v16, %v3210_v2  ;;  %v3342_v26 = vsub.f32 2.0, %v3330_v4 }
 0x39b   : > { %v3249_v48 = vmul.f32 %v3237_v13, %v3213_v15  ;;  %v3309_v52 = vmul.f32 %v3297_v51, %v3273_v28  ;;  %v3250_v7 = vmul.f32 %v3238_v35, %v3214_v0  ;;  %v3471_v15 = vand.u32 127, %v3470_v47 }
 0x39c   : > { %v3354_v18 = vmul.f32 %v3750_v50, %v3342_v26  ;;  %v3474_v50 = vshrl.u32 %v3470_v47, 7 }
 0x39d   : > { %3755 = vrcp.f32 %v3309_v52  ;;  %v3477_v13 = vadd.s32 4294967290, %v3471_v15  ;;  %v3472_v5 = vadd.s32 2, %v3471_v15 }
 0x39e   : > { %v3366_v19 = vmul.f32 %v3354_v18, %v3246_v29 }
 0x39f   : > { %v3752_v40 = vpop.eup %3751  ;;  %v3480_v2 = vsub.s32 %v3477_v13, %v3474_v50  ;;  %v3475_v0 = vsub.s32 %v3472_v5, %v3474_v50 }
 0x3a0   : > { %3397 = vrot.lane.b32.xlu1 %v3366_v19, %s3950_s6  ;;  %v3332_v57 = vmul.f32 %v3752_v40, %v3308_v63 }
 0x3a2   : > { %v3344_v37 = vsub.f32 2.0, %v3332_v57 }
 0x3a4   : > { %v3356_v46 = vmul.f32 %v3752_v40, %v3344_v37 }
 0x3a6   : > { %v3368_v58 = vmul.f32 %v3356_v46, %v3248_v22 }
 0x3a7   : > { %v3754_v39 = vpop.eup %3753 }
 0x3a8   : > { %v3334_v25 = vmul.f32 %v3754_v39, %v3310_v20  ;;  %3401 = vrot.lane.b32.xlu1 %v3368_v58, %s3950_s6  ;;  %v3484_v20 = vadd.s32 4294967282, %v3471_v15 }
 0x3aa   : > { %v3756_v1 = vpop.eup %3755  ;;  %v3346_v54 = vsub.f32 2.0, %v3334_v25 }
 0x3ab   : > { %v3333_v41 = vmul.f32 %v3756_v1, %v3309_v52 }
 0x3ac   : > { %v3358_v21 = vmul.f32 %v3754_v39, %v3346_v54 }
 0x3ad   : > { %v3345_v9 = vsub.f32 2.0, %v3333_v41 }
 0x3ae   : > { %v3370_v34 = vmul.f32 %v3358_v21, %v3250_v7 }
 0x3af   : > { %v3357_v6 = vmul.f32 %v3756_v1, %v3345_v9 }
 0x3b0   : > { %3405 = vrot.lane.b32.xlu1 %v3370_v34, %s3950_s6 }
 0x3b1   : > { %v3369_v23 = vmul.f32 %v3357_v6, %v3249_v48  ;;  %v3487_v48 = vsub.s32 %v3484_v20, %v3474_v50 }
 0x3b3   : > { %3403 = vrot.lane.b32.xlu0 %v3369_v23, %s3950_s6 }
 0x3dc   : > { %v3384_v63 = vpop.permute.xlu0 %3383 }
 0x3dd   : > { %v3420_v14 = vsel %vm3419_vm10, %v3384_v63, 0.0 }
 0x3de   : > { %3421 = vadd.xlane.f32.xlu0 %v3420_v14 }
 0x3df   : > { %v3386_v22 = vpop.permute.xlu1 %3385 }
 0x3e0   : > { %v3424_v36 = vsel %vm3423_vm11, %v3386_v22, 0.0 }
 0x3e1   : > { %3425 = vadd.xlane.f32.xlu1 %v3424_v36 }
 0x3ee   : > { %v3390_v59 = vpop.permute.xlu0 %3389 }
 0x3ef   : > { %v3431_v24 = vsel %vm3419_vm10, %v3390_v59, 0.0 }
 0x3f0   : > { %3432 = vadd.xlane.f32.xlu0 %v3431_v24  ;;  %v3547_v24 = vsub.s32 %v3471_v15, %v3474_v50 }
 0x3f2   : > { %v3388_v11 = vpop.permute.xlu0 %3387 }
 0x3f3   : > { %v3428_v27 = vsel %vm3427_vm12, %v3388_v11, 0.0 }
 0x3f4   : > { %3429 = vadd.xlane.f32.xlu1 %v3428_v27 }
 0x3f7   : > { %v3392_v49 = vpop.permute.xlu1 %3391 }
 0x3f8   : > { %v3434_v33 = vsel %vm3423_vm11, %v3392_v49, 0.0 }
 0x3f9   : > { %3435 = vadd.xlane.f32.xlu0 %v3434_v33 }
 0x400   : > { %v3394_v62 = vpop.permute.xlu1 %3393 }
 0x401   : > { %v3437_v8 = vsel %vm3427_vm12, %v3394_v62, 0.0 }
 0x402   : > { %3438 = vadd.xlane.f32.xlu0 %v3437_v8 }
 0x403   : > { %v3396_v3 = vpop.permute.xlu0 %3395 }
 0x404   : > { %v3440_v12 = vsel %vm3419_vm10, %v3396_v3, 0.0 }
 0x405   : > { %3441 = vadd.xlane.f32.xlu1 %v3440_v12 }
 0x407   : > { %v3400_v42 = vpop.permute.xlu0 %3399 }
 0x408   : > { %v3446_v61 = vsel %vm3427_vm12, %v3400_v42, 0.0 }
 0x409   : > { %3447 = vadd.xlane.f32.xlu1 %v3446_v61 }
 0x412   : > { %v3398_v38 = vpop.permute.xlu1 %3397 }
 0x413   : > { %v3443_v56 = vsel %vm3423_vm11, %v3398_v38, 0.0 }
 0x414   : > { %3444 = vadd.xlane.f32.xlu0 %v3443_v56 }
 0x41a   : > { %v3402_v10 = vpop.permute.xlu1 %3401 }
 0x41b   : > { %v3449_v44 = vsel %vm3419_vm10, %v3402_v10, 0.0 }
 0x41c   : > { %3450 = vadd.xlane.f32.xlu0 %v3449_v44 }
 0x422   : > { %v3406_v53 = vpop.permute.xlu1 %3405 }
 0x423   : > { %v3455_v31 = vsel %vm3427_vm12, %v3406_v53, 0.0 }
 0x424   : > { %3456 = vadd.xlane.f32.xlu0 %v3455_v31 }
 0x425   : > { %v3404_v43 = vpop.permute.xlu0 %3403 }
 0x426   : > { %v3452_v32 = vsel %vm3423_vm11, %v3404_v43, 0.0 }
 0x427   : > { %3453 = vadd.xlane.f32.xlu1 %v3452_v32 }
 0x467   : > { %v3422_v55 = vpop.xlane.xlu0 %3421 }
 0x468   : > { %v3476_v18 = vrot.slane %v3422_v55, %v3475_v0 }
 0x46a   : > { %v3426_v45 = vpop.xlane.xlu1 %3425 }
 0x46b   : > { %v3481_v19 = vrot.slane %v3426_v45, %v3480_v2 }
 0x46d   : > { %v3483_v9 = vsel %vm3482_vm13, %v3481_v19, %v3476_v18 }
 0x479   : > { %v3433_v30 = vpop.xlane.xlu0 %3432 }
 0x47a   : > { %v3494_v40 = vrot.slane %v3433_v30, %v3475_v0 }
 0x47d   : > { %v3430_v16 = vpop.xlane.xlu1 %3429 }
 0x47e   : > { %v3488_v57 = vrot.slane %v3430_v16, %v3487_v48 }
 0x480   : > { %v3490_v34 = vsel %vm3489_vm14, %v3488_v57, %v3483_v9 }
 0x482   : > { %v3436_v60 = vpop.xlane.xlu0 %3435 }
 0x483   : > { %v3498_v29 = vrot.slane %v3436_v60, %v3480_v2 }
 0x485   : > { %v3499_v39 = vsel %vm3482_vm13, %v3498_v29, %v3494_v40 }
 0x48b   : > { %v3439_v17 = vpop.xlane.xlu0 %3438 }
 0x48c   : > { %v3503_v7 = vrot.slane %v3439_v17, %v3487_v48 }
 0x48e   : > { %v3442_v51 = vpop.xlane.xlu1 %3441  ;;  %v3504_v1 = vsel %vm3489_vm14, %v3503_v7, %v3499_v39 }
 0x48f   : > { %v3508_v26 = vrot.slane %v3442_v51, %v3475_v0  ;;  %v3534_v63 = vsel %vm3533_vm15, %v3504_v1, %v3490_v34 }
 0x492   : > { %v3448_v52 = vpop.xlane.xlu1 %3447 }
 0x493   : > { %v3517_v58 = vrot.slane %v3448_v52, %v3487_v48 }
 0x49d   : > { %v3445_v28 = vpop.xlane.xlu0 %3444 }
 0x49e   : > { %v3512_v35 = vrot.slane %v3445_v28, %v3480_v2 }
 0x4a0   : > { %v3513_v37 = vsel %vm3482_vm13, %v3512_v35, %v3508_v26 }
 0x4a1   : > { %v3518_v6 = vsel %vm3489_vm14, %v3517_v58, %v3513_v37 }
 0x4a2   : > { %v3536_v22 = vsel %vm3535_vm0, %v3518_v6, %v3534_v63 }
 0x4a5   : > { %v3451_v4 = vpop.xlane.xlu0 %3450 }
 0x4a6   : > { %v3522_v25 = vrot.slane %v3451_v4, %v3475_v0 }
 0x4ad   : > { %v3457_v46 = vpop.xlane.xlu0 %3456 }
 0x4ae   : > { %v3531_v54 = vrot.slane %v3457_v46, %v3487_v48 }
 0x4b0   : > { %v3454_v41 = vpop.xlane.xlu1 %3453 }
 0x4b1   : > { %v3526_v21 = vrot.slane %v3454_v41, %v3480_v2 }
 0x4b3   : > { %v3527_v23 = vsel %vm3482_vm13, %v3526_v21, %v3522_v25 }
 0x4b4   : > { %v3532_v14 = vsel %vm3489_vm14, %v3531_v54, %v3527_v23 }
 0x4b5   : > { %v3538_v36 = vsel %vm3537_vm1, %v3532_v14, %v3536_v22 }
 0x4b6   : > { %v3541_v59 = vsel %vm3540_vm2, %v3538_v36, 0.0 }
 0x4b7   : > { %3542 = vadd.xlane.f32.xlu1 %v3541_v59 }
 0x540   : > { %v3543_v11 = vpop.xlane.xlu1 %3542 }
 0x541   : > { %v3548_v27 = vrot.slane %v3543_v11, %v3547_v24 }
 0x543   : > { %3551 = vst.msk [vmem:[%s202_s28] sm:$0x1] %vm3550_vm3, %v3548_v27 }
 0x544   : > { %3886 = shalt.err (!%p3883_p4)
}
 0x545   : > { %s3887_s4 = scalar_lea.hbm %s3563_s23, 16  ;;  %s3891_s3 = scalar_lea.hbm %s7083_s2, 32 }
 0x546   : > { %p3888_p9 = scmp.ne.s32.totalorder %s3563_s23, %s3887_s4  ;;  %p3892_p5 = scmp.lt.s32.totalorder %s3563_s23, %s7083_s2 }
 0x547   : > { %p3893_p8 = scmp.lt.s32.totalorder %s3891_s3, %s3887_s4 }
 0x548   : > { %p3889_p11 = pnand %p3888_p9, %p7683_p1 }
 0x549   : > { %p3894_p6 = por %p3893_p8, %p3892_p5 }
 0x54a   : > { %p3890_p3 = pneg %p3889_p11 }
 0x54c   : > { %p3895_p13 = pnand %p3894_p6, %p3890_p3 }
 0x54e   : > { %3898 = shalt.err (!%p3895_p13)
}
 0x54f   : > { %3679 = dma.vmem_to_hbm [thread:$0]  (%p7683_p1), %s3566_s24, 16, %s3563_s23, %s3553_s25  }
 0x550 PF: > { %s3577_s5 = sand.u32 1, %s3929_s9   ;;  %p7684_p12 = scmp.ne.s32.totalorder %s7182_s22, 0 }
 0x551   : > { %p7685_p7 = scmp.ge.s32.totalorder %s3941_s12, 2  ;;  %s3578_s6 = scalar_lea.sflag [#allocation5], %s3577_s5 }
 0x553   : > { %p3689_p10 = pnand %p7685_p7, %p7684_p12 }
 0x555   : > { %p3690_p0 = pneg %p3689_p10 }
 0x557   : > { %3924 = dma.done.wait (%p3690_p0), %s3578_s6, 16  }
 0x558   : > { %3926 = vsyncadd (%p3690_p0), %s3578_s6, 4294967280  ;;  %p18_p2 = scmp.ge.s32.totalorder %s3993_s15, 4   ;;  %s7686_s9 = smov %s3933_s10 }
 0x559   : > { %s7687_s10 = smov %s3937_s11  ;;  %s7688_s11 = smov %s4005_s18 }
 0x55a   : > { %s7689_s12 = smov %s3993_s15  ;;  %20 = sbr.rel (!%p18_p2) target bundleno = 7 (0x7), region = 90 }
 0x55f   :  { %3582 = vsyncpa [#allocation4], 1 }
 0x560   :  { %3584 = vsyncpa [#allocation4 + $0x1], 1 }
 0x561   :  { %3585 = vsyncpa [#allocation7], 1 }
 0x562   :  { %3587 = vsyncpa [#allocation7 + $0x1], 1 }
 0x563   :  { %3588 = vsyncpa [#allocation5], 1 }
 0x564   :  { %3590 = vsyncpa [#allocation5 + $0x1], 1 }

</bundles_post_ra>
